<compile_context>
chip_gen: v7x
topology: tpu7x:2x2x1
jax: 0.10.0
libtpu: 0.0.40
codegen_flags: <defaults>
</compile_context>

<pallas_src>
import math
import functools

import jax
import jax.numpy as jnp
from jax.experimental import pallas as pl
from jax.experimental.pallas import tpu as pltpu

# ----------------------------- config ---------------------------------------
D_MODEL = 32          # config.dim_model
N_HEADS = 4           # config.n_heads
DIM_FF = 64           # config.dim_feedforward
NUM_BLOCKS = 2        # config.num_blocks
ARM_CLS = 2           # config.num_cls_tokens_arm
CAM_CLS = 2           # config.num_cls_tokens_image
LN_EPS = 1e-5

SEG1 = ARM_CLS + 7                     # 9 tokens
SEG2 = ARM_CLS + 7                     # 9 tokens
SEG3 = CAM_CLS + 4                     # 6 tokens (2 cam CLS + 4 image tokens)
S_TOTAL = SEG1 + SEG2 + SEG3           # 24
NUM_LAYERS = 2 * NUM_BLOCKS            # stacked: [seg_0, seg_1, cross_0, cross_1]


def _layer_norm(y, g, b):
    mu = jnp.mean(y, axis=-1, keepdims=True)
    var = jnp.mean((y - mu) ** 2, axis=-1, keepdims=True)
    return (y - mu) * jax.lax.rsqrt(var + LN_EPS) * g + b


def _positional_encoding(d_model, max_len):
    position = jnp.arange(max_len, dtype=jnp.float32)[:, None]
    div_term = jnp.exp(jnp.arange(0, d_model, 2, dtype=jnp.float32)
                       * (-math.log(10000.0) / d_model))
    pe = jnp.zeros((max_len, d_model), jnp.float32)
    pe = pe.at[:, 0::2].set(jnp.sin(position * div_term))
    pe = pe.at[:, 1::2].set(jnp.cos(position * div_term))
    return pe


# ----------------------------- fused Pallas kernel ---------------------------
def fused_interact_kernel(x_ref, pe_ref, w_in_ref, w_o_ref, w1_ref, w2_ref,
                          vec_ref, o_ref, x_scr, cls_scr, *,
                          n_heads, num_blocks, arm_cls, cam_cls, n1, n2):
    D = D_MODEL
    F = DIM_FF
    dh = D // n_heads
    inv_sqrt_dh = 1.0 / math.sqrt(dh)

    # PE quirk of the original module: after 'b s d -> s b d', encoding[:, :B]
    # indexes the *batch* dim, i.e. x[b, s, :] += pe[b, :].
    x_scr[...] = x_ref[0] + pe_ref[0]
    s_total = x_scr.shape[0]

    # Compile-time block-diagonal mask: shared SegmentWiseEncoder applied to
    # the 3 segments separately == one attention over all tokens with the
    # cross-segment scores pushed to -inf (their probs underflow to exact 0).
    row = jax.lax.broadcasted_iota(jnp.int32, (s_total, s_total), 0)
    col = jax.lax.broadcasted_iota(jnp.int32, (s_total, s_total), 1)

    def seg_of(t):
        return (t >= n1).astype(jnp.int32) + (t >= n2).astype(jnp.int32)

    seg_mask = jnp.where(seg_of(row) == seg_of(col), 0.0, -1e30).astype(jnp.float32)

    def encoder_layer(h_in, l, mask):
        """Post-norm transformer layer (nn.MultiheadAttention + ReLU FFN).
        `l` is a static index into the stacked per-layer weights."""
        w_in = w_in_ref[l]                         # (D, 3D)      bf16
        w_o = w_o_ref[l]                           # (H, dh, D)   bf16 (head-split)
        w1 = w1_ref[l]                             # (D, F)       bf16
        w2 = w2_ref[l]                             # (F, D)       bf16
        vec = vec_ref[l]                           # (8, 128)     f32
        b_in = vec[0:1, :3 * D]
        b_o = vec[1:2, :D]
        b1 = vec[2:3, :F]
        b2 = vec[3:4, :D]
        g1, be1 = vec[4:5, :D], vec[5:6, :D]
        g2, be2 = vec[6:7, :D], vec[7:8, :D]

        # QKV projection: one (S,D)x(D,3D) GEMM, bf16 operands, fp32 accumulate.
        qkv = jnp.dot(h_in.astype(jnp.bfloat16), w_in,
                      preferred_element_type=jnp.float32) + b_in

        # Head-major (H, S, dh) operands for batched attention einsums.
        def heads(base):
            return jnp.stack(
                [qkv[:, base + h * dh: base + (h + 1) * dh]
                 for h in range(n_heads)], axis=0).astype(jnp.bfloat16)

        q3, k3, v3 = heads(0), heads(D), heads(2 * D)

        s = jnp.einsum('hqd,hkd->hqk', q3, k3,
                       preferred_element_type=jnp.float32) * inv_sqrt_dh
        if mask is not None:
            s = s + mask[None, :, :]
        s = s - jnp.max(s, axis=-1, keepdims=True)
        p = jnp.exp(s)
        p = p * pl.reciprocal(jnp.sum(p, axis=-1, keepdims=True), approx=True)

        ctx = jnp.einsum('hqk,hkd->hqd', p.astype(jnp.bfloat16), v3,
                         preferred_element_type=jnp.float32)
        # Output projection with head-split W_o:  sum_h ctx_h @ W_o[h]
        # (identical to concat(heads) @ W_o, without the lane-dim concat).
        attn_out = jnp.sum(
            jnp.einsum('hqd,hde->hqe', ctx.astype(jnp.bfloat16), w_o,
                       preferred_element_type=jnp.float32), axis=0) + b_o

        x1 = _layer_norm(h_in + attn_out, g1, be1)
        hid = jnp.dot(x1.astype(jnp.bfloat16), w1,
                      preferred_element_type=jnp.float32) + b1
        hid = jnp.maximum(hid, 0.0)
        ff = jnp.dot(hid.astype(jnp.bfloat16), w2,
                     preferred_element_type=jnp.float32) + b2
        return _layer_norm(x1 + ff, g2, be2)

    for i in range(num_blocks):                    # static unroll (2 blocks)
        # Shared SegmentWiseEncoder over all 3 segments at once.
        u = encoder_layer(x_scr[...], i, seg_mask)
        x_scr[...] = u
        # Gather the CLS tokens of the 3 segments.
        cls_scr[0:arm_cls, :] = u[0:arm_cls]
        cls_scr[arm_cls:2 * arm_cls, :] = u[n1:n1 + arm_cls]
        cls_scr[2 * arm_cls:, :] = u[n2:n2 + cam_cls]
        # CrossSegmentEncoder over the concatenated CLS tokens.
        cls = encoder_layer(cls_scr[...], num_blocks + i, None)
        # CLS write-back into the segments.
        x_scr[0:arm_cls, :] = cls[0:arm_cls]
        x_scr[n1:n1 + arm_cls, :] = cls[arm_cls:2 * arm_cls]
        x_scr[n2:n2 + cam_cls, :] = cls[2 * arm_cls:]

    o_ref[0, :, :] = x_scr[...]


@jax.jit
def interact_forward_pallas(segments_bsd, packed):
    """segments_bsd: (B, S, D).  Returns (S, B, D) like the PyTorch module."""
    B, S, D = segments_bsd.shape
    L = NUM_LAYERS
    pe = _positional_encoding(D, 5000)[:B][:, None, :]        # (B, 1, D) quirk

    kernel = functools.partial(
        fused_interact_kernel, n_heads=N_HEADS, num_blocks=NUM_BLOCKS,
        arm_cls=ARM_CLS, cam_cls=CAM_CLS, n1=SEG1, n2=SEG1 + SEG2)

    out_bsd = pl.pallas_call(
        kernel,
        out_shape=jax.ShapeDtypeStruct((B, S, D), jnp.float32),
        grid=(B,),
        in_specs=[
            pl.BlockSpec((1, S, D), lambda b: (b, 0, 0)),                   # x
            pl.BlockSpec((1, 1, D), lambda b: (b, 0, 0)),                   # pe
            pl.BlockSpec((L, D, 3 * D), lambda b: (0, 0, 0)),               # W_in
            pl.BlockSpec((L, N_HEADS, D // N_HEADS, D),
                         lambda b: (0, 0, 0, 0)),                           # W_o (head-split)
            pl.BlockSpec((L, D, DIM_FF), lambda b: (0, 0, 0)),              # W1
            pl.BlockSpec((L, DIM_FF, D), lambda b: (0, 0, 0)),              # W2
            pl.BlockSpec((L, 8, 128), lambda b: (0, 0, 0)),                 # biases + LN
        ],
        out_specs=pl.BlockSpec((1, S, D), lambda b: (b, 0, 0)),
        scratch_shapes=[
            pltpu.VMEM((S, D), jnp.float32),                                # residual stream
            pltpu.VMEM((2 * ARM_CLS + CAM_CLS, D), jnp.float32),            # CLS buffer
        ],
        compiler_params=pltpu.CompilerParams(
            dimension_semantics=("parallel",)),
    )(segments_bsd, pe, packed['w_in'], packed['w_o'], packed['w1'],
      packed['w2'], packed['vec'])

    return jnp.transpose(out_bsd, (1, 0, 2))       # (S, B, D): module's output layout


# ----------------------------- pure-JAX fp32 reference -----------------------
_HI = jax.lax.Precision.HIGHEST


def _ref_encoder_layer(x, p):
    """x: (S, B, D) seq-first, fp32, literal nn.MultiheadAttention semantics."""
    S, B, D = x.shape
    dh = D // N_HEADS
    qkv = jnp.einsum('sbd,df->sbf', x, p['w_in_t'], precision=_HI) + p['b_in']
    q = qkv[..., :D].reshape(S, B, N_HEADS, dh)
    k = qkv[..., D:2 * D].reshape(S, B, N_HEADS, dh)
    v = qkv[..., 2 * D:].reshape(S, B, N_HEADS, dh)
    s = jnp.einsum('qbhd,kbhd->bhqk', q, k, precision=_HI) / math.sqrt(dh)
    a = jax.nn.softmax(s, axis=-1)
    ctx = jnp.einsum('bhqk,kbhd->qbhd', a, v, precision=_HI).reshape(S, B, D)
    attn_out = jnp.einsum('sbd,df->sbf', ctx, p['w_o_t'], precision=_HI) + p['b_o']
    x1 = _layer_norm(x + attn_out, p['g1'], p['be1'])
    h = jnp.maximum(jnp.einsum('sbd,df->sbf', x1, p['w1_t'], precision=_HI)
                    + p['b1'], 0.0)
    ff = jnp.einsum('sbf,fd->sbd', h, p['w2_t'], precision=_HI) + p['b2']
    return _layer_norm(x1 + ff, p['g2'], p['be2'])


def interact_forward_ref(segments_bsd, params):
    x = jnp.transpose(segments_bsd, (1, 0, 2))                 # 'b s d -> s b d'
    S, B, D = x.shape
    pe = _positional_encoding(D, 5000)
    x = x + pe[:B][None, :, :]                                 # PE batch-dim quirk
    n1, n2 = SEG1, SEG1 + SEG2
    seg1, seg2, seg3 = x[:n1], x[n1:n2], x[n2:]
    for i in range(NUM_BLOCKS):
        sp, cp = params['segment'][i], params['cross'][i]
        u1 = _ref_encoder_layer(seg1, sp)
        u2 = _ref_encoder_layer(seg2, sp)
        u3 = _ref_encoder_layer(seg3, sp)
        cls_in = jnp.concatenate([u1[:ARM_CLS], u2[:ARM_CLS], u3[:CAM_CLS]], axis=0)
        cls = _ref_encoder_layer(cls_in, cp)
        seg1 = jnp.concatenate([cls[:ARM_CLS], u1[ARM_CLS:]], axis=0)
        seg2 = jnp.concatenate([cls[ARM_CLS:2 * ARM_CLS], u2[ARM_CLS:]], axis=0)
        seg3 = jnp.concatenate([cls[2 * ARM_CLS:], u3[CAM_CLS:]], axis=0)
    return jnp.concatenate([seg1, seg2, seg3], axis=0)         # (S, B, D)


# ----------------------------- params ----------------------------------------
def init_layer_params(key):
    """fp32 params; weights pre-transposed to (in, out) for x @ W + b."""
    ks = jax.random.split(key, 10)
    w_in = 0.05 * jax.random.normal(ks[0], (3 * D_MODEL, D_MODEL), jnp.float32)
    b_in = 0.02 * jax.random.normal(ks[1], (3 * D_MODEL,), jnp.float32)
    w_o = 0.05 * jax.random.normal(ks[2], (D_MODEL, D_MODEL), jnp.float32)
    b_o = 0.02 * jax.random.normal(ks[3], (D_MODEL,), jnp.float32)
    w1 = 0.05 * jax.random.normal(ks[4], (DIM_FF, D_MODEL), jnp.float32)
    b1 = 0.02 * jax.random.normal(ks[5], (DIM_FF,), jnp.float32)
    w2 = 0.05 * jax.random.normal(ks[6], (D_MODEL, DIM_FF), jnp.float32)
    b2 = 0.02 * jax.random.normal(ks[7], (D_MODEL,), jnp.float32)
    g1 = 1.0 + 0.05 * jax.random.normal(ks[8], (D_MODEL,), jnp.float32)
    g2 = 1.0 + 0.05 * jax.random.normal(ks[9], (D_MODEL,), jnp.float32)
    return dict(w_in_t=w_in.T, b_in=b_in, w_o_t=w_o.T, b_o=b_o,
                w1_t=w1.T, b1=b1, w2_t=w2.T, b2=b2,
                g1=g1, be1=jnp.zeros((D_MODEL,), jnp.float32),
                g2=g2, be2=jnp.zeros((D_MODEL,), jnp.float32))


def init_params(key):
    keys = jax.random.split(key, 2 * NUM_BLOCKS)
    return {'segment': [init_layer_params(keys[i]) for i in range(NUM_BLOCKS)],
            'cross': [init_layer_params(keys[NUM_BLOCKS + i]) for i in range(NUM_BLOCKS)]}


def pack_params(params):
    """Stack per-layer weights (order: seg_0..seg_{B-1}, cross_0..cross_{B-1}).
    Matrices -> bf16 (MXU operands); biases + LN affine -> one fp32 slab."""
    layers = list(params['segment']) + list(params['cross'])
    L = len(layers)
    dh = D_MODEL // N_HEADS
    w_in = jnp.stack([p['w_in_t'] for p in layers]).astype(jnp.bfloat16)
    w_o = jnp.stack([p['w_o_t'].reshape(N_HEADS, dh, D_MODEL) for p in layers]
                    ).astype(jnp.bfloat16)
    w1 = jnp.stack([p['w1_t'] for p in layers]).astype(jnp.bfloat16)
    w2 = jnp.stack([p['w2_t'] for p in layers]).astype(jnp.bfloat16)
    vec = jnp.zeros((L, 8, 128), jnp.float32)
    for i, p in enumerate(layers):
        vec = vec.at[i, 0, :3 * D_MODEL].set(p['b_in'])
        vec = vec.at[i, 1, :D_MODEL].set(p['b_o'])
        vec = vec.at[i, 2, :DIM_FF].set(p['b1'])
        vec = vec.at[i, 3, :D_MODEL].set(p['b2'])
        vec = vec.at[i, 4, :D_MODEL].set(p['g1'])
        vec = vec.at[i, 5, :D_MODEL].set(p['be1'])
        vec = vec.at[i, 6, :D_MODEL].set(p['g2'])
        vec = vec.at[i, 7, :D_MODEL].set(p['be2'])
    return dict(w_in=w_in, w_o=w_o, w1=w1, w2=w2, vec=vec)


# ----------------------------- main -------------------------------------------
if __name__ == "__main__":
    root = jax.random.PRNGKey(0)
    k_x, k_p = jax.random.split(root)

    batch = 2
    seq = S_TOTAL                                   # 24 = (2+7) + (2+7) + (2+4)
    segments = jax.random.normal(k_x, (batch, seq, D_MODEL), jnp.float32)

    params = init_params(k_p)
    packed = pack_params(params)

    out = interact_forward_pallas(segments, packed)
    out = jax.block_until_ready(out)

    ref = interact_forward_ref(segments, params)
    ref = jax.block_until_ready(ref)

    assert out.shape == (seq, batch, D_MODEL), out.shape
    max_err = float(jnp.max(jnp.abs(out - ref)))
    # bf16 MXU operands with fp32 accumulation (fp32 softmax/LN) vs fp32 ref.
    assert jnp.allclose(out, ref, atol=2e-2, rtol=2e-2), max_err

    print("KERNEL_OK")
</pallas_src>

<mosaic_0001>
module attributes {stable_mosaic.version = 11 : i64} {
  func.func @fused_interact_kernel(%arg0: i32, %arg1: memref<1x24x32xf32, #tpu.memory_space<vmem>>, %arg2: memref<1x1x32xf32, #tpu.memory_space<vmem>>, %arg3: memref<4x32x96xbf16, #tpu.memory_space<vmem>>, %arg4: memref<4x4x8x32xbf16, #tpu.memory_space<vmem>>, %arg5: memref<4x32x64xbf16, #tpu.memory_space<vmem>>, %arg6: memref<4x64x32xbf16, #tpu.memory_space<vmem>>, %arg7: memref<4x8x128xf32, #tpu.memory_space<vmem>>, %arg8: memref<1x24x32xf32, #tpu.memory_space<vmem>>, %arg9: memref<24x32xf32, #tpu.memory_space<vmem>>, %arg10: memref<6x32xf32, #tpu.memory_space<vmem>>) attributes {dimension_semantics = [#tpu.dimension_semantics<parallel>], iteration_bounds = array<i64: 2>, scalar_prefetch = 0 : i64, scratch_operands = 2 : i64, tpu.core_type = #tpu.core_type<tc>, window_params = [{transform_indices = @transform_0, window_bounds = array<i64: 1, 24, 32>}, {transform_indices = @transform_1, window_bounds = array<i64: 1, 1, 32>}, {pipeline_mode = #tpu.pipeline_mode<synchronous>, transform_indices = @transform_2, window_bounds = array<i64: 4, 32, 96>}, {pipeline_mode = #tpu.pipeline_mode<synchronous>, transform_indices = @transform_3, window_bounds = array<i64: 4, 4, 8, 32>}, {pipeline_mode = #tpu.pipeline_mode<synchronous>, transform_indices = @transform_4, window_bounds = array<i64: 4, 32, 64>}, {pipeline_mode = #tpu.pipeline_mode<synchronous>, transform_indices = @transform_5, window_bounds = array<i64: 4, 64, 32>}, {pipeline_mode = #tpu.pipeline_mode<synchronous>, transform_indices = @transform_6, window_bounds = array<i64: 4, 8, 128>}, {transform_indices = @transform_7, window_bounds = array<i64: 1, 24, 32>}]} {
    %c0 = arith.constant 0 : index
    %c0_0 = arith.constant 0 : index
    %c0_1 = arith.constant 0 : index
    %0 = vector.load %arg1[%c0, %c0_0, %c0_1] : memref<1x24x32xf32, #tpu.memory_space<vmem>>, vector<1x24x32xf32>
    %1 = vector.shape_cast %0 : vector<1x24x32xf32> to vector<24x32xf32>
    %c0_2 = arith.constant 0 : index
    %c0_3 = arith.constant 0 : index
    %c0_4 = arith.constant 0 : index
    %2 = vector.load %arg2[%c0_2, %c0_3, %c0_4] : memref<1x1x32xf32, #tpu.memory_space<vmem>>, vector<1x1x32xf32>
    %3 = vector.shape_cast %2 : vector<1x1x32xf32> to vector<1x32xf32>
    %4 = vector.broadcast %3 : vector<1x32xf32> to vector<24x32xf32>
    %5 = arith.addf %1, %4 : vector<24x32xf32>
    %c0_5 = arith.constant 0 : index
    %c0_6 = arith.constant 0 : index
    %6 = vector.load %arg9[%c0_5, %c0_6] : memref<24x32xf32, #tpu.memory_space<vmem>>, vector<24x32xf32>
    tpu.vector_store %arg9[%c0_5, %c0_6], %5 {strides = array<i32>} : memref<24x32xf32, #tpu.memory_space<vmem>>, vector<24x32xf32>,
    %7 = tpu.iota {dimensions = array<i32: 0>} : vector<24x24xi32>
    %8 = tpu.iota {dimensions = array<i32: 1>} : vector<24x24xi32>
    %c9_i32 = arith.constant 9 : i32
    %9 = vector.broadcast %c9_i32 : i32 to vector<24x24xi32>
    %10 = arith.cmpi sge, %7, %9 : vector<24x24xi32>
    %11 = arith.extui %10 : vector<24x24xi1> to vector<24x24xi32>
    %c18_i32 = arith.constant 18 : i32
    %12 = vector.broadcast %c18_i32 : i32 to vector<24x24xi32>
    %13 = arith.cmpi sge, %7, %12 : vector<24x24xi32>
    %14 = arith.extui %13 : vector<24x24xi1> to vector<24x24xi32>
    %15 = arith.addi %11, %14 : vector<24x24xi32>
    %c9_i32_7 = arith.constant 9 : i32
    %16 = vector.broadcast %c9_i32_7 : i32 to vector<24x24xi32>
    %17 = arith.cmpi sge, %8, %16 : vector<24x24xi32>
    %18 = arith.extui %17 : vector<24x24xi1> to vector<24x24xi32>
    %c18_i32_8 = arith.constant 18 : i32
    %19 = vector.broadcast %c18_i32_8 : i32 to vector<24x24xi32>
    %20 = arith.cmpi sge, %8, %19 : vector<24x24xi32>
    %21 = arith.extui %20 : vector<24x24xi1> to vector<24x24xi32>
    %22 = arith.addi %18, %21 : vector<24x24xi32>
    %23 = arith.cmpi eq, %15, %22 : vector<24x24xi32>
    %cst = arith.constant 0.000000e+00 : f32
    %cst_9 = arith.constant -1.000000e+30 : f32
    %24 = vector.broadcast %cst : f32 to vector<24x24xf32>
    %25 = vector.broadcast %cst_9 : f32 to vector<24x24xf32>
    %26 = arith.select %23, %24, %25 : vector<24x24xi1>, vector<24x24xf32>
    %c0_10 = arith.constant 0 : index
    %c0_11 = arith.constant 0 : index
    %27 = vector.load %arg9[%c0_10, %c0_11] : memref<24x32xf32, #tpu.memory_space<vmem>>, vector<24x32xf32>
    %c0_12 = arith.constant 0 : index
    %c0_13 = arith.constant 0 : index
    %c0_14 = arith.constant 0 : index
    %28 = vector.load %arg3[%c0_12, %c0_13, %c0_14] : memref<4x32x96xbf16, #tpu.memory_space<vmem>>, vector<1x32x96xbf16>
    %29 = vector.shape_cast %28 : vector<1x32x96xbf16> to vector<32x96xbf16>
    %c0_15 = arith.constant 0 : index
    %c0_16 = arith.constant 0 : index
    %c0_17 = arith.constant 0 : index
    %c0_18 = arith.constant 0 : index
    %30 = vector.load %arg4[%c0_15, %c0_16, %c0_17, %c0_18] : memref<4x4x8x32xbf16, #tpu.memory_space<vmem>>, vector<1x4x8x32xbf16>
    %31 = vector.shape_cast %30 : vector<1x4x8x32xbf16> to vector<4x8x32xbf16>
    %c0_19 = arith.constant 0 : index
    %c0_20 = arith.constant 0 : index
    %c0_21 = arith.constant 0 : index
    %32 = vector.load %arg5[%c0_19, %c0_20, %c0_21] : memref<4x32x64xbf16, #tpu.memory_space<vmem>>, vector<1x32x64xbf16>
    %33 = vector.shape_cast %32 : vector<1x32x64xbf16> to vector<32x64xbf16>
    %c0_22 = arith.constant 0 : index
    %c0_23 = arith.constant 0 : index
    %c0_24 = arith.constant 0 : index
    %34 = vector.load %arg6[%c0_22, %c0_23, %c0_24] : memref<4x64x32xbf16, #tpu.memory_space<vmem>>, vector<1x64x32xbf16>
    %35 = vector.shape_cast %34 : vector<1x64x32xbf16> to vector<64x32xbf16>
    %c0_25 = arith.constant 0 : index
    %c0_26 = arith.constant 0 : index
    %c0_27 = arith.constant 0 : index
    %36 = vector.load %arg7[%c0_25, %c0_26, %c0_27] : memref<4x8x128xf32, #tpu.memory_space<vmem>>, vector<1x8x128xf32>
    %37 = vector.shape_cast %36 : vector<1x8x128xf32> to vector<8x128xf32>
    %38 = vector.extract_strided_slice %37 {offsets = [0, 0], sizes = [1, 96], strides = [1, 1]} : vector<8x128xf32> to vector<1x96xf32>
    %39 = vector.extract_strided_slice %37 {offsets = [1, 0], sizes = [1, 32], strides = [1, 1]} : vector<8x128xf32> to vector<1x32xf32>
    %40 = vector.extract_strided_slice %37 {offsets = [2, 0], sizes = [1, 64], strides = [1, 1]} : vector<8x128xf32> to vector<1x64xf32>
    %41 = vector.extract_strided_slice %37 {offsets = [3, 0], sizes = [1, 32], strides = [1, 1]} : vector<8x128xf32> to vector<1x32xf32>
    %42 = vector.extract_strided_slice %37 {offsets = [4, 0], sizes = [1, 32], strides = [1, 1]} : vector<8x128xf32> to vector<1x32xf32>
    %43 = vector.extract_strided_slice %37 {offsets = [5, 0], sizes = [1, 32], strides = [1, 1]} : vector<8x128xf32> to vector<1x32xf32>
    %44 = vector.extract_strided_slice %37 {offsets = [6, 0], sizes = [1, 32], strides = [1, 1]} : vector<8x128xf32> to vector<1x32xf32>
    %45 = vector.extract_strided_slice %37 {offsets = [7, 0], sizes = [1, 32], strides = [1, 1]} : vector<8x128xf32> to vector<1x32xf32>
    %46 = arith.truncf %27 : vector<24x32xf32> to vector<24x32xbf16>
    %cst_28 = arith.constant dense<0.000000e+00> : vector<24x96xf32>
    %47 = tpu.matmul %46, %29, %cst_28 {dimension_numbers = #tpu.dot_dimension_numbers<[1], [0], [0], [1], [0, 0, 1, 1], [], []>} : vector<24x32xbf16>, vector<32x96xbf16>, vector<24x96xf32> -> vector<24x96xf32>
    %48 = vector.broadcast %38 : vector<1x96xf32> to vector<24x96xf32>
    %49 = arith.addf %47, %48 : vector<24x96xf32>
    %50 = vector.extract_strided_slice %49 {offsets = [0, 0], sizes = [24, 8], strides = [1, 1]} : vector<24x96xf32> to vector<24x8xf32>
    %51 = vector.extract_strided_slice %49 {offsets = [0, 8], sizes = [24, 8], strides = [1, 1]} : vector<24x96xf32> to vector<24x8xf32>
    %52 = vector.extract_strided_slice %49 {offsets = [0, 16], sizes = [24, 8], strides = [1, 1]} : vector<24x96xf32> to vector<24x8xf32>
    %53 = vector.extract_strided_slice %49 {offsets = [0, 24], sizes = [24, 8], strides = [1, 1]} : vector<24x96xf32> to vector<24x8xf32>
    %54 = vector.shape_cast %50 : vector<24x8xf32> to vector<1x24x8xf32>
    %55 = vector.shape_cast %51 : vector<24x8xf32> to vector<1x24x8xf32>
    %56 = vector.shape_cast %52 : vector<24x8xf32> to vector<1x24x8xf32>
    %57 = vector.shape_cast %53 : vector<24x8xf32> to vector<1x24x8xf32>
    %58 = tpu.concatenate %54, %55, %56, %57 in 0 : vector<1x24x8xf32>, vector<1x24x8xf32>, vector<1x24x8xf32>, vector<1x24x8xf32> -> vector<4x24x8xf32>
    %59 = arith.truncf %58 : vector<4x24x8xf32> to vector<4x24x8xbf16>
    %60 = vector.extract_strided_slice %49 {offsets = [0, 32], sizes = [24, 8], strides = [1, 1]} : vector<24x96xf32> to vector<24x8xf32>
    %61 = vector.extract_strided_slice %49 {offsets = [0, 40], sizes = [24, 8], strides = [1, 1]} : vector<24x96xf32> to vector<24x8xf32>
    %62 = vector.extract_strided_slice %49 {offsets = [0, 48], sizes = [24, 8], strides = [1, 1]} : vector<24x96xf32> to vector<24x8xf32>
    %63 = vector.extract_strided_slice %49 {offsets = [0, 56], sizes = [24, 8], strides = [1, 1]} : vector<24x96xf32> to vector<24x8xf32>
    %64 = vector.shape_cast %60 : vector<24x8xf32> to vector<1x24x8xf32>
    %65 = vector.shape_cast %61 : vector<24x8xf32> to vector<1x24x8xf32>
    %66 = vector.shape_cast %62 : vector<24x8xf32> to vector<1x24x8xf32>
    %67 = vector.shape_cast %63 : vector<24x8xf32> to vector<1x24x8xf32>
    %68 = tpu.concatenate %64, %65, %66, %67 in 0 : vector<1x24x8xf32>, vector<1x24x8xf32>, vector<1x24x8xf32>, vector<1x24x8xf32> -> vector<4x24x8xf32>
    %69 = arith.truncf %68 : vector<4x24x8xf32> to vector<4x24x8xbf16>
    %70 = vector.extract_strided_slice %49 {offsets = [0, 64], sizes = [24, 8], strides = [1, 1]} : vector<24x96xf32> to vector<24x8xf32>
    %71 = vector.extract_strided_slice %49 {offsets = [0, 72], sizes = [24, 8], strides = [1, 1]} : vector<24x96xf32> to vector<24x8xf32>
    %72 = vector.extract_strided_slice %49 {offsets = [0, 80], sizes = [24, 8], strides = [1, 1]} : vector<24x96xf32> to vector<24x8xf32>
    %73 = vector.extract_strided_slice %49 {offsets = [0, 88], sizes = [24, 8], strides = [1, 1]} : vector<24x96xf32> to vector<24x8xf32>
    %74 = vector.shape_cast %70 : vector<24x8xf32> to vector<1x24x8xf32>
    %75 = vector.shape_cast %71 : vector<24x8xf32> to vector<1x24x8xf32>
    %76 = vector.shape_cast %72 : vector<24x8xf32> to vector<1x24x8xf32>
    %77 = vector.shape_cast %73 : vector<24x8xf32> to vector<1x24x8xf32>
    %78 = tpu.concatenate %74, %75, %76, %77 in 0 : vector<1x24x8xf32>, vector<1x24x8xf32>, vector<1x24x8xf32>, vector<1x24x8xf32> -> vector<4x24x8xf32>
    %79 = arith.truncf %78 : vector<4x24x8xf32> to vector<4x24x8xbf16>
    "tpu.trace_start"() <{level = 10 : i32, message = "hqd,hkd->hqk"}> : () -> ()
    %cst_29 = arith.constant dense<0.000000e+00> : vector<4x24x24xf32>
    %80 = tpu.matmul %59, %69, %cst_29 {dimension_numbers = #tpu.dot_dimension_numbers<[2], [2], [1], [1], [0, 0, 0, 1, 1, 1], [0], [0]>} : vector<4x24x8xbf16>, vector<4x24x8xbf16>, vector<4x24x24xf32> -> vector<4x24x24xf32>
    "tpu.trace_stop"() : () -> ()
    %cst_30 = arith.constant 0.353553385 : f32
    %81 = vector.broadcast %cst_30 : f32 to vector<4x24x24xf32>
    %82 = arith.mulf %80, %81 : vector<4x24x24xf32>
    %83 = vector.shape_cast %26 : vector<24x24xf32> to vector<1x24x24xf32>
    %84 = vector.broadcast %83 : vector<1x24x24xf32> to vector<4x24x24xf32>
    %85 = arith.addf %82, %84 : vector<4x24x24xf32>
    %cst_31 = arith.constant dense<0xFF800000> : vector<4x24xf32>
    %86 = vector.multi_reduction <maximumf>, %85, %cst_31 [2] : vector<4x24x24xf32> to vector<4x24xf32>
    %87 = vector.shape_cast %86 : vector<4x24xf32> to vector<4x24x1xf32>
    %88 = vector.broadcast %87 : vector<4x24x1xf32> to vector<4x24x24xf32>
    %89 = arith.subf %85, %88 : vector<4x24x24xf32>
    %90 = math.exp %89 : vector<4x24x24xf32>
    %cst_32 = arith.constant dense<0.000000e+00> : vector<4x24xf32>
    %91 = vector.multi_reduction <add>, %90, %cst_32 [2] : vector<4x24x24xf32> to vector<4x24xf32>
    %92 = vector.shape_cast %91 : vector<4x24xf32> to vector<4x24x1xf32>
    %93 = tpu.reciprocal %92 {approx = true} : vector<4x24x1xf32> -> vector<4x24x1xf32>
    %94 = vector.broadcast %93 : vector<4x24x1xf32> to vector<4x24x24xf32>
    %95 = arith.mulf %90, %94 : vector<4x24x24xf32>
    %96 = arith.truncf %95 : vector<4x24x24xf32> to vector<4x24x24xbf16>
    "tpu.trace_start"() <{level = 10 : i32, message = "hqk,hkd->hqd"}> : () -> ()
    %cst_33 = arith.constant dense<0.000000e+00> : vector<4x24x8xf32>
    %97 = tpu.matmul %96, %79, %cst_33 {dimension_numbers = #tpu.dot_dimension_numbers<[2], [1], [1], [2], [0, 0, 0, 1, 1, 2], [0], [0]>} : vector<4x24x24xbf16>, vector<4x24x8xbf16>, vector<4x24x8xf32> -> vector<4x24x8xf32>
    "tpu.trace_stop"() : () -> ()
    %98 = arith.truncf %97 : vector<4x24x8xf32> to vector<4x24x8xbf16>
    "tpu.trace_start"() <{level = 10 : i32, message = "hqd,hde->hqe"}> : () -> ()
    %cst_34 = arith.constant dense<0.000000e+00> : vector<4x24x32xf32>
    %99 = tpu.matmul %98, %31, %cst_34 {dimension_numbers = #tpu.dot_dimension_numbers<[2], [1], [1], [2], [0, 0, 0, 1, 1, 2], [0], [0]>} : vector<4x24x8xbf16>, vector<4x8x32xbf16>, vector<4x24x32xf32> -> vector<4x24x32xf32>
    "tpu.trace_stop"() : () -> ()
    %cst_35 = arith.constant dense<0.000000e+00> : vector<24x32xf32>
    %100 = vector.multi_reduction <add>, %99, %cst_35 [0] : vector<4x24x32xf32> to vector<24x32xf32>
    %101 = vector.broadcast %39 : vector<1x32xf32> to vector<24x32xf32>
    %102 = arith.addf %100, %101 : vector<24x32xf32>
    %103 = arith.addf %27, %102 : vector<24x32xf32>
    %cst_36 = arith.constant dense<0.000000e+00> : vector<24xf32>
    %104 = vector.multi_reduction <add>, %103, %cst_36 [1] : vector<24x32xf32> to vector<24xf32>
    %105 = vector.shape_cast %104 : vector<24xf32> to vector<24x1xf32>
    %cst_37 = arith.constant 3.200000e+01 : f32
    %106 = vector.broadcast %cst_37 : f32 to vector<24x1xf32>
    %107 = arith.divf %105, %106 : vector<24x1xf32>
    %108 = vector.broadcast %107 : vector<24x1xf32> to vector<24x32xf32>
    %109 = arith.subf %103, %108 : vector<24x32xf32>
    %110 = arith.mulf %109, %109 : vector<24x32xf32>
    %cst_38 = arith.constant dense<0.000000e+00> : vector<24xf32>
    %111 = vector.multi_reduction <add>, %110, %cst_38 [1] : vector<24x32xf32> to vector<24xf32>
    %112 = vector.shape_cast %111 : vector<24xf32> to vector<24x1xf32>
    %cst_39 = arith.constant 3.200000e+01 : f32
    %113 = vector.broadcast %cst_39 : f32 to vector<24x1xf32>
    %114 = arith.divf %112, %113 : vector<24x1xf32>
    %115 = vector.broadcast %107 : vector<24x1xf32> to vector<24x32xf32>
    %116 = arith.subf %103, %115 : vector<24x32xf32>
    %cst_40 = arith.constant 9.99999974E-6 : f32
    %117 = vector.broadcast %cst_40 : f32 to vector<24x1xf32>
    %118 = arith.addf %114, %117 : vector<24x1xf32>
    %119 = math.rsqrt %118 : vector<24x1xf32>
    %120 = vector.broadcast %119 : vector<24x1xf32> to vector<24x32xf32>
    %121 = arith.mulf %116, %120 : vector<24x32xf32>
    %122 = vector.broadcast %42 : vector<1x32xf32> to vector<24x32xf32>
    %123 = arith.mulf %121, %122 : vector<24x32xf32>
    %124 = vector.broadcast %43 : vector<1x32xf32> to vector<24x32xf32>
    %125 = arith.addf %123, %124 : vector<24x32xf32>
    %126 = arith.truncf %125 : vector<24x32xf32> to vector<24x32xbf16>
    %cst_41 = arith.constant dense<0.000000e+00> : vector<24x64xf32>
    %127 = tpu.matmul %126, %33, %cst_41 {dimension_numbers = #tpu.dot_dimension_numbers<[1], [0], [0], [1], [0, 0, 1, 1], [], []>} : vector<24x32xbf16>, vector<32x64xbf16>, vector<24x64xf32> -> vector<24x64xf32>
    %128 = vector.broadcast %40 : vector<1x64xf32> to vector<24x64xf32>
    %129 = arith.addf %127, %128 : vector<24x64xf32>
    %cst_42 = arith.constant 0.000000e+00 : f32
    %130 = vector.broadcast %cst_42 : f32 to vector<24x64xf32>
    %131 = arith.maximumf %129, %130 : vector<24x64xf32>
    %132 = arith.truncf %131 : vector<24x64xf32> to vector<24x64xbf16>
    %cst_43 = arith.constant dense<0.000000e+00> : vector<24x32xf32>
    %133 = tpu.matmul %132, %35, %cst_43 {dimension_numbers = #tpu.dot_dimension_numbers<[1], [0], [0], [1], [0, 0, 1, 1], [], []>} : vector<24x64xbf16>, vector<64x32xbf16>, vector<24x32xf32> -> vector<24x32xf32>
    %134 = vector.broadcast %41 : vector<1x32xf32> to vector<24x32xf32>
    %135 = arith.addf %133, %134 : vector<24x32xf32>
    %136 = arith.addf %125, %135 : vector<24x32xf32>
    %cst_44 = arith.constant dense<0.000000e+00> : vector<24xf32>
    %137 = vector.multi_reduction <add>, %136, %cst_44 [1] : vector<24x32xf32> to vector<24xf32>
    %138 = vector.shape_cast %137 : vector<24xf32> to vector<24x1xf32>
    %cst_45 = arith.constant 3.200000e+01 : f32
    %139 = vector.broadcast %cst_45 : f32 to vector<24x1xf32>
    %140 = arith.divf %138, %139 : vector<24x1xf32>
    %141 = vector.broadcast %140 : vector<24x1xf32> to vector<24x32xf32>
    %142 = arith.subf %136, %141 : vector<24x32xf32>
    %143 = arith.mulf %142, %142 : vector<24x32xf32>
    %cst_46 = arith.constant dense<0.000000e+00> : vector<24xf32>
    %144 = vector.multi_reduction <add>, %143, %cst_46 [1] : vector<24x32xf32> to vector<24xf32>
    %145 = vector.shape_cast %144 : vector<24xf32> to vector<24x1xf32>
    %cst_47 = arith.constant 3.200000e+01 : f32
    %146 = vector.broadcast %cst_47 : f32 to vector<24x1xf32>
    %147 = arith.divf %145, %146 : vector<24x1xf32>
    %148 = vector.broadcast %140 : vector<24x1xf32> to vector<24x32xf32>
    %149 = arith.subf %136, %148 : vector<24x32xf32>
    %cst_48 = arith.constant 9.99999974E-6 : f32
    %150 = vector.broadcast %cst_48 : f32 to vector<24x1xf32>
    %151 = arith.addf %147, %150 : vector<24x1xf32>
    %152 = math.rsqrt %151 : vector<24x1xf32>
    %153 = vector.broadcast %152 : vector<24x1xf32> to vector<24x32xf32>
    %154 = arith.mulf %149, %153 : vector<24x32xf32>
    %155 = vector.broadcast %44 : vector<1x32xf32> to vector<24x32xf32>
    %156 = arith.mulf %154, %155 : vector<24x32xf32>
    %157 = vector.broadcast %45 : vector<1x32xf32> to vector<24x32xf32>
    %158 = arith.addf %156, %157 : vector<24x32xf32>
    %c0_49 = arith.constant 0 : index
    %c0_50 = arith.constant 0 : index
    %159 = vector.load %arg9[%c0_49, %c0_50] : memref<24x32xf32, #tpu.memory_space<vmem>>, vector<24x32xf32>
    tpu.vector_store %arg9[%c0_49, %c0_50], %158 {strides = array<i32>} : memref<24x32xf32, #tpu.memory_space<vmem>>, vector<24x32xf32>,
    %160 = vector.extract_strided_slice %158 {offsets = [0, 0], sizes = [2, 32], strides = [1, 1]} : vector<24x32xf32> to vector<2x32xf32>
    %c0_51 = arith.constant 0 : index
    %c0_52 = arith.constant 0 : index
    %161 = vector.load %arg10[%c0_51, %c0_52] : memref<6x32xf32, #tpu.memory_space<vmem>>, vector<2x32xf32>
    tpu.vector_store %arg10[%c0_51, %c0_52], %160 {strides = array<i32>} : memref<6x32xf32, #tpu.memory_space<vmem>>, vector<2x32xf32>,
    %162 = vector.extract_strided_slice %158 {offsets = [9, 0], sizes = [2, 32], strides = [1, 1]} : vector<24x32xf32> to vector<2x32xf32>
    %c2 = arith.constant 2 : index
    %c0_53 = arith.constant 0 : index
    %163 = vector.load %arg10[%c2, %c0_53] : memref<6x32xf32, #tpu.memory_space<vmem>>, vector<2x32xf32>
    tpu.vector_store %arg10[%c2, %c0_53], %162 {strides = array<i32>} : memref<6x32xf32, #tpu.memory_space<vmem>>, vector<2x32xf32>,
    %164 = vector.extract_strided_slice %158 {offsets = [18, 0], sizes = [2, 32], strides = [1, 1]} : vector<24x32xf32> to vector<2x32xf32>
    %c4 = arith.constant 4 : index
    %c0_54 = arith.constant 0 : index
    %165 = vector.load %arg10[%c4, %c0_54] : memref<6x32xf32, #tpu.memory_space<vmem>>, vector<2x32xf32>
    tpu.vector_store %arg10[%c4, %c0_54], %164 {strides = array<i32>} : memref<6x32xf32, #tpu.memory_space<vmem>>, vector<2x32xf32>,
    %c0_55 = arith.constant 0 : index
    %c0_56 = arith.constant 0 : index
    %166 = vector.load %arg10[%c0_55, %c0_56] : memref<6x32xf32, #tpu.memory_space<vmem>>, vector<6x32xf32>
    %c2_57 = arith.constant 2 : index
    %c0_58 = arith.constant 0 : index
    %c0_59 = arith.constant 0 : index
    %167 = vector.load %arg3[%c2_57, %c0_58, %c0_59] : memref<4x32x96xbf16, #tpu.memory_space<vmem>>, vector<1x32x96xbf16>
    %168 = vector.shape_cast %167 : vector<1x32x96xbf16> to vector<32x96xbf16>
    %c2_60 = arith.constant 2 : index
    %c0_61 = arith.constant 0 : index
    %c0_62 = arith.constant 0 : index
    %c0_63 = arith.constant 0 : index
    %169 = vector.load %arg4[%c2_60, %c0_61, %c0_62, %c0_63] : memref<4x4x8x32xbf16, #tpu.memory_space<vmem>>, vector<1x4x8x32xbf16>
    %170 = vector.shape_cast %169 : vector<1x4x8x32xbf16> to vector<4x8x32xbf16>
    %c2_64 = arith.constant 2 : index
    %c0_65 = arith.constant 0 : index
    %c0_66 = arith.constant 0 : index
    %171 = vector.load %arg5[%c2_64, %c0_65, %c0_66] : memref<4x32x64xbf16, #tpu.memory_space<vmem>>, vector<1x32x64xbf16>
    %172 = vector.shape_cast %171 : vector<1x32x64xbf16> to vector<32x64xbf16>
    %c2_67 = arith.constant 2 : index
    %c0_68 = arith.constant 0 : index
    %c0_69 = arith.constant 0 : index
    %173 = vector.load %arg6[%c2_67, %c0_68, %c0_69] : memref<4x64x32xbf16, #tpu.memory_space<vmem>>, vector<1x64x32xbf16>
    %174 = vector.shape_cast %173 : vector<1x64x32xbf16> to vector<64x32xbf16>
    %c2_70 = arith.constant 2 : index
    %c0_71 = arith.constant 0 : index
    %c0_72 = arith.constant 0 : index
    %175 = vector.load %arg7[%c2_70, %c0_71, %c0_72] : memref<4x8x128xf32, #tpu.memory_space<vmem>>, vector<1x8x128xf32>
    %176 = vector.shape_cast %175 : vector<1x8x128xf32> to vector<8x128xf32>
    %177 = vector.extract_strided_slice %176 {offsets = [0, 0], sizes = [1, 96], strides = [1, 1]} : vector<8x128xf32> to vector<1x96xf32>
    %178 = vector.extract_strided_slice %176 {offsets = [1, 0], sizes = [1, 32], strides = [1, 1]} : vector<8x128xf32> to vector<1x32xf32>
    %179 = vector.extract_strided_slice %176 {offsets = [2, 0], sizes = [1, 64], strides = [1, 1]} : vector<8x128xf32> to vector<1x64xf32>
    %180 = vector.extract_strided_slice %176 {offsets = [3, 0], sizes = [1, 32], strides = [1, 1]} : vector<8x128xf32> to vector<1x32xf32>
    %181 = vector.extract_strided_slice %176 {offsets = [4, 0], sizes = [1, 32], strides = [1, 1]} : vector<8x128xf32> to vector<1x32xf32>
    %182 = vector.extract_strided_slice %176 {offsets = [5, 0], sizes = [1, 32], strides = [1, 1]} : vector<8x128xf32> to vector<1x32xf32>
    %183 = vector.extract_strided_slice %176 {offsets = [6, 0], sizes = [1, 32], strides = [1, 1]} : vector<8x128xf32> to vector<1x32xf32>
    %184 = vector.extract_strided_slice %176 {offsets = [7, 0], sizes = [1, 32], strides = [1, 1]} : vector<8x128xf32> to vector<1x32xf32>
    %185 = arith.truncf %166 : vector<6x32xf32> to vector<6x32xbf16>
    %cst_73 = arith.constant dense<0.000000e+00> : vector<6x96xf32>
    %186 = tpu.matmul %185, %168, %cst_73 {dimension_numbers = #tpu.dot_dimension_numbers<[1], [0], [0], [1], [0, 0, 1, 1], [], []>} : vector<6x32xbf16>, vector<32x96xbf16>, vector<6x96xf32> -> vector<6x96xf32>
    %187 = vector.broadcast %177 : vector<1x96xf32> to vector<6x96xf32>
    %188 = arith.addf %186, %187 : vector<6x96xf32>
    %189 = vector.extract_strided_slice %188 {offsets = [0, 0], sizes = [6, 8], strides = [1, 1]} : vector<6x96xf32> to vector<6x8xf32>
    %190 = vector.extract_strided_slice %188 {offsets = [0, 8], sizes = [6, 8], strides = [1, 1]} : vector<6x96xf32> to vector<6x8xf32>
    %191 = vector.extract_strided_slice %188 {offsets = [0, 16], sizes = [6, 8], strides = [1, 1]} : vector<6x96xf32> to vector<6x8xf32>
    %192 = vector.extract_strided_slice %188 {offsets = [0, 24], sizes = [6, 8], strides = [1, 1]} : vector<6x96xf32> to vector<6x8xf32>
    %193 = vector.shape_cast %189 : vector<6x8xf32> to vector<1x6x8xf32>
    %194 = vector.shape_cast %190 : vector<6x8xf32> to vector<1x6x8xf32>
    %195 = vector.shape_cast %191 : vector<6x8xf32> to vector<1x6x8xf32>
    %196 = vector.shape_cast %192 : vector<6x8xf32> to vector<1x6x8xf32>
    %197 = tpu.concatenate %193, %194, %195, %196 in 0 : vector<1x6x8xf32>, vector<1x6x8xf32>, vector<1x6x8xf32>, vector<1x6x8xf32> -> vector<4x6x8xf32>
    %198 = arith.truncf %197 : vector<4x6x8xf32> to vector<4x6x8xbf16>
    %199 = vector.extract_strided_slice %188 {offsets = [0, 32], sizes = [6, 8], strides = [1, 1]} : vector<6x96xf32> to vector<6x8xf32>
    %200 = vector.extract_strided_slice %188 {offsets = [0, 40], sizes = [6, 8], strides = [1, 1]} : vector<6x96xf32> to vector<6x8xf32>
    %201 = vector.extract_strided_slice %188 {offsets = [0, 48], sizes = [6, 8], strides = [1, 1]} : vector<6x96xf32> to vector<6x8xf32>
    %202 = vector.extract_strided_slice %188 {offsets = [0, 56], sizes = [6, 8], strides = [1, 1]} : vector<6x96xf32> to vector<6x8xf32>
    %203 = vector.shape_cast %199 : vector<6x8xf32> to vector<1x6x8xf32>
    %204 = vector.shape_cast %200 : vector<6x8xf32> to vector<1x6x8xf32>
    %205 = vector.shape_cast %201 : vector<6x8xf32> to vector<1x6x8xf32>
    %206 = vector.shape_cast %202 : vector<6x8xf32> to vector<1x6x8xf32>
    %207 = tpu.concatenate %203, %204, %205, %206 in 0 : vector<1x6x8xf32>, vector<1x6x8xf32>, vector<1x6x8xf32>, vector<1x6x8xf32> -> vector<4x6x8xf32>
    %208 = arith.truncf %207 : vector<4x6x8xf32> to vector<4x6x8xbf16>
    %209 = vector.extract_strided_slice %188 {offsets = [0, 64], sizes = [6, 8], strides = [1, 1]} : vector<6x96xf32> to vector<6x8xf32>
    %210 = vector.extract_strided_slice %188 {offsets = [0, 72], sizes = [6, 8], strides = [1, 1]} : vector<6x96xf32> to vector<6x8xf32>
    %211 = vector.extract_strided_slice %188 {offsets = [0, 80], sizes = [6, 8], strides = [1, 1]} : vector<6x96xf32> to vector<6x8xf32>
    %212 = vector.extract_strided_slice %188 {offsets = [0, 88], sizes = [6, 8], strides = [1, 1]} : vector<6x96xf32> to vector<6x8xf32>
    %213 = vector.shape_cast %209 : vector<6x8xf32> to vector<1x6x8xf32>
    %214 = vector.shape_cast %210 : vector<6x8xf32> to vector<1x6x8xf32>
    %215 = vector.shape_cast %211 : vector<6x8xf32> to vector<1x6x8xf32>
    %216 = vector.shape_cast %212 : vector<6x8xf32> to vector<1x6x8xf32>
    %217 = tpu.concatenate %213, %214, %215, %216 in 0 : vector<1x6x8xf32>, vector<1x6x8xf32>, vector<1x6x8xf32>, vector<1x6x8xf32> -> vector<4x6x8xf32>
    %218 = arith.truncf %217 : vector<4x6x8xf32> to vector<4x6x8xbf16>
    "tpu.trace_start"() <{level = 10 : i32, message = "hqd,hkd->hqk"}> : () -> ()
    %cst_74 = arith.constant dense<0.000000e+00> : vector<4x6x6xf32>
    %219 = tpu.matmul %198, %208, %cst_74 {dimension_numbers = #tpu.dot_dimension_numbers<[2], [2], [1], [1], [0, 0, 0, 1, 1, 1], [0], [0]>} : vector<4x6x8xbf16>, vector<4x6x8xbf16>, vector<4x6x6xf32> -> vector<4x6x6xf32>
    "tpu.trace_stop"() : () -> ()
    %cst_75 = arith.constant 0.353553385 : f32
    %220 = vector.broadcast %cst_75 : f32 to vector<4x6x6xf32>
    %221 = arith.mulf %219, %220 : vector<4x6x6xf32>
    %cst_76 = arith.constant dense<0xFF800000> : vector<4x6xf32>
    %222 = vector.multi_reduction <maximumf>, %221, %cst_76 [2] : vector<4x6x6xf32> to vector<4x6xf32>
    %223 = vector.shape_cast %222 : vector<4x6xf32> to vector<4x6x1xf32>
    %224 = vector.broadcast %223 : vector<4x6x1xf32> to vector<4x6x6xf32>
    %225 = arith.subf %221, %224 : vector<4x6x6xf32>
    %226 = math.exp %225 : vector<4x6x6xf32>
    %cst_77 = arith.constant dense<0.000000e+00> : vector<4x6xf32>
    %227 = vector.multi_reduction <add>, %226, %cst_77 [2] : vector<4x6x6xf32> to vector<4x6xf32>
    %228 = vector.shape_cast %227 : vector<4x6xf32> to vector<4x6x1xf32>
    %229 = tpu.reciprocal %228 {approx = true} : vector<4x6x1xf32> -> vector<4x6x1xf32>
    %230 = vector.broadcast %229 : vector<4x6x1xf32> to vector<4x6x6xf32>
    %231 = arith.mulf %226, %230 : vector<4x6x6xf32>
    %232 = arith.truncf %231 : vector<4x6x6xf32> to vector<4x6x6xbf16>
    "tpu.trace_start"() <{level = 10 : i32, message = "hqk,hkd->hqd"}> : () -> ()
    %cst_78 = arith.constant dense<0.000000e+00> : vector<4x6x8xf32>
    %233 = tpu.matmul %232, %218, %cst_78 {dimension_numbers = #tpu.dot_dimension_numbers<[2], [1], [1], [2], [0, 0, 0, 1, 1, 2], [0], [0]>} : vector<4x6x6xbf16>, vector<4x6x8xbf16>, vector<4x6x8xf32> -> vector<4x6x8xf32>
    "tpu.trace_stop"() : () -> ()
    %234 = arith.truncf %233 : vector<4x6x8xf32> to vector<4x6x8xbf16>
    "tpu.trace_start"() <{level = 10 : i32, message = "hqd,hde->hqe"}> : () -> ()
    %cst_79 = arith.constant dense<0.000000e+00> : vector<4x6x32xf32>
    %235 = tpu.matmul %234, %170, %cst_79 {dimension_numbers = #tpu.dot_dimension_numbers<[2], [1], [1], [2], [0, 0, 0, 1, 1, 2], [0], [0]>} : vector<4x6x8xbf16>, vector<4x8x32xbf16>, vector<4x6x32xf32> -> vector<4x6x32xf32>
    "tpu.trace_stop"() : () -> ()
    %cst_80 = arith.constant dense<0.000000e+00> : vector<6x32xf32>
    %236 = vector.multi_reduction <add>, %235, %cst_80 [0] : vector<4x6x32xf32> to vector<6x32xf32>
    %237 = vector.broadcast %178 : vector<1x32xf32> to vector<6x32xf32>
    %238 = arith.addf %236, %237 : vector<6x32xf32>
    %239 = arith.addf %166, %238 : vector<6x32xf32>
    %cst_81 = arith.constant dense<0.000000e+00> : vector<6xf32>
    %240 = vector.multi_reduction <add>, %239, %cst_81 [1] : vector<6x32xf32> to vector<6xf32>
    %241 = vector.shape_cast %240 : vector<6xf32> to vector<6x1xf32>
    %cst_82 = arith.constant 3.200000e+01 : f32
    %242 = vector.broadcast %cst_82 : f32 to vector<6x1xf32>
    %243 = arith.divf %241, %242 : vector<6x1xf32>
    %244 = vector.broadcast %243 : vector<6x1xf32> to vector<6x32xf32>
    %245 = arith.subf %239, %244 : vector<6x32xf32>
    %246 = arith.mulf %245, %245 : vector<6x32xf32>
    %cst_83 = arith.constant dense<0.000000e+00> : vector<6xf32>
    %247 = vector.multi_reduction <add>, %246, %cst_83 [1] : vector<6x32xf32> to vector<6xf32>
    %248 = vector.shape_cast %247 : vector<6xf32> to vector<6x1xf32>
    %cst_84 = arith.constant 3.200000e+01 : f32
    %249 = vector.broadcast %cst_84 : f32 to vector<6x1xf32>
    %250 = arith.divf %248, %249 : vector<6x1xf32>
    %251 = vector.broadcast %243 : vector<6x1xf32> to vector<6x32xf32>
    %252 = arith.subf %239, %251 : vector<6x32xf32>
    %cst_85 = arith.constant 9.99999974E-6 : f32
    %253 = vector.broadcast %cst_85 : f32 to vector<6x1xf32>
    %254 = arith.addf %250, %253 : vector<6x1xf32>
    %255 = math.rsqrt %254 : vector<6x1xf32>
    %256 = vector.broadcast %255 : vector<6x1xf32> to vector<6x32xf32>
    %257 = arith.mulf %252, %256 : vector<6x32xf32>
    %258 = vector.broadcast %181 : vector<1x32xf32> to vector<6x32xf32>
    %259 = arith.mulf %257, %258 : vector<6x32xf32>
    %260 = vector.broadcast %182 : vector<1x32xf32> to vector<6x32xf32>
    %261 = arith.addf %259, %260 : vector<6x32xf32>
    %262 = arith.truncf %261 : vector<6x32xf32> to vector<6x32xbf16>
    %cst_86 = arith.constant dense<0.000000e+00> : vector<6x64xf32>
    %263 = tpu.matmul %262, %172, %cst_86 {dimension_numbers = #tpu.dot_dimension_numbers<[1], [0], [0], [1], [0, 0, 1, 1], [], []>} : vector<6x32xbf16>, vector<32x64xbf16>, vector<6x64xf32> -> vector<6x64xf32>
    %264 = vector.broadcast %179 : vector<1x64xf32> to vector<6x64xf32>
    %265 = arith.addf %263, %264 : vector<6x64xf32>
    %cst_87 = arith.constant 0.000000e+00 : f32
    %266 = vector.broadcast %cst_87 : f32 to vector<6x64xf32>
    %267 = arith.maximumf %265, %266 : vector<6x64xf32>
    %268 = arith.truncf %267 : vector<6x64xf32> to vector<6x64xbf16>
    %cst_88 = arith.constant dense<0.000000e+00> : vector<6x32xf32>
    %269 = tpu.matmul %268, %174, %cst_88 {dimension_numbers = #tpu.dot_dimension_numbers<[1], [0], [0], [1], [0, 0, 1, 1], [], []>} : vector<6x64xbf16>, vector<64x32xbf16>, vector<6x32xf32> -> vector<6x32xf32>
    %270 = vector.broadcast %180 : vector<1x32xf32> to vector<6x32xf32>
    %271 = arith.addf %269, %270 : vector<6x32xf32>
    %272 = arith.addf %261, %271 : vector<6x32xf32>
    %cst_89 = arith.constant dense<0.000000e+00> : vector<6xf32>
    %273 = vector.multi_reduction <add>, %272, %cst_89 [1] : vector<6x32xf32> to vector<6xf32>
    %274 = vector.shape_cast %273 : vector<6xf32> to vector<6x1xf32>
    %cst_90 = arith.constant 3.200000e+01 : f32
    %275 = vector.broadcast %cst_90 : f32 to vector<6x1xf32>
    %276 = arith.divf %274, %275 : vector<6x1xf32>
    %277 = vector.broadcast %276 : vector<6x1xf32> to vector<6x32xf32>
    %278 = arith.subf %272, %277 : vector<6x32xf32>
    %279 = arith.mulf %278, %278 : vector<6x32xf32>
    %cst_91 = arith.constant dense<0.000000e+00> : vector<6xf32>
    %280 = vector.multi_reduction <add>, %279, %cst_91 [1] : vector<6x32xf32> to vector<6xf32>
    %281 = vector.shape_cast %280 : vector<6xf32> to vector<6x1xf32>
    %cst_92 = arith.constant 3.200000e+01 : f32
    %282 = vector.broadcast %cst_92 : f32 to vector<6x1xf32>
    %283 = arith.divf %281, %282 : vector<6x1xf32>
    %284 = vector.broadcast %276 : vector<6x1xf32> to vector<6x32xf32>
    %285 = arith.subf %272, %284 : vector<6x32xf32>
    %cst_93 = arith.constant 9.99999974E-6 : f32
    %286 = vector.broadcast %cst_93 : f32 to vector<6x1xf32>
    %287 = arith.addf %283, %286 : vector<6x1xf32>
    %288 = math.rsqrt %287 : vector<6x1xf32>
    %289 = vector.broadcast %288 : vector<6x1xf32> to vector<6x32xf32>
    %290 = arith.mulf %285, %289 : vector<6x32xf32>
    %291 = vector.broadcast %183 : vector<1x32xf32> to vector<6x32xf32>
    %292 = arith.mulf %290, %291 : vector<6x32xf32>
    %293 = vector.broadcast %184 : vector<1x32xf32> to vector<6x32xf32>
    %294 = arith.addf %292, %293 : vector<6x32xf32>
    %295 = vector.extract_strided_slice %294 {offsets = [0, 0], sizes = [2, 32], strides = [1, 1]} : vector<6x32xf32> to vector<2x32xf32>
    %c0_94 = arith.constant 0 : index
    %c0_95 = arith.constant 0 : index
    %296 = vector.load %arg9[%c0_94, %c0_95] : memref<24x32xf32, #tpu.memory_space<vmem>>, vector<2x32xf32>
    tpu.vector_store %arg9[%c0_94, %c0_95], %295 {strides = array<i32>} : memref<24x32xf32, #tpu.memory_space<vmem>>, vector<2x32xf32>,
    %297 = vector.extract_strided_slice %294 {offsets = [2, 0], sizes = [2, 32], strides = [1, 1]} : vector<6x32xf32> to vector<2x32xf32>
    %c9 = arith.constant 9 : index
    %c0_96 = arith.constant 0 : index
    %298 = vector.load %arg9[%c9, %c0_96] : memref<24x32xf32, #tpu.memory_space<vmem>>, vector<2x32xf32>
    tpu.vector_store %arg9[%c9, %c0_96], %297 {strides = array<i32>} : memref<24x32xf32, #tpu.memory_space<vmem>>, vector<2x32xf32>,
    %299 = vector.extract_strided_slice %294 {offsets = [4, 0], sizes = [2, 32], strides = [1, 1]} : vector<6x32xf32> to vector<2x32xf32>
    %c18 = arith.constant 18 : index
    %c0_97 = arith.constant 0 : index
    %300 = vector.load %arg9[%c18, %c0_97] : memref<24x32xf32, #tpu.memory_space<vmem>>, vector<2x32xf32>
    tpu.vector_store %arg9[%c18, %c0_97], %299 {strides = array<i32>} : memref<24x32xf32, #tpu.memory_space<vmem>>, vector<2x32xf32>,
    %c0_98 = arith.constant 0 : index
    %c0_99 = arith.constant 0 : index
    %301 = vector.load %arg9[%c0_98, %c0_99] : memref<24x32xf32, #tpu.memory_space<vmem>>, vector<24x32xf32>
    %c1 = arith.constant 1 : index
    %c0_100 = arith.constant 0 : index
    %c0_101 = arith.constant 0 : index
    %302 = vector.load %arg3[%c1, %c0_100, %c0_101] : memref<4x32x96xbf16, #tpu.memory_space<vmem>>, vector<1x32x96xbf16>
    %303 = vector.shape_cast %302 : vector<1x32x96xbf16> to vector<32x96xbf16>
    %c1_102 = arith.constant 1 : index
    %c0_103 = arith.constant 0 : index
    %c0_104 = arith.constant 0 : index
    %c0_105 = arith.constant 0 : index
    %304 = vector.load %arg4[%c1_102, %c0_103, %c0_104, %c0_105] : memref<4x4x8x32xbf16, #tpu.memory_space<vmem>>, vector<1x4x8x32xbf16>
    %305 = vector.shape_cast %304 : vector<1x4x8x32xbf16> to vector<4x8x32xbf16>
    %c1_106 = arith.constant 1 : index
    %c0_107 = arith.constant 0 : index
    %c0_108 = arith.constant 0 : index
    %306 = vector.load %arg5[%c1_106, %c0_107, %c0_108] : memref<4x32x64xbf16, #tpu.memory_space<vmem>>, vector<1x32x64xbf16>
    %307 = vector.shape_cast %306 : vector<1x32x64xbf16> to vector<32x64xbf16>
    %c1_109 = arith.constant 1 : index
    %c0_110 = arith.constant 0 : index
    %c0_111 = arith.constant 0 : index
    %308 = vector.load %arg6[%c1_109, %c0_110, %c0_111] : memref<4x64x32xbf16, #tpu.memory_space<vmem>>, vector<1x64x32xbf16>
    %309 = vector.shape_cast %308 : vector<1x64x32xbf16> to vector<64x32xbf16>
    %c1_112 = arith.constant 1 : index
    %c0_113 = arith.constant 0 : index
    %c0_114 = arith.constant 0 : index
    %310 = vector.load %arg7[%c1_112, %c0_113, %c0_114] : memref<4x8x128xf32, #tpu.memory_space<vmem>>, vector<1x8x128xf32>
    %311 = vector.shape_cast %310 : vector<1x8x128xf32> to vector<8x128xf32>
    %312 = vector.extract_strided_slice %311 {offsets = [0, 0], sizes = [1, 96], strides = [1, 1]} : vector<8x128xf32> to vector<1x96xf32>
    %313 = vector.extract_strided_slice %311 {offsets = [1, 0], sizes = [1, 32], strides = [1, 1]} : vector<8x128xf32> to vector<1x32xf32>
    %314 = vector.extract_strided_slice %311 {offsets = [2, 0], sizes = [1, 64], strides = [1, 1]} : vector<8x128xf32> to vector<1x64xf32>
    %315 = vector.extract_strided_slice %311 {offsets = [3, 0], sizes = [1, 32], strides = [1, 1]} : vector<8x128xf32> to vector<1x32xf32>
    %316 = vector.extract_strided_slice %311 {offsets = [4, 0], sizes = [1, 32], strides = [1, 1]} : vector<8x128xf32> to vector<1x32xf32>
    %317 = vector.extract_strided_slice %311 {offsets = [5, 0], sizes = [1, 32], strides = [1, 1]} : vector<8x128xf32> to vector<1x32xf32>
    %318 = vector.extract_strided_slice %311 {offsets = [6, 0], sizes = [1, 32], strides = [1, 1]} : vector<8x128xf32> to vector<1x32xf32>
    %319 = vector.extract_strided_slice %311 {offsets = [7, 0], sizes = [1, 32], strides = [1, 1]} : vector<8x128xf32> to vector<1x32xf32>
    %320 = arith.truncf %301 : vector<24x32xf32> to vector<24x32xbf16>
    %cst_115 = arith.constant dense<0.000000e+00> : vector<24x96xf32>
    %321 = tpu.matmul %320, %303, %cst_115 {dimension_numbers = #tpu.dot_dimension_numbers<[1], [0], [0], [1], [0, 0, 1, 1], [], []>} : vector<24x32xbf16>, vector<32x96xbf16>, vector<24x96xf32> -> vector<24x96xf32>
    %322 = vector.broadcast %312 : vector<1x96xf32> to vector<24x96xf32>
    %323 = arith.addf %321, %322 : vector<24x96xf32>
    %324 = vector.extract_strided_slice %323 {offsets = [0, 0], sizes = [24, 8], strides = [1, 1]} : vector<24x96xf32> to vector<24x8xf32>
    %325 = vector.extract_strided_slice %323 {offsets = [0, 8], sizes = [24, 8], strides = [1, 1]} : vector<24x96xf32> to vector<24x8xf32>
    %326 = vector.extract_strided_slice %323 {offsets = [0, 16], sizes = [24, 8], strides = [1, 1]} : vector<24x96xf32> to vector<24x8xf32>
    %327 = vector.extract_strided_slice %323 {offsets = [0, 24], sizes = [24, 8], strides = [1, 1]} : vector<24x96xf32> to vector<24x8xf32>
    %328 = vector.shape_cast %324 : vector<24x8xf32> to vector<1x24x8xf32>
    %329 = vector.shape_cast %325 : vector<24x8xf32> to vector<1x24x8xf32>
    %330 = vector.shape_cast %326 : vector<24x8xf32> to vector<1x24x8xf32>
    %331 = vector.shape_cast %327 : vector<24x8xf32> to vector<1x24x8xf32>
    %332 = tpu.concatenate %328, %329, %330, %331 in 0 : vector<1x24x8xf32>, vector<1x24x8xf32>, vector<1x24x8xf32>, vector<1x24x8xf32> -> vector<4x24x8xf32>
    %333 = arith.truncf %332 : vector<4x24x8xf32> to vector<4x24x8xbf16>
    %334 = vector.extract_strided_slice %323 {offsets = [0, 32], sizes = [24, 8], strides = [1, 1]} : vector<24x96xf32> to vector<24x8xf32>
    %335 = vector.extract_strided_slice %323 {offsets = [0, 40], sizes = [24, 8], strides = [1, 1]} : vector<24x96xf32> to vector<24x8xf32>
    %336 = vector.extract_strided_slice %323 {offsets = [0, 48], sizes = [24, 8], strides = [1, 1]} : vector<24x96xf32> to vector<24x8xf32>
    %337 = vector.extract_strided_slice %323 {offsets = [0, 56], sizes = [24, 8], strides = [1, 1]} : vector<24x96xf32> to vector<24x8xf32>
    %338 = vector.shape_cast %334 : vector<24x8xf32> to vector<1x24x8xf32>
    %339 = vector.shape_cast %335 : vector<24x8xf32> to vector<1x24x8xf32>
    %340 = vector.shape_cast %336 : vector<24x8xf32> to vector<1x24x8xf32>
    %341 = vector.shape_cast %337 : vector<24x8xf32> to vector<1x24x8xf32>
    %342 = tpu.concatenate %338, %339, %340, %341 in 0 : vector<1x24x8xf32>, vector<1x24x8xf32>, vector<1x24x8xf32>, vector<1x24x8xf32> -> vector<4x24x8xf32>
    %343 = arith.truncf %342 : vector<4x24x8xf32> to vector<4x24x8xbf16>
    %344 = vector.extract_strided_slice %323 {offsets = [0, 64], sizes = [24, 8], strides = [1, 1]} : vector<24x96xf32> to vector<24x8xf32>
    %345 = vector.extract_strided_slice %323 {offsets = [0, 72], sizes = [24, 8], strides = [1, 1]} : vector<24x96xf32> to vector<24x8xf32>
    %346 = vector.extract_strided_slice %323 {offsets = [0, 80], sizes = [24, 8], strides = [1, 1]} : vector<24x96xf32> to vector<24x8xf32>
    %347 = vector.extract_strided_slice %323 {offsets = [0, 88], sizes = [24, 8], strides = [1, 1]} : vector<24x96xf32> to vector<24x8xf32>
    %348 = vector.shape_cast %344 : vector<24x8xf32> to vector<1x24x8xf32>
    %349 = vector.shape_cast %345 : vector<24x8xf32> to vector<1x24x8xf32>
    %350 = vector.shape_cast %346 : vector<24x8xf32> to vector<1x24x8xf32>
    %351 = vector.shape_cast %347 : vector<24x8xf32> to vector<1x24x8xf32>
    %352 = tpu.concatenate %348, %349, %350, %351 in 0 : vector<1x24x8xf32>, vector<1x24x8xf32>, vector<1x24x8xf32>, vector<1x24x8xf32> -> vector<4x24x8xf32>
    %353 = arith.truncf %352 : vector<4x24x8xf32> to vector<4x24x8xbf16>
    "tpu.trace_start"() <{level = 10 : i32, message = "hqd,hkd->hqk"}> : () -> ()
    %cst_116 = arith.constant dense<0.000000e+00> : vector<4x24x24xf32>
    %354 = tpu.matmul %333, %343, %cst_116 {dimension_numbers = #tpu.dot_dimension_numbers<[2], [2], [1], [1], [0, 0, 0, 1, 1, 1], [0], [0]>} : vector<4x24x8xbf16>, vector<4x24x8xbf16>, vector<4x24x24xf32> -> vector<4x24x24xf32>
    "tpu.trace_stop"() : () -> ()
    %cst_117 = arith.constant 0.353553385 : f32
    %355 = vector.broadcast %cst_117 : f32 to vector<4x24x24xf32>
    %356 = arith.mulf %354, %355 : vector<4x24x24xf32>
    %357 = vector.shape_cast %26 : vector<24x24xf32> to vector<1x24x24xf32>
    %358 = vector.broadcast %357 : vector<1x24x24xf32> to vector<4x24x24xf32>
    %359 = arith.addf %356, %358 : vector<4x24x24xf32>
    %cst_118 = arith.constant dense<0xFF800000> : vector<4x24xf32>
    %360 = vector.multi_reduction <maximumf>, %359, %cst_118 [2] : vector<4x24x24xf32> to vector<4x24xf32>
    %361 = vector.shape_cast %360 : vector<4x24xf32> to vector<4x24x1xf32>
    %362 = vector.broadcast %361 : vector<4x24x1xf32> to vector<4x24x24xf32>
    %363 = arith.subf %359, %362 : vector<4x24x24xf32>
    %364 = math.exp %363 : vector<4x24x24xf32>
    %cst_119 = arith.constant dense<0.000000e+00> : vector<4x24xf32>
    %365 = vector.multi_reduction <add>, %364, %cst_119 [2] : vector<4x24x24xf32> to vector<4x24xf32>
    %366 = vector.shape_cast %365 : vector<4x24xf32> to vector<4x24x1xf32>
    %367 = tpu.reciprocal %366 {approx = true} : vector<4x24x1xf32> -> vector<4x24x1xf32>
    %368 = vector.broadcast %367 : vector<4x24x1xf32> to vector<4x24x24xf32>
    %369 = arith.mulf %364, %368 : vector<4x24x24xf32>
    %370 = arith.truncf %369 : vector<4x24x24xf32> to vector<4x24x24xbf16>
    "tpu.trace_start"() <{level = 10 : i32, message = "hqk,hkd->hqd"}> : () -> ()
    %cst_120 = arith.constant dense<0.000000e+00> : vector<4x24x8xf32>
    %371 = tpu.matmul %370, %353, %cst_120 {dimension_numbers = #tpu.dot_dimension_numbers<[2], [1], [1], [2], [0, 0, 0, 1, 1, 2], [0], [0]>} : vector<4x24x24xbf16>, vector<4x24x8xbf16>, vector<4x24x8xf32> -> vector<4x24x8xf32>
    "tpu.trace_stop"() : () -> ()
    %372 = arith.truncf %371 : vector<4x24x8xf32> to vector<4x24x8xbf16>
    "tpu.trace_start"() <{level = 10 : i32, message = "hqd,hde->hqe"}> : () -> ()
    %cst_121 = arith.constant dense<0.000000e+00> : vector<4x24x32xf32>
    %373 = tpu.matmul %372, %305, %cst_121 {dimension_numbers = #tpu.dot_dimension_numbers<[2], [1], [1], [2], [0, 0, 0, 1, 1, 2], [0], [0]>} : vector<4x24x8xbf16>, vector<4x8x32xbf16>, vector<4x24x32xf32> -> vector<4x24x32xf32>
    "tpu.trace_stop"() : () -> ()
    %cst_122 = arith.constant dense<0.000000e+00> : vector<24x32xf32>
    %374 = vector.multi_reduction <add>, %373, %cst_122 [0] : vector<4x24x32xf32> to vector<24x32xf32>
    %375 = vector.broadcast %313 : vector<1x32xf32> to vector<24x32xf32>
    %376 = arith.addf %374, %375 : vector<24x32xf32>
    %377 = arith.addf %301, %376 : vector<24x32xf32>
    %cst_123 = arith.constant dense<0.000000e+00> : vector<24xf32>
    %378 = vector.multi_reduction <add>, %377, %cst_123 [1] : vector<24x32xf32> to vector<24xf32>
    %379 = vector.shape_cast %378 : vector<24xf32> to vector<24x1xf32>
    %cst_124 = arith.constant 3.200000e+01 : f32
    %380 = vector.broadcast %cst_124 : f32 to vector<24x1xf32>
    %381 = arith.divf %379, %380 : vector<24x1xf32>
    %382 = vector.broadcast %381 : vector<24x1xf32> to vector<24x32xf32>
    %383 = arith.subf %377, %382 : vector<24x32xf32>
    %384 = arith.mulf %383, %383 : vector<24x32xf32>
    %cst_125 = arith.constant dense<0.000000e+00> : vector<24xf32>
    %385 = vector.multi_reduction <add>, %384, %cst_125 [1] : vector<24x32xf32> to vector<24xf32>
    %386 = vector.shape_cast %385 : vector<24xf32> to vector<24x1xf32>
    %cst_126 = arith.constant 3.200000e+01 : f32
    %387 = vector.broadcast %cst_126 : f32 to vector<24x1xf32>
    %388 = arith.divf %386, %387 : vector<24x1xf32>
    %389 = vector.broadcast %381 : vector<24x1xf32> to vector<24x32xf32>
    %390 = arith.subf %377, %389 : vector<24x32xf32>
    %cst_127 = arith.constant 9.99999974E-6 : f32
    %391 = vector.broadcast %cst_127 : f32 to vector<24x1xf32>
    %392 = arith.addf %388, %391 : vector<24x1xf32>
    %393 = math.rsqrt %392 : vector<24x1xf32>
    %394 = vector.broadcast %393 : vector<24x1xf32> to vector<24x32xf32>
    %395 = arith.mulf %390, %394 : vector<24x32xf32>
    %396 = vector.broadcast %316 : vector<1x32xf32> to vector<24x32xf32>
    %397 = arith.mulf %395, %396 : vector<24x32xf32>
    %398 = vector.broadcast %317 : vector<1x32xf32> to vector<24x32xf32>
    %399 = arith.addf %397, %398 : vector<24x32xf32>
    %400 = arith.truncf %399 : vector<24x32xf32> to vector<24x32xbf16>
    %cst_128 = arith.constant dense<0.000000e+00> : vector<24x64xf32>
    %401 = tpu.matmul %400, %307, %cst_128 {dimension_numbers = #tpu.dot_dimension_numbers<[1], [0], [0], [1], [0, 0, 1, 1], [], []>} : vector<24x32xbf16>, vector<32x64xbf16>, vector<24x64xf32> -> vector<24x64xf32>
    %402 = vector.broadcast %314 : vector<1x64xf32> to vector<24x64xf32>
    %403 = arith.addf %401, %402 : vector<24x64xf32>
    %cst_129 = arith.constant 0.000000e+00 : f32
    %404 = vector.broadcast %cst_129 : f32 to vector<24x64xf32>
    %405 = arith.maximumf %403, %404 : vector<24x64xf32>
    %406 = arith.truncf %405 : vector<24x64xf32> to vector<24x64xbf16>
    %cst_130 = arith.constant dense<0.000000e+00> : vector<24x32xf32>
    %407 = tpu.matmul %406, %309, %cst_130 {dimension_numbers = #tpu.dot_dimension_numbers<[1], [0], [0], [1], [0, 0, 1, 1], [], []>} : vector<24x64xbf16>, vector<64x32xbf16>, vector<24x32xf32> -> vector<24x32xf32>
    %408 = vector.broadcast %315 : vector<1x32xf32> to vector<24x32xf32>
    %409 = arith.addf %407, %408 : vector<24x32xf32>
    %410 = arith.addf %399, %409 : vector<24x32xf32>
    %cst_131 = arith.constant dense<0.000000e+00> : vector<24xf32>
    %411 = vector.multi_reduction <add>, %410, %cst_131 [1] : vector<24x32xf32> to vector<24xf32>
    %412 = vector.shape_cast %411 : vector<24xf32> to vector<24x1xf32>
    %cst_132 = arith.constant 3.200000e+01 : f32
    %413 = vector.broadcast %cst_132 : f32 to vector<24x1xf32>
    %414 = arith.divf %412, %413 : vector<24x1xf32>
    %415 = vector.broadcast %414 : vector<24x1xf32> to vector<24x32xf32>
    %416 = arith.subf %410, %415 : vector<24x32xf32>
    %417 = arith.mulf %416, %416 : vector<24x32xf32>
    %cst_133 = arith.constant dense<0.000000e+00> : vector<24xf32>
    %418 = vector.multi_reduction <add>, %417, %cst_133 [1] : vector<24x32xf32> to vector<24xf32>
    %419 = vector.shape_cast %418 : vector<24xf32> to vector<24x1xf32>
    %cst_134 = arith.constant 3.200000e+01 : f32
    %420 = vector.broadcast %cst_134 : f32 to vector<24x1xf32>
    %421 = arith.divf %419, %420 : vector<24x1xf32>
    %422 = vector.broadcast %414 : vector<24x1xf32> to vector<24x32xf32>
    %423 = arith.subf %410, %422 : vector<24x32xf32>
    %cst_135 = arith.constant 9.99999974E-6 : f32
    %424 = vector.broadcast %cst_135 : f32 to vector<24x1xf32>
    %425 = arith.addf %421, %424 : vector<24x1xf32>
    %426 = math.rsqrt %425 : vector<24x1xf32>
    %427 = vector.broadcast %426 : vector<24x1xf32> to vector<24x32xf32>
    %428 = arith.mulf %423, %427 : vector<24x32xf32>
    %429 = vector.broadcast %318 : vector<1x32xf32> to vector<24x32xf32>
    %430 = arith.mulf %428, %429 : vector<24x32xf32>
    %431 = vector.broadcast %319 : vector<1x32xf32> to vector<24x32xf32>
    %432 = arith.addf %430, %431 : vector<24x32xf32>
    %c0_136 = arith.constant 0 : index
    %c0_137 = arith.constant 0 : index
    %433 = vector.load %arg9[%c0_136, %c0_137] : memref<24x32xf32, #tpu.memory_space<vmem>>, vector<24x32xf32>
    tpu.vector_store %arg9[%c0_136, %c0_137], %432 {strides = array<i32>} : memref<24x32xf32, #tpu.memory_space<vmem>>, vector<24x32xf32>,
    %434 = vector.extract_strided_slice %432 {offsets = [0, 0], sizes = [2, 32], strides = [1, 1]} : vector<24x32xf32> to vector<2x32xf32>
    %c0_138 = arith.constant 0 : index
    %c0_139 = arith.constant 0 : index
    %435 = vector.load %arg10[%c0_138, %c0_139] : memref<6x32xf32, #tpu.memory_space<vmem>>, vector<2x32xf32>
    tpu.vector_store %arg10[%c0_138, %c0_139], %434 {strides = array<i32>} : memref<6x32xf32, #tpu.memory_space<vmem>>, vector<2x32xf32>,
    %436 = vector.extract_strided_slice %432 {offsets = [9, 0], sizes = [2, 32], strides = [1, 1]} : vector<24x32xf32> to vector<2x32xf32>
    %c2_140 = arith.constant 2 : index
    %c0_141 = arith.constant 0 : index
    %437 = vector.load %arg10[%c2_140, %c0_141] : memref<6x32xf32, #tpu.memory_space<vmem>>, vector<2x32xf32>
    tpu.vector_store %arg10[%c2_140, %c0_141], %436 {strides = array<i32>} : memref<6x32xf32, #tpu.memory_space<vmem>>, vector<2x32xf32>,
    %438 = vector.extract_strided_slice %432 {offsets = [18, 0], sizes = [2, 32], strides = [1, 1]} : vector<24x32xf32> to vector<2x32xf32>
    %c4_142 = arith.constant 4 : index
    %c0_143 = arith.constant 0 : index
    %439 = vector.load %arg10[%c4_142, %c0_143] : memref<6x32xf32, #tpu.memory_space<vmem>>, vector<2x32xf32>
    tpu.vector_store %arg10[%c4_142, %c0_143], %438 {strides = array<i32>} : memref<6x32xf32, #tpu.memory_space<vmem>>, vector<2x32xf32>,
    %c0_144 = arith.constant 0 : index
    %c0_145 = arith.constant 0 : index
    %440 = vector.load %arg10[%c0_144, %c0_145] : memref<6x32xf32, #tpu.memory_space<vmem>>, vector<6x32xf32>
    %c3 = arith.constant 3 : index
    %c0_146 = arith.constant 0 : index
    %c0_147 = arith.constant 0 : index
    %441 = vector.load %arg3[%c3, %c0_146, %c0_147] : memref<4x32x96xbf16, #tpu.memory_space<vmem>>, vector<1x32x96xbf16>
    %442 = vector.shape_cast %441 : vector<1x32x96xbf16> to vector<32x96xbf16>
    %c3_148 = arith.constant 3 : index
    %c0_149 = arith.constant 0 : index
    %c0_150 = arith.constant 0 : index
    %c0_151 = arith.constant 0 : index
    %443 = vector.load %arg4[%c3_148, %c0_149, %c0_150, %c0_151] : memref<4x4x8x32xbf16, #tpu.memory_space<vmem>>, vector<1x4x8x32xbf16>
    %444 = vector.shape_cast %443 : vector<1x4x8x32xbf16> to vector<4x8x32xbf16>
    %c3_152 = arith.constant 3 : index
    %c0_153 = arith.constant 0 : index
    %c0_154 = arith.constant 0 : index
    %445 = vector.load %arg5[%c3_152, %c0_153, %c0_154] : memref<4x32x64xbf16, #tpu.memory_space<vmem>>, vector<1x32x64xbf16>
    %446 = vector.shape_cast %445 : vector<1x32x64xbf16> to vector<32x64xbf16>
    %c3_155 = arith.constant 3 : index
    %c0_156 = arith.constant 0 : index
    %c0_157 = arith.constant 0 : index
    %447 = vector.load %arg6[%c3_155, %c0_156, %c0_157] : memref<4x64x32xbf16, #tpu.memory_space<vmem>>, vector<1x64x32xbf16>
    %448 = vector.shape_cast %447 : vector<1x64x32xbf16> to vector<64x32xbf16>
    %c3_158 = arith.constant 3 : index
    %c0_159 = arith.constant 0 : index
    %c0_160 = arith.constant 0 : index
    %449 = vector.load %arg7[%c3_158, %c0_159, %c0_160] : memref<4x8x128xf32, #tpu.memory_space<vmem>>, vector<1x8x128xf32>
    %450 = vector.shape_cast %449 : vector<1x8x128xf32> to vector<8x128xf32>
    %451 = vector.extract_strided_slice %450 {offsets = [0, 0], sizes = [1, 96], strides = [1, 1]} : vector<8x128xf32> to vector<1x96xf32>
    %452 = vector.extract_strided_slice %450 {offsets = [1, 0], sizes = [1, 32], strides = [1, 1]} : vector<8x128xf32> to vector<1x32xf32>
    %453 = vector.extract_strided_slice %450 {offsets = [2, 0], sizes = [1, 64], strides = [1, 1]} : vector<8x128xf32> to vector<1x64xf32>
    %454 = vector.extract_strided_slice %450 {offsets = [3, 0], sizes = [1, 32], strides = [1, 1]} : vector<8x128xf32> to vector<1x32xf32>
    %455 = vector.extract_strided_slice %450 {offsets = [4, 0], sizes = [1, 32], strides = [1, 1]} : vector<8x128xf32> to vector<1x32xf32>
    %456 = vector.extract_strided_slice %450 {offsets = [5, 0], sizes = [1, 32], strides = [1, 1]} : vector<8x128xf32> to vector<1x32xf32>
    %457 = vector.extract_strided_slice %450 {offsets = [6, 0], sizes = [1, 32], strides = [1, 1]} : vector<8x128xf32> to vector<1x32xf32>
    %458 = vector.extract_strided_slice %450 {offsets = [7, 0], sizes = [1, 32], strides = [1, 1]} : vector<8x128xf32> to vector<1x32xf32>
    %459 = arith.truncf %440 : vector<6x32xf32> to vector<6x32xbf16>
    %cst_161 = arith.constant dense<0.000000e+00> : vector<6x96xf32>
    %460 = tpu.matmul %459, %442, %cst_161 {dimension_numbers = #tpu.dot_dimension_numbers<[1], [0], [0], [1], [0, 0, 1, 1], [], []>} : vector<6x32xbf16>, vector<32x96xbf16>, vector<6x96xf32> -> vector<6x96xf32>
    %461 = vector.broadcast %451 : vector<1x96xf32> to vector<6x96xf32>
    %462 = arith.addf %460, %461 : vector<6x96xf32>
    %463 = vector.extract_strided_slice %462 {offsets = [0, 0], sizes = [6, 8], strides = [1, 1]} : vector<6x96xf32> to vector<6x8xf32>
    %464 = vector.extract_strided_slice %462 {offsets = [0, 8], sizes = [6, 8], strides = [1, 1]} : vector<6x96xf32> to vector<6x8xf32>
    %465 = vector.extract_strided_slice %462 {offsets = [0, 16], sizes = [6, 8], strides = [1, 1]} : vector<6x96xf32> to vector<6x8xf32>
    %466 = vector.extract_strided_slice %462 {offsets = [0, 24], sizes = [6, 8], strides = [1, 1]} : vector<6x96xf32> to vector<6x8xf32>
    %467 = vector.shape_cast %463 : vector<6x8xf32> to vector<1x6x8xf32>
    %468 = vector.shape_cast %464 : vector<6x8xf32> to vector<1x6x8xf32>
    %469 = vector.shape_cast %465 : vector<6x8xf32> to vector<1x6x8xf32>
    %470 = vector.shape_cast %466 : vector<6x8xf32> to vector<1x6x8xf32>
    %471 = tpu.concatenate %467, %468, %469, %470 in 0 : vector<1x6x8xf32>, vector<1x6x8xf32>, vector<1x6x8xf32>, vector<1x6x8xf32> -> vector<4x6x8xf32>
    %472 = arith.truncf %471 : vector<4x6x8xf32> to vector<4x6x8xbf16>
    %473 = vector.extract_strided_slice %462 {offsets = [0, 32], sizes = [6, 8], strides = [1, 1]} : vector<6x96xf32> to vector<6x8xf32>
    %474 = vector.extract_strided_slice %462 {offsets = [0, 40], sizes = [6, 8], strides = [1, 1]} : vector<6x96xf32> to vector<6x8xf32>
    %475 = vector.extract_strided_slice %462 {offsets = [0, 48], sizes = [6, 8], strides = [1, 1]} : vector<6x96xf32> to vector<6x8xf32>
    %476 = vector.extract_strided_slice %462 {offsets = [0, 56], sizes = [6, 8], strides = [1, 1]} : vector<6x96xf32> to vector<6x8xf32>
    %477 = vector.shape_cast %473 : vector<6x8xf32> to vector<1x6x8xf32>
    %478 = vector.shape_cast %474 : vector<6x8xf32> to vector<1x6x8xf32>
    %479 = vector.shape_cast %475 : vector<6x8xf32> to vector<1x6x8xf32>
    %480 = vector.shape_cast %476 : vector<6x8xf32> to vector<1x6x8xf32>
    %481 = tpu.concatenate %477, %478, %479, %480 in 0 : vector<1x6x8xf32>, vector<1x6x8xf32>, vector<1x6x8xf32>, vector<1x6x8xf32> -> vector<4x6x8xf32>
    %482 = arith.truncf %481 : vector<4x6x8xf32> to vector<4x6x8xbf16>
    %483 = vector.extract_strided_slice %462 {offsets = [0, 64], sizes = [6, 8], strides = [1, 1]} : vector<6x96xf32> to vector<6x8xf32>
    %484 = vector.extract_strided_slice %462 {offsets = [0, 72], sizes = [6, 8], strides = [1, 1]} : vector<6x96xf32> to vector<6x8xf32>
    %485 = vector.extract_strided_slice %462 {offsets = [0, 80], sizes = [6, 8], strides = [1, 1]} : vector<6x96xf32> to vector<6x8xf32>
    %486 = vector.extract_strided_slice %462 {offsets = [0, 88], sizes = [6, 8], strides = [1, 1]} : vector<6x96xf32> to vector<6x8xf32>
    %487 = vector.shape_cast %483 : vector<6x8xf32> to vector<1x6x8xf32>
    %488 = vector.shape_cast %484 : vector<6x8xf32> to vector<1x6x8xf32>
    %489 = vector.shape_cast %485 : vector<6x8xf32> to vector<1x6x8xf32>
    %490 = vector.shape_cast %486 : vector<6x8xf32> to vector<1x6x8xf32>
    %491 = tpu.concatenate %487, %488, %489, %490 in 0 : vector<1x6x8xf32>, vector<1x6x8xf32>, vector<1x6x8xf32>, vector<1x6x8xf32> -> vector<4x6x8xf32>
    %492 = arith.truncf %491 : vector<4x6x8xf32> to vector<4x6x8xbf16>
    "tpu.trace_start"() <{level = 10 : i32, message = "hqd,hkd->hqk"}> : () -> ()
    %cst_162 = arith.constant dense<0.000000e+00> : vector<4x6x6xf32>
    %493 = tpu.matmul %472, %482, %cst_162 {dimension_numbers = #tpu.dot_dimension_numbers<[2], [2], [1], [1], [0, 0, 0, 1, 1, 1], [0], [0]>} : vector<4x6x8xbf16>, vector<4x6x8xbf16>, vector<4x6x6xf32> -> vector<4x6x6xf32>
    "tpu.trace_stop"() : () -> ()
    %cst_163 = arith.constant 0.353553385 : f32
    %494 = vector.broadcast %cst_163 : f32 to vector<4x6x6xf32>
    %495 = arith.mulf %493, %494 : vector<4x6x6xf32>
    %cst_164 = arith.constant dense<0xFF800000> : vector<4x6xf32>
    %496 = vector.multi_reduction <maximumf>, %495, %cst_164 [2] : vector<4x6x6xf32> to vector<4x6xf32>
    %497 = vector.shape_cast %496 : vector<4x6xf32> to vector<4x6x1xf32>
    %498 = vector.broadcast %497 : vector<4x6x1xf32> to vector<4x6x6xf32>
    %499 = arith.subf %495, %498 : vector<4x6x6xf32>
    %500 = math.exp %499 : vector<4x6x6xf32>
    %cst_165 = arith.constant dense<0.000000e+00> : vector<4x6xf32>
    %501 = vector.multi_reduction <add>, %500, %cst_165 [2] : vector<4x6x6xf32> to vector<4x6xf32>
    %502 = vector.shape_cast %501 : vector<4x6xf32> to vector<4x6x1xf32>
    %503 = tpu.reciprocal %502 {approx = true} : vector<4x6x1xf32> -> vector<4x6x1xf32>
    %504 = vector.broadcast %503 : vector<4x6x1xf32> to vector<4x6x6xf32>
    %505 = arith.mulf %500, %504 : vector<4x6x6xf32>
    %506 = arith.truncf %505 : vector<4x6x6xf32> to vector<4x6x6xbf16>
    "tpu.trace_start"() <{level = 10 : i32, message = "hqk,hkd->hqd"}> : () -> ()
    %cst_166 = arith.constant dense<0.000000e+00> : vector<4x6x8xf32>
    %507 = tpu.matmul %506, %492, %cst_166 {dimension_numbers = #tpu.dot_dimension_numbers<[2], [1], [1], [2], [0, 0, 0, 1, 1, 2], [0], [0]>} : vector<4x6x6xbf16>, vector<4x6x8xbf16>, vector<4x6x8xf32> -> vector<4x6x8xf32>
    "tpu.trace_stop"() : () -> ()
    %508 = arith.truncf %507 : vector<4x6x8xf32> to vector<4x6x8xbf16>
    "tpu.trace_start"() <{level = 10 : i32, message = "hqd,hde->hqe"}> : () -> ()
    %cst_167 = arith.constant dense<0.000000e+00> : vector<4x6x32xf32>
    %509 = tpu.matmul %508, %444, %cst_167 {dimension_numbers = #tpu.dot_dimension_numbers<[2], [1], [1], [2], [0, 0, 0, 1, 1, 2], [0], [0]>} : vector<4x6x8xbf16>, vector<4x8x32xbf16>, vector<4x6x32xf32> -> vector<4x6x32xf32>
    "tpu.trace_stop"() : () -> ()
    %cst_168 = arith.constant dense<0.000000e+00> : vector<6x32xf32>
    %510 = vector.multi_reduction <add>, %509, %cst_168 [0] : vector<4x6x32xf32> to vector<6x32xf32>
    %511 = vector.broadcast %452 : vector<1x32xf32> to vector<6x32xf32>
    %512 = arith.addf %510, %511 : vector<6x32xf32>
    %513 = arith.addf %440, %512 : vector<6x32xf32>
    %cst_169 = arith.constant dense<0.000000e+00> : vector<6xf32>
    %514 = vector.multi_reduction <add>, %513, %cst_169 [1] : vector<6x32xf32> to vector<6xf32>
    %515 = vector.shape_cast %514 : vector<6xf32> to vector<6x1xf32>
    %cst_170 = arith.constant 3.200000e+01 : f32
    %516 = vector.broadcast %cst_170 : f32 to vector<6x1xf32>
    %517 = arith.divf %515, %516 : vector<6x1xf32>
    %518 = vector.broadcast %517 : vector<6x1xf32> to vector<6x32xf32>
    %519 = arith.subf %513, %518 : vector<6x32xf32>
    %520 = arith.mulf %519, %519 : vector<6x32xf32>
    %cst_171 = arith.constant dense<0.000000e+00> : vector<6xf32>
    %521 = vector.multi_reduction <add>, %520, %cst_171 [1] : vector<6x32xf32> to vector<6xf32>
    %522 = vector.shape_cast %521 : vector<6xf32> to vector<6x1xf32>
    %cst_172 = arith.constant 3.200000e+01 : f32
    %523 = vector.broadcast %cst_172 : f32 to vector<6x1xf32>
    %524 = arith.divf %522, %523 : vector<6x1xf32>
    %525 = vector.broadcast %517 : vector<6x1xf32> to vector<6x32xf32>
    %526 = arith.subf %513, %525 : vector<6x32xf32>
    %cst_173 = arith.constant 9.99999974E-6 : f32
    %527 = vector.broadcast %cst_173 : f32 to vector<6x1xf32>
    %528 = arith.addf %524, %527 : vector<6x1xf32>
    %529 = math.rsqrt %528 : vector<6x1xf32>
    %530 = vector.broadcast %529 : vector<6x1xf32> to vector<6x32xf32>
    %531 = arith.mulf %526, %530 : vector<6x32xf32>
    %532 = vector.broadcast %455 : vector<1x32xf32> to vector<6x32xf32>
    %533 = arith.mulf %531, %532 : vector<6x32xf32>
    %534 = vector.broadcast %456 : vector<1x32xf32> to vector<6x32xf32>
    %535 = arith.addf %533, %534 : vector<6x32xf32>
    %536 = arith.truncf %535 : vector<6x32xf32> to vector<6x32xbf16>
    %cst_174 = arith.constant dense<0.000000e+00> : vector<6x64xf32>
    %537 = tpu.matmul %536, %446, %cst_174 {dimension_numbers = #tpu.dot_dimension_numbers<[1], [0], [0], [1], [0, 0, 1, 1], [], []>} : vector<6x32xbf16>, vector<32x64xbf16>, vector<6x64xf32> -> vector<6x64xf32>
    %538 = vector.broadcast %453 : vector<1x64xf32> to vector<6x64xf32>
    %539 = arith.addf %537, %538 : vector<6x64xf32>
    %cst_175 = arith.constant 0.000000e+00 : f32
    %540 = vector.broadcast %cst_175 : f32 to vector<6x64xf32>
    %541 = arith.maximumf %539, %540 : vector<6x64xf32>
    %542 = arith.truncf %541 : vector<6x64xf32> to vector<6x64xbf16>
    %cst_176 = arith.constant dense<0.000000e+00> : vector<6x32xf32>
    %543 = tpu.matmul %542, %448, %cst_176 {dimension_numbers = #tpu.dot_dimension_numbers<[1], [0], [0], [1], [0, 0, 1, 1], [], []>} : vector<6x64xbf16>, vector<64x32xbf16>, vector<6x32xf32> -> vector<6x32xf32>
    %544 = vector.broadcast %454 : vector<1x32xf32> to vector<6x32xf32>
    %545 = arith.addf %543, %544 : vector<6x32xf32>
    %546 = arith.addf %535, %545 : vector<6x32xf32>
    %cst_177 = arith.constant dense<0.000000e+00> : vector<6xf32>
    %547 = vector.multi_reduction <add>, %546, %cst_177 [1] : vector<6x32xf32> to vector<6xf32>
    %548 = vector.shape_cast %547 : vector<6xf32> to vector<6x1xf32>
    %cst_178 = arith.constant 3.200000e+01 : f32
    %549 = vector.broadcast %cst_178 : f32 to vector<6x1xf32>
    %550 = arith.divf %548, %549 : vector<6x1xf32>
    %551 = vector.broadcast %550 : vector<6x1xf32> to vector<6x32xf32>
    %552 = arith.subf %546, %551 : vector<6x32xf32>
    %553 = arith.mulf %552, %552 : vector<6x32xf32>
    %cst_179 = arith.constant dense<0.000000e+00> : vector<6xf32>
    %554 = vector.multi_reduction <add>, %553, %cst_179 [1] : vector<6x32xf32> to vector<6xf32>
    %555 = vector.shape_cast %554 : vector<6xf32> to vector<6x1xf32>
    %cst_180 = arith.constant 3.200000e+01 : f32
    %556 = vector.broadcast %cst_180 : f32 to vector<6x1xf32>
    %557 = arith.divf %555, %556 : vector<6x1xf32>
    %558 = vector.broadcast %550 : vector<6x1xf32> to vector<6x32xf32>
    %559 = arith.subf %546, %558 : vector<6x32xf32>
    %cst_181 = arith.constant 9.99999974E-6 : f32
    %560 = vector.broadcast %cst_181 : f32 to vector<6x1xf32>
    %561 = arith.addf %557, %560 : vector<6x1xf32>
    %562 = math.rsqrt %561 : vector<6x1xf32>
    %563 = vector.broadcast %562 : vector<6x1xf32> to vector<6x32xf32>
    %564 = arith.mulf %559, %563 : vector<6x32xf32>
    %565 = vector.broadcast %457 : vector<1x32xf32> to vector<6x32xf32>
    %566 = arith.mulf %564, %565 : vector<6x32xf32>
    %567 = vector.broadcast %458 : vector<1x32xf32> to vector<6x32xf32>
    %568 = arith.addf %566, %567 : vector<6x32xf32>
    %569 = vector.extract_strided_slice %568 {offsets = [0, 0], sizes = [2, 32], strides = [1, 1]} : vector<6x32xf32> to vector<2x32xf32>
    %c0_182 = arith.constant 0 : index
    %c0_183 = arith.constant 0 : index
    %570 = vector.load %arg9[%c0_182, %c0_183] : memref<24x32xf32, #tpu.memory_space<vmem>>, vector<2x32xf32>
    tpu.vector_store %arg9[%c0_182, %c0_183], %569 {strides = array<i32>} : memref<24x32xf32, #tpu.memory_space<vmem>>, vector<2x32xf32>,
    %571 = vector.extract_strided_slice %568 {offsets = [2, 0], sizes = [2, 32], strides = [1, 1]} : vector<6x32xf32> to vector<2x32xf32>
    %c9_184 = arith.constant 9 : index
    %c0_185 = arith.constant 0 : index
    %572 = vector.load %arg9[%c9_184, %c0_185] : memref<24x32xf32, #tpu.memory_space<vmem>>, vector<2x32xf32>
    tpu.vector_store %arg9[%c9_184, %c0_185], %571 {strides = array<i32>} : memref<24x32xf32, #tpu.memory_space<vmem>>, vector<2x32xf32>,
    %573 = vector.extract_strided_slice %568 {offsets = [4, 0], sizes = [2, 32], strides = [1, 1]} : vector<6x32xf32> to vector<2x32xf32>
    %c18_186 = arith.constant 18 : index
    %c0_187 = arith.constant 0 : index
    %574 = vector.load %arg9[%c18_186, %c0_187] : memref<24x32xf32, #tpu.memory_space<vmem>>, vector<2x32xf32>
    tpu.vector_store %arg9[%c18_186, %c0_187], %573 {strides = array<i32>} : memref<24x32xf32, #tpu.memory_space<vmem>>, vector<2x32xf32>,
    %c0_188 = arith.constant 0 : index
    %c0_189 = arith.constant 0 : index
    %575 = vector.load %arg9[%c0_188, %c0_189] : memref<24x32xf32, #tpu.memory_space<vmem>>, vector<24x32xf32>
    %c0_190 = arith.constant 0 : index
    %c0_191 = arith.constant 0 : index
    %c0_192 = arith.constant 0 : index
    %576 = vector.load %arg8[%c0_190, %c0_191, %c0_192] : memref<1x24x32xf32, #tpu.memory_space<vmem>>, vector<1x24x32xf32>
    %577 = vector.shape_cast %576 : vector<1x24x32xf32> to vector<24x32xf32>
    %578 = vector.shape_cast %575 : vector<24x32xf32> to vector<1x24x32xf32>
    tpu.vector_store %arg8[%c0_190, %c0_191, %c0_192], %578 {strides = array<i32>} : memref<1x24x32xf32, #tpu.memory_space<vmem>>, vector<1x24x32xf32>,
    return
  }
  func.func @transform_0(%arg0: i32) -> (i32, i32, i32) {
    %c0_i32 = arith.constant 0 : i32
    %c0_i32_0 = arith.constant 0 : i32
    %c0_i32_1 = arith.constant 0 : i32
    return %arg0, %c0_i32, %c0_i32_0 : i32, i32, i32
  }
  func.func @transform_1(%arg0: i32) -> (i32, i32, i32) {
    %c0_i32 = arith.constant 0 : i32
    %c0_i32_0 = arith.constant 0 : i32
    %c0_i32_1 = arith.constant 0 : i32
    return %arg0, %c0_i32, %c0_i32_0 : i32, i32, i32
  }
  func.func @transform_2(%arg0: i32) -> (i32, i32, i32) {
    %c0_i32 = arith.constant 0 : i32
    %c0_i32_0 = arith.constant 0 : i32
    %c0_i32_1 = arith.constant 0 : i32
    %c0_i32_2 = arith.constant 0 : i32
    return %c0_i32, %c0_i32_0, %c0_i32_1 : i32, i32, i32
  }
  func.func @transform_3(%arg0: i32) -> (i32, i32, i32, i32) {
    %c0_i32 = arith.constant 0 : i32
    %c0_i32_0 = arith.constant 0 : i32
    %c0_i32_1 = arith.constant 0 : i32
    %c0_i32_2 = arith.constant 0 : i32
    %c0_i32_3 = arith.constant 0 : i32
    return %c0_i32, %c0_i32_0, %c0_i32_1, %c0_i32_2 : i32, i32, i32, i32
  }
  func.func @transform_4(%arg0: i32) -> (i32, i32, i32) {
    %c0_i32 = arith.constant 0 : i32
    %c0_i32_0 = arith.constant 0 : i32
    %c0_i32_1 = arith.constant 0 : i32
    %c0_i32_2 = arith.constant 0 : i32
    return %c0_i32, %c0_i32_0, %c0_i32_1 : i32, i32, i32
  }
  func.func @transform_5(%arg0: i32) -> (i32, i32, i32) {
    %c0_i32 = arith.constant 0 : i32
    %c0_i32_0 = arith.constant 0 : i32
    %c0_i32_1 = arith.constant 0 : i32
    %c0_i32_2 = arith.constant 0 : i32
    return %c0_i32, %c0_i32_0, %c0_i32_1 : i32, i32, i32
  }
  func.func @transform_6(%arg0: i32) -> (i32, i32, i32) {
    %c0_i32 = arith.constant 0 : i32
    %c0_i32_0 = arith.constant 0 : i32
    %c0_i32_1 = arith.constant 0 : i32
    %c0_i32_2 = arith.constant 0 : i32
    return %c0_i32, %c0_i32_0, %c0_i32_1 : i32, i32, i32
  }
  func.func @transform_7(%arg0: i32) -> (i32, i32, i32) {
    %c0_i32 = arith.constant 0 : i32
    %c0_i32_0 = arith.constant 0 : i32
    %c0_i32_1 = arith.constant 0 : i32
    return %arg0, %c0_i32, %c0_i32_0 : i32, i32, i32
  }
}

</mosaic_0001>

<bundles_post_ra>
// kernel: interact_forward_pallas.1
= control target key start
LH: loop header
LB: loop body
LE: loop exit
PB: predicated region body
PF: predicated region fallthrough
CT: control target
= control target key end

     0   :  { %s6128_s24 = smov 0   ;;  %s7288_s0 = inlined_call_operand.vmem [shape: f32[2,24,32], index: 0, kind: input, shape index: {}]   ;;  %s7289_s1 = inlined_call_operand.vmem [shape: f32[2,1,32], index: 1, kind: input, shape index: {}]   ;;  %s7290_s2 = inlined_call_operand.vmem [shape: bf16[4,32,96], index: 2, kind: input, shape index: {}]   ;;  %s7291_s3 = inlined_call_operand.vmem [shape: bf16[4,4,8,32], index: 3, kind: input, shape index: {}]   ;;  %s7292_s4 = inlined_call_operand.vmem [shape: bf16[4,32,64], index: 4, kind: input, shape index: {}]   ;;  %s7293_s5 = inlined_call_operand.vmem [shape: bf16[4,64,32], index: 5, kind: input, shape index: {}]   ;;  %s7294_s6 = inlined_call_operand.vmem [shape: f32[4,8,128], index: 6, kind: input, shape index: {}]   ;;  %s7295_s7 = inlined_call_operand.vmem [shape: f32[2,24,32], index: 7, kind: output, shape index: {}]  }
   0x1 LB: > { %s4983_s25 = sadd.s32 4294967295, %s6077_s24   ;;  %p4987_p0 = scmp.ge.s32.totalorder %s6077_s24, 1  ;;  %s6077_s24 = sphi %s6128_s24, %s17_s24  }
   0x2   : > { %p245_p1 = scmp.lt.s32.totalorder %s6077_s24, 3 }
   0x4   : > { %p246_p2 = pnand %p4987_p0, %p245_p1 }
   0x5   : > { %v5877_v0 = vld [vmem:[%s7290_s2] sm:$0xff] (!%p246_p2)   ;;  %p280_p3 = scmp.lt.s32.totalorder (!%p246_p2), %s4983_s25, 1  ;;  %v5878_v1 = vld [vmem:[%s7290_s2 + $0x8] sm:$0xff] (!%p246_p2)   ;;  %vm307_vm0 = vcmask (!%p246_p2), 261120   ;;  %v311_v14 = vlaneseq (!%p246_p2)  ;;  %vm483_vm1 = vcmask (!%p246_p2), 64512   ;;  %s6079_s16 = smov (!%p246_p2), 112  }
   0x6   : > { %249 = sbr.rel (%p246_p2) target bundleno = 10169 (0x27b9), region = 48  ;;  %5365 = vmatprep.subr.bf16.mxu1 (!%p246_p2), %v5877_v0  ;;  %v6178_v17 = vld [vmem:[%s7294_s6] sm:$0xff] (!%p246_p2)  ;;  %s6080_s17 = smov (!%p246_p2), 120   ;;  %vm766_vm9 = vcmask (!%p246_p2), 195584   ;;  %vm918_vm10 = vcmask (!%p246_p2), 1043456   ;;  %vm1582_vm11 = vcmask (!%p246_p2), 523264  }
   0x7   : > { %5366 = vmatpush3.bf16.msra.mxu1 (!%p246_p2), %v5877_v0  ;;  %v6170_v15 = vshrl.u32 (!%p246_p2), %v311_v14, 7  ;;  %s6081_s18 = smov (!%p246_p2), 104   ;;  %s6082_s19 = smov (!%p246_p2), 96   ;;  %v316_v0 = vand.u32 (!%p246_p2), 127, %v311_v14  ;;  %vm6087_vm12 = vmmov (!%p246_p2), 0   ;;  %vm1696_vm13 = vcmask (!%p246_p2), 254976  }
   0x8   : > { %5367 = vmatprep.subr.bf16.mxu1 (!%p246_p2), %v5878_v1  ;;  %s6085_s20 = smov (!%p246_p2), 64   ;;  %vm1698_vm14 = vcmask (!%p246_p2), 256001   ;;  %vm1700_vm15 = vcmask (!%p246_p2), 257026  }
   0x9   : > { %v6173_v16 = vsub.s32 (!%p246_p2), 0, %v6170_v15  ;;  %v314_v63 = vadd.s32 (!%p246_p2), 16, %v6170_v15  ;;  %vm332_vm3 = vcmp.ge.s32.totalorder (!%p246_p2), %v316_v0, 9  ;;  %vm334_vm4 = vcmp.ge.s32.totalorder (!%p246_p2), %v316_v0, 18 }
   0xb   : > { %5368 = vmatpush3.bf16.msra.mxu1 (!%p246_p2), %v5878_v1  ;;  %v372_v18 = vrot.slane (!%p246_p2), %v6178_v17, %v6173_v16  ;;  %vm325_vm2 = vcmp.ge.s32.totalorder (!%p246_p2), %v314_v63, 18  ;;  %v6083_v1 = vmov (!%p246_p2), 0  }
   0xd   : > { %s7297_s25 = smov (!%p280_p3, %s4983_s25), 1 }
   0xe   : > { %s5829_s30 = smul.u32 24, %s7297_s25  ;;  %s287_s10 = scalar_lea.vmem %s7289_s1, %s7297_s25 }
   0xf   : > { %v4990_v2 = vld [vmem:[%s287_s10] ss:$0 sm:$0xff] }
  0x10   : > { %s284_s13 = scalar_lea.vmem %s7288_s0, %s5829_s30 }
  0x11   : > { %v294_v3 = vld [vmem:[%s284_s13] sm:$0xff]  ;;  %v295_v4 = vld [vmem:[%s284_s13 + $0x8] sm:$0xff]  ;;  %v296_v5 = vld [vmem:[%s284_s13 + $0x10] sm:$0xff] }
  0x12   : > { %v304_v6 = vadd.f32 %v4990_v2, %v294_v3  ;;  %v305_v7 = vadd.f32 %v4990_v2, %v295_v4  ;;  %v306_v8 = vadd.f32 %v4990_v2, %v296_v5  ;;  %v328_v2 = vsel %vm325_vm2, 1, %v6083_v1 }
  0x13   : > { %v333_v3 = vsel %vm332_vm3, 1, %v6083_v1  ;;  %v335_v4 = vsel %vm334_vm4, 1, %v6083_v1  ;;  %v313_v5 = vadd.s32 8, %v6170_v15  ;;  %vm2003_vm2 = vcmask 46080  }
  0x14   : > { %308 = vst.msk [vmem:[#allocation2] sm:$0xff] %vm307_vm0, %v304_v6  ;;  %309 = vst.msk [vmem:[#allocation2 + $0x8] sm:$0xff] %vm307_vm0, %v305_v7  ;;  %v331_v6 = vadd.s32 1, %v328_v2  ;;  %v336_v7 = vadd.s32 %v335_v4, %v333_v3  ;;  %vm2058_vm3 = vcmask 1042432   ;;  %vm2054_vm4 = vcmask 48128  }
  0x15   : > { %310 = vst.msk [vmem:[#allocation2 + $0x10] sm:$0xff] %vm307_vm0, %v306_v8  ;;  %vm318_vm5 = vcmp.ge.s32.totalorder %v313_v5, 9 }
  0x16   : > { %vm339_vm6 = vcmp.eq.s32.totalorder %v331_v6, %v336_v7  ;;  %v321_v8 = vsel %vm318_vm5, 1, %v6083_v1  ;;  %vm4991_vm7 = vcmp.eq.s32.totalorder %v336_v7, 0  ;;  %vm2434_vm5 = vcmask 259072  }
  0x17   : > { %vm338_vm8 = vcmp.eq.s32.totalorder %v321_v8, %v336_v7 }
  0x1b   : > { %v6157_v9 = vld [vmem:[#allocation2] sm:$0xff]  ;;  %v6159_v10 = vld [vmem:[#allocation2 + $0x8] sm:$0xff] }
  0x1c   : > { %v6161_v11 = vld [vmem:[#allocation2 + $0x10] sm:$0xff]  ;;  %v367_v12 = vpack.c.bf16 %v6159_v10, %v6157_v9 }
  0x1d   : > { %v368_v13 = vpack.c.bf16 %v6161_v11, %v6161_v11 }
  0x1e   : > { %5369 = vmatprep.mubr.msk.bf16.mxu1 %vm307_vm0, %v367_v12 }
  0x1f   : > { %5370 = vmatmul.mubr.msk.bf16.vlgmr.msra.gmra.mrb[0].mxu1 %vm307_vm0, %v368_v13  ;;  %v6084_v13 = vmov -1e+30  }
  0xf2   : > { %v5371_v19 = vpop.f32.mrb[0].mxu1 }
  0xf3   : > { %v425_v20 = vpop.f32.mrb[1].mxu1  ;;  %v434_v27 = vadd.f32 %v5371_v19, %v372_v18 }
  0xf4   : > { %v5372_v21 = vpop.f32.mrb[2].mxu1  ;;  %v426_v23 = vadd.f32 %v425_v20, %v372_v18 }
  0xf5   : > { %v428_v22 = vpop.f32.mrb[3].mxu1  ;;  %v6194_v28 = vpack.c.bf16 %v434_v27, %v434_v27 }
  0xf6   : > { %v429_v24 = vadd.f32 %v428_v22, %v372_v18  ;;  %v6255_v18 = vsel %vm339_vm6, 0.0, %v6084_v13  ;;  %v6257_v22 = vsel %vm4991_vm7, 0.0, %v6084_v13  ;;  %vm2630_vm6 = vcmask 259076  }
  0xf8   : > { %v5852_v25 = vpack.i.bf16 %v429_v24, %v426_v23  ;;  %v6182_v26 = vpack.c.bf16 %v429_v24, %v426_v23 }
  0xfa   : > { %5853 = vrot.lane.b32.xlu1 %v5852_v25, %s6079_s16  ;;  %5848 = vrot.lane.b32.xlu0 %v5852_v25, %s6080_s17 }
  0xfb   : > { %5377 = vmatprep.mubr.msk.bf16.mxu1 %vm483_vm1, %v6182_v26 }
  0xfe   : > { %5858 = vrot.lane.b32.xlu1 %v5852_v25, %s6081_s18  ;;  %446 = vrot.lane.b32.xlu0 %v434_v27, %s6080_s17  ;;  %v6262_v25 = vsel %vm338_vm8, 0.0, %v6084_v13 }
 0x102   : > { %464 = vrot.lane.b32.xlu1 %v434_v27, %s6081_s18  ;;  %455 = vrot.lane.b32.xlu0 %v434_v27, %s6079_s16 }
 0x106   : > { %479 = vrot.lane.b32.xlu0 %v6182_v26, %s6082_s19 }
 0x10a   : > { %481 = vrot.lane.b32.xlu0 %v6194_v28, %s6082_s19 }
 0x16c   : > { %v5854_v29 = vpop.permute.xlu1 %5853  ;;  %v5849_v30 = vpop.permute.xlu0 %5848 }
 0x16d   : > { %v5856_v31 = vunpack.i.h.bf16 %v5854_v29  ;;  %v5855_v32 = vunpack.i.l.bf16 %v5854_v29  ;;  %v5851_v33 = vunpack.i.h.bf16 %v5849_v30  ;;  %v5850_v34 = vunpack.i.l.bf16 %v5849_v30 }
 0x16f   : > { %v6198_v35 = vpack.c.bf16 %v5851_v33, %v5850_v34  ;;  %v6200_v36 = vpack.c.bf16 %v5856_v31, %v5855_v32 }
 0x170   : > { %v5859_v37 = vpop.permute.xlu1 %5858  ;;  %v447_v38 = vpop.permute.xlu0 %446 }
 0x171   : > { %546 = vrot.lane.b32.xlu1 %v6198_v35, %s6082_s19  ;;  %5385 = vmatprep.mubr.msk.bf16.mxu0 %vm483_vm1, %v6198_v35  ;;  %v5861_v39 = vunpack.i.h.bf16 %v5859_v37  ;;  %v5860_v40 = vunpack.i.l.bf16 %v5859_v37  ;;  %v6208_v41 = vpack.c.bf16 %v447_v38, %v447_v38 }
 0x172   : > { %612 = vrot.lane.b32.xlu0 %v6200_v36, %s6082_s19 }
 0x173   : > { %v6216_v44 = vpack.c.bf16 %v5861_v39, %v5860_v40 }
 0x174   : > { %v456_v42 = vpop.permute.xlu0 %455  ;;  %v465_v45 = vpop.permute.xlu1 %464 }
 0x175   : > { %v6210_v43 = vpack.c.bf16 %v456_v42, %v456_v42  ;;  %548 = vrot.lane.b32.xlu1 %v6208_v41, %s6082_s19  ;;  %v6222_v48 = vpack.c.bf16 %v465_v45, %v465_v45 }
 0x177   : > { %614 = vrot.lane.b32.xlu0 %v6210_v43, %s6082_s19 }
 0x178   : > { %v480_v46 = vpop.permute.xlu0 %479 }
 0x179   : > { %678 = vrot.lane.b32.xlu1 %v6216_v44, %s6082_s19  ;;  %5797 = vmatprep.subr.msk.bf16.mxu1 %vm483_vm1, %v480_v46  ;;  %v491_v47 = vsel %vm483_vm1, %v480_v46, 0 }
 0x17a   : > { %5374 = vmatpush3.bf16.xpose.msra.mxu1 %v491_v47 }
 0x17c   : > { %v482_v49 = vpop.permute.xlu0 %481 }
 0x17d   : > { %680 = vrot.lane.b32.xlu1 %v6222_v48, %s6082_s19  ;;  %5798 = vmatprep.subr.msk.bf16.mxu1 %vm483_vm1, %v482_v49  ;;  %v494_v50 = vsel %vm483_vm1, %v482_v49, 0 }
 0x182   : > { %5376 = vmatpush3.bf16.xpose.msra.mxu1 %v494_v50 }
 0x189   : > { %5378 = vmatmul.mubr.msk.bf16.vlgmr.msra.gmra.mrb[4].mxu1 %vm483_vm1, %v6194_v28 }
 0x18a   : > { %5393 = vmatprep.mubr.msk.bf16.mxu1 %vm483_vm1, %v6200_v36 }
 0x1e3   : > { %v547_v51 = vpop.permute.xlu1 %546 }
 0x1e4   : > { %v613_v52 = vpop.permute.xlu0 %612  ;;  %5799 = vmatprep.subr.msk.bf16.mxu0 %vm483_vm1, %v547_v51  ;;  %v557_v53 = vsel %vm483_vm1, %v547_v51, 0 }
 0x1e5   : > { %5801 = vmatprep.subr.msk.bf16.mxu1 %vm483_vm1, %v613_v52  ;;  %5382 = vmatpush3.bf16.xpose.msra.mxu0 %v557_v53  ;;  %v623_v54 = vsel %vm483_vm1, %v613_v52, 0 }
 0x1e6   : > { %5390 = vmatpush3.bf16.xpose.msra.mxu1 %v623_v54 }
 0x1e7   : > { %v549_v55 = vpop.permute.xlu1 %548 }
 0x1e8   : > { %5800 = vmatprep.subr.msk.bf16.mxu0 %vm483_vm1, %v549_v55  ;;  %v560_v57 = vsel %vm483_vm1, %v549_v55, 0 }
 0x1e9   : > { %v615_v56 = vpop.permute.xlu0 %614 }
 0x1ea   : > { %5802 = vmatprep.subr.msk.bf16.mxu1 %vm483_vm1, %v615_v56  ;;  %v626_v59 = vsel %vm483_vm1, %v615_v56, 0 }
 0x1eb   : > { %v679_v58 = vpop.permute.xlu1 %678 }
 0x1ec   : > { %v689_v60 = vsel %vm483_vm1, %v679_v58, 0 }
 0x1ed   : > { %5384 = vmatpush3.bf16.xpose.msra.mxu0 %v560_v57 }
 0x1ee   : > { %5392 = vmatpush3.bf16.xpose.msra.mxu1 %v626_v59  ;;  %5803 = vmatprep.subr.msk.bf16.mxu0 %vm483_vm1, %v679_v58 }
 0x1ef   : > { %v681_v61 = vpop.permute.xlu1 %680 }
 0x1f0   : > { %v692_v62 = vsel %vm483_vm1, %v681_v61, 0 }
 0x1f4   : > { %5386 = vmatmul.mubr.msk.bf16.vlgmr.msra.gmra.mrb[0].mxu0 %vm483_vm1, %v6208_v41 }
 0x1f5   : > { %5394 = vmatmul.mubr.msk.bf16.vlgmr.msra.gmra.mrb[8].mxu1 %vm483_vm1, %v6210_v43  ;;  %5398 = vmatpush3.bf16.xpose.msra.mxu0 %v689_v60 }
 0x1f6   : > { %5401 = vmatprep.mubr.msk.bf16.mxu0 %vm483_vm1, %v6216_v44  ;;  %5804 = vmatprep.subr.msk.bf16.mxu0 %vm483_vm1, %v681_v61 }
 0x1fd   : > { %5400 = vmatpush3.bf16.xpose.msra.mxu0 %v692_v62 }
 0x204   : > { %5402 = vmatmul.mubr.msk.bf16.vlgmr.msra.gmra.mrb[4].mxu0 %vm483_vm1, %v6222_v48 }
 0x25c   : > { %v5379_v12 = vpop.f32.mrb[4].mxu1 }
 0x25d   : > { %v744_v14 = vmul.f32 0.35355338, %v5379_v12  ;;  %v530_v19 = vpop.f32.mrb[5].mxu1 }
 0x25e   : > { %v742_v20 = vmul.f32 0.35355338, %v530_v19  ;;  %v5380_v21 = vpop.f32.mrb[6].mxu1 }
 0x25f   : > { %v533_v23 = vpop.f32.mrb[7].mxu1  ;;  %v6260_v24 = vadd.f32 %v744_v14, %v6255_v18 }
 0x260   : > { %v743_v27 = vmul.f32 0.35355338, %v533_v23  ;;  %v6267_v30 = vadd.f32 %v742_v20, %v6257_v22 }
 0x261   : > { %v773_v29 = vsel %vm766_vm9, %v6260_v24, -inf }
 0x262   : > { %774 = vmax.xlane.f32.xlu0 %v773_v29  ;;  %v755_v31 = vadd.f32 %v743_v27, %v6262_v25  ;;  %v767_v33 = vsel %vm766_vm9, %v6267_v30, -inf }
 0x264   : > { %v770_v32 = vsel %vm766_vm9, %v755_v31, -inf }
 0x265   : > { %771 = vmax.xlane.f32.xlu1 %v770_v32 }
 0x266   : > { %768 = vmax.xlane.f32.xlu0 %v767_v33 }
 0x2c7   : > { %v5387_v34 = vpop.f32.mrb[0].mxu0 }
 0x2c8   : > { %v747_v37 = vmul.f32 0.35355338, %v5387_v34  ;;  %v5395_v38 = vpop.f32.mrb[8].mxu1  ;;  %v596_v39 = vpop.f32.mrb[1].mxu0 }
 0x2c9   : > { %v750_v40 = vmul.f32 0.35355338, %v5395_v38  ;;  %v745_v42 = vmul.f32 0.35355338, %v596_v39  ;;  %v662_v45 = vpop.f32.mrb[9].mxu1  ;;  %v5388_v46 = vpop.f32.mrb[2].mxu0 }
 0x2ca   : > { %v748_v47 = vmul.f32 0.35355338, %v662_v45  ;;  %v5396_v49 = vpop.f32.mrb[10].mxu1  ;;  %v599_v50 = vpop.f32.mrb[3].mxu0  ;;  %v6274_v51 = vadd.f32 %v747_v37, %v6255_v18 }
 0x2cb   : > { %v665_v52 = vpop.f32.mrb[11].mxu1  ;;  %v6277_v53 = vadd.f32 %v750_v40, %v6255_v18  ;;  %v6282_v56 = vadd.f32 %v745_v42, %v6257_v22  ;;  %v746_v57 = vmul.f32 0.35355338, %v599_v50 }
 0x2cc   : > { %v749_v54 = vmul.f32 0.35355338, %v665_v52  ;;  %v782_v55 = vsel %vm766_vm9, %v6274_v51, -inf  ;;  %v6287_v59 = vadd.f32 %v748_v47, %v6257_v22 }
 0x2cd   : > { %783 = vmax.xlane.f32.xlu0 %v782_v55  ;;  %v791_v58 = vsel %vm766_vm9, %v6277_v53, -inf  ;;  %v776_v60 = vsel %vm766_vm9, %v6282_v56, -inf  ;;  %v6297_v63 = vadd.f32 %v746_v57, %v6262_v25 }
 0x2ce   : > { %792 = vmax.xlane.f32.xlu1 %v791_v58  ;;  %v6292_v61 = vadd.f32 %v749_v54, %v6262_v25  ;;  %v785_v62 = vsel %vm766_vm9, %v6287_v59, -inf }
 0x2cf   : > { %v779_v1 = vsel %vm766_vm9, %v6297_v63, -inf }
 0x2d0   : > { %v788_v0 = vsel %vm766_vm9, %v6292_v61, -inf }
 0x2d1   : > { %777 = vmax.xlane.f32.xlu0 %v776_v60 }
 0x2d2   : > { %786 = vmax.xlane.f32.xlu1 %v785_v62 }
 0x2d5   : > { %789 = vmax.xlane.f32.xlu0 %v788_v0 }
 0x2d6   : > { %780 = vmax.xlane.f32.xlu1 %v779_v1 }
 0x2d7   : > { %v5403_v2 = vpop.f32.mrb[4].mxu0 }
 0x2d8   : > { %v728_v3 = vpop.f32.mrb[5].mxu0  ;;  %v753_v4 = vmul.f32 0.35355338, %v5403_v2 }
 0x2d9   : > { %v751_v5 = vmul.f32 0.35355338, %v728_v3  ;;  %v5404_v6 = vpop.f32.mrb[6].mxu0 }
 0x2da   : > { %v731_v7 = vpop.f32.mrb[7].mxu0  ;;  %v6309_v13 = vadd.f32 %v753_v4, %v6255_v18 }
 0x2db   : > { %v6304_v8 = vadd.f32 %v751_v5, %v6257_v22  ;;  %v752_v19 = vmul.f32 0.35355338, %v731_v7 }
 0x2dc   : > { %v800_v14 = vsel %vm766_vm9, %v6309_v13, -inf }
 0x2dd   : > { %v794_v12 = vsel %vm766_vm9, %v6304_v8, -inf  ;;  %v6320_v23 = vadd.f32 %v752_v19, %v6262_v25 }
 0x2de   : > { %795 = vmax.xlane.f32.xlu0 %v794_v12 }
 0x2df   : > { %v797_v29 = vsel %vm766_vm9, %v6320_v23, -inf }
 0x2e2   : > { %801 = vmax.xlane.f32.xlu0 %v800_v14 }
 0x2e7   : > { %907 = vrot.lane.b32.xlu1 %v6182_v26, %s6085_s20 }
 0x2f2   : > { %v772_v20 = vpop.xlane.xlu1 %771 }
 0x2f3   : > { %v804_v21 = vsub.f32 %v755_v31, %v772_v20 }
 0x2f5   : > { %v817_v27 = vmul.f32 1.442695, %v804_v21 }
 0x2f7   : > { %5909 = vpow2.f32 %v817_v27 }
 0x2f8   : > { %970 = vrot.lane.b32.xlu0 %v6198_v35, %s6085_s20  ;;  %v775_v35 = vpop.xlane.xlu0 %774 }
 0x2fc   : > { %1032 = vrot.lane.b32.xlu0 %v6200_v36, %s6085_s20  ;;  %v805_v36 = vsub.f32 %v6260_v24, %v775_v35  ;;  %v769_v31 = vpop.xlane.xlu0 %768 }
 0x2fd   : > { %v803_v34 = vsub.f32 %v6267_v30, %v769_v31 }
 0x2fe   : > { %v819_v33 = vmul.f32 1.442695, %v805_v36 }
 0x2ff   : > { %v815_v37 = vmul.f32 1.442695, %v803_v34 }
 0x300   : > { %5911 = vpow2.f32 %v819_v33 }
 0x301   : > { %v6324_v32 = vpop.eup %5909  ;;  %5913 = vpow2.f32 %v815_v37 }
 0x302   : > { %v842_v26 = vsel %vm766_vm9, %v6324_v32, 0.0 }
 0x30a   : > { %v6336_v38 = vpop.eup %5911 }
 0x30b   : > { %798 = vmax.xlane.f32.xlu1 %v797_v29  ;;  %v6340_v39 = vpop.eup %5913 }
 0x31b   : > { %843 = vadd.xlane.f32.xlu0 %v842_v26 }
 0x31c   : > { %909 = vrot.lane.b32.xlu1 %v6194_v28, %s6085_s20  ;;  %v845_v28 = vsel %vm766_vm9, %v6336_v38, 0.0 }
 0x320   : > { %972 = vrot.lane.b32.xlu1 %v6208_v41, %s6085_s20  ;;  %v839_v41 = vsel %vm766_vm9, %v6340_v39, 0.0 }
 0x324   : > { %1094 = vrot.lane.b32.xlu1 %v6216_v44, %s6085_s20 }
 0x348   : > { %846 = vadd.xlane.f32.xlu1 %v845_v28 }
 0x34c   : > { %840 = vadd.xlane.f32.xlu1 %v839_v41 }
 0x35a   : > { %v784_v44 = vpop.xlane.xlu0 %783 }
 0x35b   : > { %v808_v24 = vsub.f32 %v6274_v51, %v784_v44  ;;  %v793_v40 = vpop.xlane.xlu1 %792 }
 0x35c   : > { %v811_v30 = vsub.f32 %v6277_v53, %v793_v40 }
 0x35d   : > { %v825_v42 = vmul.f32 1.442695, %v808_v24 }
 0x35e   : > { %v831_v45 = vmul.f32 1.442695, %v811_v30  ;;  %v778_v46 = vpop.xlane.xlu0 %777 }
 0x35f   : > { %5915 = vpow2.f32 %v825_v42  ;;  %v806_v47 = vsub.f32 %v6282_v56, %v778_v46  ;;  %v787_v49 = vpop.xlane.xlu1 %786 }
 0x360   : > { %5917 = vpow2.f32 %v831_v45  ;;  %v809_v50 = vsub.f32 %v6287_v59, %v787_v49 }
 0x361   : > { %v821_v52 = vmul.f32 1.442695, %v806_v47 }
 0x362   : > { %v827_v54 = vmul.f32 1.442695, %v809_v50  ;;  %v790_v55 = vpop.xlane.xlu0 %789 }
 0x363   : > { %5919 = vpow2.f32 %v821_v52  ;;  %v781_v57 = vpop.xlane.xlu1 %780  ;;  %v810_v51 = vsub.f32 %v6292_v61, %v790_v55 }
 0x364   : > { %5921 = vpow2.f32 %v827_v54  ;;  %v807_v53 = vsub.f32 %v6297_v63, %v781_v57 }
 0x365   : > { %v829_v58 = vmul.f32 1.442695, %v810_v51 }
 0x366   : > { %v823_v60 = vmul.f32 1.442695, %v807_v53 }
 0x367   : > { %5923 = vpow2.f32 %v829_v58  ;;  %v908_v62 = vpop.permute.xlu1 %907 }
 0x368   : > { %5925 = vpow2.f32 %v823_v60  ;;  %5405 = vmatprep.subr.bf16.mxu1 %v908_v62 }
 0x369   : > { %v6350_v56 = vpop.eup %5915  ;;  %5406 = vmatpush3.bf16.msra.mxu1 %v908_v62 }
 0x36a   : > { %v6352_v59 = vpop.eup %5917  ;;  %v854_v0 = vsel %vm766_vm9, %v6350_v56, 0.0 }
 0x36b   : > { %v863_v61 = vsel %vm766_vm9, %v6352_v59, 0.0  ;;  %855 = vadd.xlane.f32.xlu0 %v854_v0  ;;  %v796_v1 = vpop.xlane.xlu0 %795 }
 0x36c   : > { %864 = vadd.xlane.f32.xlu1 %v863_v61  ;;  %v812_v3 = vsub.f32 %v6304_v8, %v796_v1 }
 0x36d   : > { %v6358_v63 = vpop.eup %5919 }
 0x36e   : > { %v6360_v2 = vpop.eup %5921  ;;  %v848_v4 = vsel %vm766_vm9, %v6358_v63, 0.0  ;;  %v833_v19 = vmul.f32 1.442695, %v812_v3 }
 0x36f   : > { %v857_v5 = vsel %vm766_vm9, %v6360_v2, 0.0  ;;  %849 = vadd.xlane.f32.xlu0 %v848_v4  ;;  %v802_v6 = vpop.xlane.xlu0 %801 }
 0x370   : > { %858 = vadd.xlane.f32.xlu1 %v857_v5  ;;  %v814_v7 = vsub.f32 %v6309_v13, %v802_v6 }
 0x371   : > { %v6368_v12 = vpop.eup %5923 }
 0x372   : > { %v6370_v14 = vpop.eup %5925  ;;  %v837_v20 = vmul.f32 1.442695, %v814_v7  ;;  %v860_v8 = vsel %vm766_vm9, %v6368_v12, 0.0 }
 0x373   : > { %v851_v21 = vsel %vm766_vm9, %v6370_v14, 0.0  ;;  %861 = vadd.xlane.f32.xlu0 %v860_v8  ;;  %v971_v27 = vpop.permute.xlu0 %970 }
 0x374   : > { %5927 = vpow2.f32 %v837_v20  ;;  %852 = vadd.xlane.f32.xlu1 %v851_v21  ;;  %5413 = vmatprep.subr.bf16.mxu0 %v971_v27 }
 0x375   : > { %5414 = vmatpush3.bf16.msra.mxu0 %v971_v27  ;;  %5929 = vpow2.f32 %v833_v19 }
 0x377   : > { %v1033_v28 = vpop.permute.xlu0 %1032 }
 0x37e   : > { %v6376_v13 = vpop.eup %5927 }
 0x37f   : > { %v872_v29 = vsel %vm766_vm9, %v6376_v13, 0.0  ;;  %v6380_v26 = vpop.eup %5929 }
 0x380   : > { %873 = vadd.xlane.f32.xlu0 %v872_v29  ;;  %v866_v35 = vsel %vm766_vm9, %v6380_v26, 0.0 }
 0x384   : > { %867 = vadd.xlane.f32.xlu0 %v866_v35 }
 0x398   : > { %v799_v36 = vpop.xlane.xlu1 %798 }
 0x399   : > { %v813_v31 = vsub.f32 %v6320_v23, %v799_v36  ;;  %v350_v36 = vld [vmem:[%s7291_s3] sm:$0xf] }
 0x39a   : > { %1034 = vrot.lane.b32.xlu0 %v6210_v43, %s6085_s20 }
 0x39b   : > { %v835_v33 = vmul.f32 1.442695, %v813_v31 }
 0x39c   : > { %v910_v34 = vpop.permute.xlu1 %909 }
 0x39d   : > { %5931 = vpow2.f32 %v835_v33  ;;  %5805 = vmatprep.subr.msk.bf16.mxu1 %vm918_vm10, %v910_v34  ;;  %v920_v37 = vsel %vm918_vm10, %v910_v34, 0  ;;  %v1171_v34 = vsel %vm918_vm10, %v350_v36, 0 }
 0x39e   : > { %5408 = vmatpush3.bf16.msra.mxu1 %v920_v37 }
 0x39f   : > { %5421 = vmatprep.subr.bf16.mxu1 %v1033_v28 }
 0x3a0   : > { %v973_v41 = vpop.permute.xlu1 %972 }
 0x3a1   : > { %5806 = vmatprep.subr.msk.bf16.mxu0 %vm918_vm10, %v973_v41  ;;  %v982_v44 = vsel %vm918_vm10, %v973_v41, 0 }
 0x3a2   : > { %5416 = vmatpush3.bf16.msra.mxu0 %v982_v44 }
 0x3a4   : > { %v1095_v23 = vpop.permute.xlu1 %1094 }
 0x3a5   : > { %5429 = vmatprep.subr.bf16.mxu0 %v1095_v23 }
 0x3a7   : > { %v6391_v43 = vpop.eup %5931 }
 0x3a8   : > { %v869_v24 = vsel %vm766_vm9, %v6391_v43, 0.0  ;;  %v844_v40 = vpop.xlane.xlu0 %843 }
 0x3a9   : > { %870 = vadd.xlane.f32.xlu1 %v869_v24 }
 0x3ba   : > { %1096 = vrot.lane.b32.xlu1 %v6222_v48, %s6085_s20 }
 0x3d5   : > { %v847_v30 = vpop.xlane.xlu1 %846 }
 0x3d6   : > { %5933 = vrcp.f32 %v847_v30 }
 0x3d7   : > { %5935 = vrcp.f32 %v844_v40 }
 0x3d9   : > { %v841_v42 = vpop.xlane.xlu1 %840 }
 0x3da   : > { %5937 = vrcp.f32 %v841_v42 }
 0x3e0   : > { %v5934_v45 = vpop.eup %5933 }
 0x3e1   : > { %v5936_v46 = vpop.eup %5935  ;;  %v889_v49 = vmul.f32 %v5934_v45, %v6336_v38 }
 0x3e2   : > { %v888_v52 = vmul.f32 %v5936_v46, %v6324_v32 }
 0x3e3   : > { %v900_v55 = vpack.c.bf16 %v889_v49, %v889_v49 }
 0x3e4   : > { %v5938_v47 = vpop.eup %5937 }
 0x3e5   : > { %v887_v50 = vmul.f32 %v5938_v47, %v6340_v39 }
 0x3e7   : > { %v899_v54 = vpack.c.bf16 %v888_v52, %v887_v50 }
 0x3e9   : > { %5409 = vmatprep.mubr.msk.bf16.mxu1 %vm766_vm9, %v899_v54 }
 0x3ea   : > { %5410 = vmatmul.mubr.msk.bf16.vlgmr.msra.gmra.mrb[12].mxu1 %vm766_vm9, %v900_v55 }
 0x3eb   : > { %5422 = vmatpush3.bf16.msra.mxu1 %v1033_v28 }
 0x3f8   : > { %v856_v48 = vpop.xlane.xlu0 %855 }
 0x3f9   : > { %v865_v57 = vpop.xlane.xlu1 %864  ;;  %5939 = vrcp.f32 %v856_v48 }
 0x3fc   : > { %v850_v51 = vpop.xlane.xlu0 %849 }
 0x3fd   : > { %v859_v53 = vpop.xlane.xlu1 %858 }
 0x3fe   : > { %5941 = vrcp.f32 %v859_v53 }
 0x3ff   : > { %5943 = vrcp.f32 %v850_v51 }
 0x400   : > { %v862_v58 = vpop.xlane.xlu0 %861 }
 0x401   : > { %v853_v38 = vpop.xlane.xlu1 %852  ;;  %5945 = vrcp.f32 %v862_v58 }
 0x402   : > { %5947 = vrcp.f32 %v853_v38 }
 0x403   : > { %5949 = vrcp.f32 %v865_v57  ;;  %v5940_v32 = vpop.eup %5939 }
 0x404   : > { %v892_v3 = vmul.f32 %v5940_v32, %v6350_v56 }
 0x406   : > { %v902_v20 = vpack.c.bf16 %v892_v3, %v892_v3 }
 0x408   : > { %v5942_v39 = vpop.eup %5941 }
 0x409   : > { %v5944_v60 = vpop.eup %5943  ;;  %v893_v61 = vmul.f32 %v5942_v39, %v6360_v2 }
 0x40a   : > { %v890_v5 = vmul.f32 %v5944_v60, %v6358_v63 }
 0x40b   : > { %v5946_v62 = vpop.eup %5945 }
 0x40c   : > { %v5948_v0 = vpop.eup %5947  ;;  %v894_v1 = vmul.f32 %v5946_v62, %v6368_v12 }
 0x40d   : > { %v874_v4 = vpop.xlane.xlu0 %873  ;;  %v891_v6 = vmul.f32 %v5948_v0, %v6370_v14  ;;  %v5950_v8 = vpop.eup %5949 }
 0x40e   : > { %v903_v7 = vpack.c.bf16 %v894_v1, %v893_v61  ;;  %v895_v2 = vmul.f32 %v5950_v8, %v6352_v59  ;;  %5951 = vrcp.f32 %v874_v4 }
 0x40f   : > { %v901_v19 = vpack.c.bf16 %v891_v6, %v890_v5 }
 0x410   : > { %5425 = vmatprep.mubr.msk.bf16.mxu1 %vm766_vm9, %v903_v7  ;;  %v904_v12 = vpack.c.bf16 %v895_v2, %v895_v2 }
 0x411   : > { %5417 = vmatprep.mubr.msk.bf16.mxu0 %vm766_vm9, %v901_v19  ;;  %v868_v21 = vpop.xlane.xlu0 %867 }
 0x412   : > { %5418 = vmatmul.mubr.msk.bf16.vlgmr.msra.gmra.mrb[8].mxu0 %vm766_vm9, %v902_v20  ;;  %5953 = vrcp.f32 %v868_v21 }
 0x413   : > { %5430 = vmatpush3.bf16.msra.mxu0 %v1095_v23  ;;  %v351_v23 = vld [vmem:[%s7291_s3 + $0x4] sm:$0xf] }
 0x415   : > { %v1035_v56 = vpop.permute.xlu0 %1034 }
 0x416   : > { %5807 = vmatprep.subr.msk.bf16.mxu1 %vm918_vm10, %v1035_v56  ;;  %v1044_v63 = vsel %vm918_vm10, %v1035_v56, 0 }
 0x417   : > { %5424 = vmatpush3.bf16.msra.mxu1 %v1044_v63 }
 0x418   : > { %v5952_v59 = vpop.eup %5951  ;;  %5809 = vmatprep.subr.msk.bf16.mxu1 %vm918_vm10, %v350_v36 }
 0x419   : > { %v898_v33 = vmul.f32 %v5952_v59, %v6376_v13  ;;  %v1228_v13 = vsel %vm918_vm10, %v351_v23, 0 }
 0x41a   : > { %5426 = vmatmul.mubr.msk.bf16.vlgmr.msra.gmra.mrb[16].mxu1 %vm766_vm9, %v904_v12 }
 0x41b   : > { %5438 = vmatpush3.bf16.msra.mxu1 %v1171_v34  ;;  %v906_v44 = vpack.c.bf16 %v898_v33, %v898_v33 }
 0x41c   : > { %v5954_v35 = vpop.eup %5953 }
 0x41d   : > { %v896_v37 = vmul.f32 %v5954_v35, %v6380_v26  ;;  %v352_v26 = vld [vmem:[%s7291_s3 + $0x8] sm:$0xf] }
 0x41e   : > { %5811 = vmatprep.subr.msk.bf16.mxu1 %vm918_vm10, %v352_v26  ;;  %v1285_v47 = vsel %vm918_vm10, %v352_v26, 0  ;;  %v6459_v26 = vsub.s32 1, %v6170_v15 }
 0x436   : > { %v871_v14 = vpop.xlane.xlu1 %870 }
 0x437   : > { %5955 = vrcp.f32 %v871_v14 }
 0x43a   : > { %v1097_v27 = vpop.permute.xlu1 %1096 }
 0x43b   : > { %5808 = vmatprep.subr.msk.bf16.mxu0 %vm918_vm10, %v1097_v27  ;;  %v1106_v29 = vsel %vm918_vm10, %v1097_v27, 0 }
 0x43c   : > { %5432 = vmatpush3.bf16.msra.mxu0 %v1106_v29 }
 0x43d   : > { %5810 = vmatprep.subr.msk.bf16.mxu0 %vm918_vm10, %v351_v23 }
 0x441   : > { %v5956_v31 = vpop.eup %5955 }
 0x442   : > { %v897_v28 = vmul.f32 %v5956_v31, %v6391_v43  ;;  %v353_v43 = vld [vmem:[%s7291_s3 + $0xc] sm:$0xf] }
 0x443   : > { %v1342_v57 = vsel %vm918_vm10, %v353_v43, 0 }
 0x444   : > { %v905_v41 = vpack.c.bf16 %v897_v28, %v896_v37 }
 0x446   : > { %5433 = vmatprep.mubr.msk.bf16.mxu0 %vm766_vm9, %v905_v41 }
 0x447   : > { %5434 = vmatmul.mubr.msk.bf16.vlgmr.msra.gmra.mrb[12].mxu0 %vm766_vm9, %v906_v44 }
 0x448   : > { %5444 = vmatpush3.bf16.msra.mxu0 %v1228_v13 }
 0x449   : > { %5812 = vmatprep.subr.msk.bf16.mxu0 %vm918_vm10, %v353_v43 }
 0x4bd   : > { %v5411_v24 = vpop.f32.mrb[12].mxu1 }
 0x4be   : > { %v956_v40 = vpop.f32.mrb[13].mxu1  ;;  %v1157_v46 = vpack.c.bf16 %v5411_v24, %v5411_v24 }
 0x4bf   : > { %v5412_v30 = vpop.f32.mrb[14].mxu1 }
 0x4c0   : > { %v959_v42 = vpop.f32.mrb[15].mxu1 }
 0x4c1   : > { %v1156_v45 = vpack.c.bf16 %v959_v42, %v956_v40  ;;  %v1416_v40 = vrot.slane %v6178_v17, %v6459_v26 }
 0x4c3   : > { %5439 = vmatprep.mubr.msk.bf16.mxu1 %vm483_vm1, %v1156_v45 }
 0x4c4   : > { %5440 = vmatmul.mubr.msk.bf16.vlgmr.msra.gmra.mrb[20].mxu1 %vm483_vm1, %v1157_v46 }
 0x4c5   : > { %5450 = vmatpush3.bf16.msra.mxu1 %v1285_v47 }
 0x4e5   : > { %v5419_v49 = vpop.f32.mrb[8].mxu0 }
 0x4e6   : > { %v1018_v50 = vpop.f32.mrb[9].mxu0  ;;  %v1159_v48 = vpack.c.bf16 %v5419_v49, %v5419_v49 }
 0x4e7   : > { %v5420_v52 = vpop.f32.mrb[10].mxu0 }
 0x4e8   : > { %v1021_v54 = vpop.f32.mrb[11].mxu0 }
 0x4e9   : > { %v1158_v55 = vpack.c.bf16 %v1021_v54, %v1018_v50 }
 0x4eb   : > { %5445 = vmatprep.mubr.msk.bf16.mxu0 %vm483_vm1, %v1158_v55 }
 0x4ec   : > { %5446 = vmatmul.mubr.msk.bf16.vlgmr.msra.gmra.mrb[16].mxu0 %vm483_vm1, %v1159_v48 }
 0x4ed   : > { %v5427_v51 = vpop.f32.mrb[16].mxu1  ;;  %5456 = vmatpush3.bf16.msra.mxu0 %v1342_v57 }
 0x4ee   : > { %v1080_v53 = vpop.f32.mrb[17].mxu1  ;;  %v1161_v39 = vpack.c.bf16 %v5427_v51, %v5427_v51 }
 0x4ef   : > { %v5428_v58 = vpop.f32.mrb[18].mxu1 }
 0x4f0   : > { %v1083_v38 = vpop.f32.mrb[19].mxu1 }
 0x4f1   : > { %v1160_v32 = vpack.c.bf16 %v1083_v38, %v1080_v53 }
 0x4f3   : > { %5451 = vmatprep.mubr.msk.bf16.mxu1 %vm483_vm1, %v1160_v32 }
 0x4f4   : > { %5452 = vmatmul.mubr.msk.bf16.vlgmr.msra.gmra.mrb[24].mxu1 %vm483_vm1, %v1161_v39 }
 0x51a   : > { %v5435_v60 = vpop.f32.mrb[12].mxu0 }
 0x51b   : > { %v1142_v62 = vpop.f32.mrb[13].mxu0  ;;  %v1163_v3 = vpack.c.bf16 %v5435_v60, %v5435_v60 }
 0x51c   : > { %v5436_v0 = vpop.f32.mrb[14].mxu0 }
 0x51d   : > { %v1145_v61 = vpop.f32.mrb[15].mxu0 }
 0x51e   : > { %v1162_v1 = vpack.c.bf16 %v1145_v61, %v1142_v62 }
 0x520   : > { %5457 = vmatprep.mubr.msk.bf16.mxu0 %vm483_vm1, %v1162_v1 }
 0x521   : > { %5458 = vmatmul.mubr.msk.bf16.vlgmr.msra.gmra.mrb[20].mxu0 %vm483_vm1, %v1163_v3 }
 0x597   : > { %v5441_v4 = vpop.f32.mrb[20].mxu1 }
 0x598   : > { %v1207_v5 = vpop.f32.mrb[21].mxu1  ;;  %v1406_v20 = vsel %vm307_vm0, %v5441_v4, 0.0 }
 0x599   : > { %v5442_v6 = vpop.f32.mrb[22].mxu1  ;;  %v1392_v2 = vsel %vm307_vm0, %v1207_v5, 0.0 }
 0x59a   : > { %v1210_v7 = vpop.f32.mrb[23].mxu1 }
 0x59b   : > { %v1399_v29 = vsel %vm307_vm0, %v1210_v7, 0.0 }
 0x5bf   : > { %v5447_v19 = vpop.f32.mrb[16].mxu0 }
 0x5c0   : > { %v1407_v8 = vsel %vm307_vm0, %v5447_v19, 0.0  ;;  %v1264_v21 = vpop.f32.mrb[17].mxu0 }
 0x5c1   : > { %v1408_v56 = vadd.f32 %v1407_v8, %v1406_v20  ;;  %v1393_v63 = vsel %vm307_vm0, %v1264_v21, 0.0  ;;  %v5448_v12 = vpop.f32.mrb[18].mxu0  ;;  %v5879_v20 = vld [vmem:[%s7292_s4] sm:$0xff]   ;;  %v5880_v8 = vld [vmem:[%s7292_s4 + $0x8] sm:$0xff]  }
 0x5c2   : > { %v1394_v14 = vadd.f32 %v1393_v63, %v1392_v2  ;;  %v1267_v27 = vpop.f32.mrb[19].mxu0  ;;  %5461 = vmatprep.subr.bf16.mxu1 %v5879_v20  ;;  %v5881_v21 = vld [vmem:[%s7293_s5] sm:$0xff]   ;;  %v5882_v2 = vld [vmem:[%s7293_s5 + $0x8] sm:$0xff]  }
 0x5c3   : > { %v1400_v59 = vsel %vm307_vm0, %v1267_v27, 0.0  ;;  %5462 = vmatpush3.bf16.msra.mxu1 %v5879_v20  ;;  %5469 = vmatprep.subr.bf16.mxu0 %v5881_v21 }
 0x5c4   : > { %v1401_v35 = vadd.f32 %v1400_v59, %v1399_v29  ;;  %5463 = vmatprep.subr.bf16.mxu1 %v5880_v8  ;;  %5470 = vmatpush3.bf16.msra.mxu0 %v5881_v21 }
 0x5c5   : > { %5471 = vmatprep.subr.bf16.mxu0 %v5882_v2 }
 0x5c7   : > { %v5453_v36 = vpop.f32.mrb[24].mxu1  ;;  %5464 = vmatpush3.bf16.msra.mxu1 %v5880_v8 }
 0x5c8   : > { %v1409_v31 = vsel %vm307_vm0, %v5453_v36, 0.0  ;;  %v1321_v33 = vpop.f32.mrb[25].mxu1  ;;  %5472 = vmatpush3.bf16.msra.mxu0 %v5882_v2 }
 0x5c9   : > { %v1410_v34 = vadd.f32 %v1409_v31, %v1408_v56  ;;  %v1395_v37 = vsel %vm307_vm0, %v1321_v33, 0.0  ;;  %v5454_v28 = vpop.f32.mrb[26].mxu1  ;;  %v6488_v31 = vsub.s32 4, %v6170_v15 }
 0x5ca   : > { %v1396_v41 = vadd.f32 %v1395_v37, %v1394_v14  ;;  %v1324_v44 = vpop.f32.mrb[27].mxu1 }
 0x5cb   : > { %v1402_v23 = vsel %vm307_vm0, %v1324_v44, 0.0  ;;  %v1466_v33 = vrot.slane %v6178_v17, %v6488_v31 }
 0x5cc   : > { %v1403_v13 = vadd.f32 %v1402_v23, %v1401_v35 }
 0x5f4   : > { %v5459_v43 = vpop.f32.mrb[20].mxu0 }
 0x5f5   : > { %v1411_v24 = vsel %vm307_vm0, %v5459_v43, 0.0  ;;  %v1378_v30 = vpop.f32.mrb[21].mxu0 }
 0x5f6   : > { %v1412_v42 = vadd.f32 %v1411_v24, %v1410_v34  ;;  %v1397_v45 = vsel %vm307_vm0, %v1378_v30, 0.0  ;;  %v5460_v46 = vpop.f32.mrb[22].mxu0  ;;  %v6493_v34 = vsub.s32 5, %v6170_v15 }
 0x5f7   : > { %v1398_v47 = vadd.f32 %v1397_v45, %v1396_v41  ;;  %v1381_v49 = vpop.f32.mrb[23].mxu0 }
 0x5f8   : > { %v1404_v50 = vsel %vm307_vm0, %v1381_v49, 0.0  ;;  %v1419_v52 = vadd.f32 %v1416_v40, %v1412_v42 }
 0x5f9   : > { %v1417_v54 = vadd.f32 %v1416_v40, %v1398_v47  ;;  %v1405_v55 = vadd.f32 %v1404_v50, %v1403_v13  ;;  %v6498_v13 = vld [vmem:[%s7294_s6] sm:$0xff]  ;;  %v5883_v50 = vld [vmem:[%s7293_s5 + $0x10] sm:$0xff]  }
 0x5fa   : > { %v1422_v58 = vadd.f32 %v1419_v52, %v6161_v11  ;;  %v1473_v43 = vrot.slane %v6498_v13, %v6493_v34  ;;  %5473 = vmatprep.subr.bf16.mxu0 %v5883_v50  ;;  %v5884_v52 = vld [vmem:[%s7293_s5 + $0x18] sm:$0xff]  }
 0x5fb   : > { %v1418_v48 = vadd.f32 %v1416_v40, %v1405_v55  ;;  %v1420_v57 = vadd.f32 %v1417_v54, %v6157_v9  ;;  %5474 = vmatpush3.bf16.msra.mxu0 %v5883_v50  ;;  %v6511_v54 = vsub.s32 2, %v6170_v15 }
 0x5fc   : > { %v1429_v32 = vsel %vm307_vm0, %v1422_v58, 0.0  ;;  %5475 = vmatprep.subr.bf16.mxu0 %v5884_v52 }
 0x5fd   : > { %v1423_v51 = vsel %vm307_vm0, %v1420_v57, 0.0  ;;  %v1421_v53 = vadd.f32 %v1418_v48, %v6159_v10  ;;  %v1482_v55 = vrot.slane %v6498_v13, %v6511_v54 }
 0x5fe   : > { %1424 = vadd.xlane.f32.xlu0 %v1423_v51 }
 0x5ff   : > { %v1426_v38 = vsel %vm307_vm0, %v1421_v53, 0.0  ;;  %5476 = vmatpush3.bf16.msra.mxu0 %v5884_v52 }
 0x600   : > { %1427 = vadd.xlane.f32.xlu1 %v1426_v38 }
 0x602   : > { %1430 = vadd.xlane.f32.xlu0 %v1429_v32 }
 0x68b   : > { %v1425_v39 = vpop.xlane.xlu0 %1424 }
 0x68c   : > { %v1433_v60 = vmul.f32 0.03125, %v1425_v39 }
 0x68d   : > { %v1428_v62 = vpop.xlane.xlu1 %1427 }
 0x68e   : > { %v1436_v0 = vsub.f32 %v1420_v57, %v1433_v60  ;;  %v1434_v61 = vmul.f32 0.03125, %v1428_v62 }
 0x68f   : > { %v1431_v1 = vpop.xlane.xlu0 %1430 }
 0x690   : > { %v1437_v9 = vsub.f32 %v1421_v53, %v1434_v61  ;;  %v1435_v3 = vmul.f32 0.03125, %v1431_v1  ;;  %v1439_v4 = vmul.f32 %v1436_v0, %v1436_v0  ;;  %v6518_v1 = vsub.s32 3, %v6170_v15 }
 0x692   : > { %v1438_v5 = vsub.f32 %v1422_v58, %v1435_v3  ;;  %v1442_v10 = vsel %vm307_vm0, %v1439_v4, 0.0  ;;  %v1440_v11 = vmul.f32 %v1437_v9, %v1437_v9 }
 0x693   : > { %1443 = vadd.xlane.f32.xlu0 %v1442_v10 }
 0x694   : > { %v1445_v6 = vsel %vm307_vm0, %v1440_v11, 0.0  ;;  %v1441_v7 = vmul.f32 %v1438_v5, %v1438_v5 }
 0x695   : > { %1446 = vadd.xlane.f32.xlu1 %v1445_v6 }
 0x696   : > { %v1448_v19 = vsel %vm307_vm0, %v1441_v7, 0.0 }
 0x697   : > { %1449 = vadd.xlane.f32.xlu0 %v1448_v19 }
 0x720   : > { %v1444_v56 = vpop.xlane.xlu0 %1443 }
 0x721   : > { %v1451_v63 = vmul.f32 0.03125, %v1444_v56 }
 0x722   : > { %v1447_v12 = vpop.xlane.xlu1 %1446 }
 0x723   : > { %v1454_v14 = vadd.f32 1e-05, %v1451_v63  ;;  %v1452_v27 = vmul.f32 0.03125, %v1447_v12 }
 0x724   : > { %v1450_v29 = vpop.xlane.xlu0 %1449 }
 0x725   : > { %5957 = vrsqrt.f32 %v1454_v14  ;;  %v1455_v59 = vadd.f32 1e-05, %v1452_v27  ;;  %v1453_v35 = vmul.f32 0.03125, %v1450_v29 }
 0x727   : > { %5959 = vrsqrt.f32 %v1455_v59  ;;  %v1456_v36 = vadd.f32 1e-05, %v1453_v35 }
 0x729   : > { %5961 = vrsqrt.f32 %v1456_v36 }
 0x72f   : > { %v5958_v37 = vpop.eup %5957 }
 0x730   : > { %v1460_v28 = vmul.f32 %v5958_v37, %v1436_v0 }
 0x731   : > { %v5960_v41 = vpop.eup %5959 }
 0x732   : > { %v1461_v44 = vmul.f32 %v5960_v41, %v1437_v9  ;;  %v1467_v23 = vmul.f32 %v1466_v33, %v1460_v28  ;;  %v1557_v9 = vrot.slane %v6498_v13, %v6518_v1 }
 0x733   : > { %v5962_v24 = vpop.eup %5961 }
 0x734   : > { %v1462_v40 = vmul.f32 %v5962_v24, %v1438_v5  ;;  %v1468_v30 = vmul.f32 %v1466_v33, %v1461_v44  ;;  %v1474_v42 = vadd.f32 %v1473_v43, %v1467_v23  ;;  %v5885_v24 = vld [vmem:[%s7290_s2 + $0x20] sm:$0xff]  }
 0x736   : > { %v1469_v17 = vmul.f32 %v1466_v33, %v1462_v40  ;;  %v1475_v45 = vadd.f32 %v1473_v43, %v1468_v30  ;;  %v6086_v40 = vmov 0.0   ;;  %v5886_v30 = vld [vmem:[%s7290_s2 + $0x28] sm:$0xff]  }
 0x737   : > { %5481 = vmatprep.subr.bf16.mxu1 %v6086_v40  ;;  %5495 = vmatprep.subr.bf16.mxu0 %v6086_v40 }
 0x738   : > { %v1477_v46 = vpack.c.bf16 %v1475_v45, %v1474_v42  ;;  %v1476_v47 = vadd.f32 %v1473_v43, %v1469_v17 }
 0x73a   : > { %5465 = vmatprep.mubr.msk.bf16.mxu1 %vm307_vm0, %v1477_v46  ;;  %v1478_v49 = vpack.c.bf16 %v1476_v47, %v1476_v47 }
 0x73c   : > { %5466 = vmatmul.mubr.msk.bf16.vlgmr.msra.gmra.mrb[28].mxu1 %vm307_vm0, %v1478_v49 }
 0x73d   : > { %5485 = vmatprep.mubr.msk.bf16.mxu1 %vm6087_vm12, %v6086_v40  ;;  %5482 = vmatpush3.bf16.msra.mxu1 %v5885_v24 }
 0x73e   : > { %5483 = vmatprep.subr.bf16.mxu1 %v6086_v40 }
 0x741   : > { %5484 = vmatpush3.bf16.msra.mxu1 %v5886_v30 }
 0x742   : > { %5489 = vmatprep.subr.bf16.mxu1 %v6086_v40 }
 0x80f   : > { %v5467_v48 = vpop.f32.mrb[28].mxu1 }
 0x810   : > { %v1544_v57 = vadd.f32 %v5467_v48, %v1482_v55  ;;  %v1535_v51 = vpop.f32.mrb[29].mxu1  ;;  %v6543_v48 = vsub.s32 6, %v6170_v15 }
 0x811   : > { %v1536_v53 = vadd.f32 %v1535_v51, %v1482_v55  ;;  %v5468_v58 = vpop.f32.mrb[30].mxu1 }
 0x812   : > { %v1538_v38 = vpop.f32.mrb[31].mxu1  ;;  %v1551_v39 = vmax.f32 %v1544_v57, 0.0  ;;  %v6546_v57 = vsub.s32 7, %v6170_v15  ;;  %v1682_v51 = vrot.slane %v6498_v13, %v6543_v48 }
 0x813   : > { %v1539_v32 = vadd.f32 %v1538_v38, %v1482_v55  ;;  %v1549_v60 = vmax.f32 %v1536_v53, 0.0 }
 0x814   : > { %v1553_v61 = vpack.c.bf16 %v1551_v39, %v1551_v39  ;;  %v1689_v58 = vrot.slane %v6498_v13, %v6546_v57 }
 0x815   : > { %v1550_v62 = vmax.f32 %v1539_v32, 0.0 }
 0x817   : > { %v1552_v0 = vpack.c.bf16 %v1550_v62, %v1549_v60 }
 0x819   : > { %5477 = vmatprep.mubr.msk.bf16.mxu0 %vm1582_vm11, %v1552_v0 }
 0x81a   : > { %5478 = vmatmul.mubr.msk.bf16.vlgmr.msra.gmra.mrb[24].mxu0 %vm1582_vm11, %v1553_v61 }
 0x81b   : > { %5497 = vmatprep.mubr.msk.bf16.mxu0 %vm6087_vm12, %v6086_v40 }
 0x8ed   : > { %v5479_v3 = vpop.f32.mrb[24].mxu0 }
 0x8ee   : > { %v1623_v4 = vpop.f32.mrb[25].mxu0  ;;  %v1632_v5 = vadd.f32 %v5479_v3, %v1557_v9 }
 0x8ef   : > { %v1624_v10 = vadd.f32 %v1623_v4, %v1557_v9  ;;  %v5480_v11 = vpop.f32.mrb[26].mxu0 }
 0x8f0   : > { %v1626_v6 = vpop.f32.mrb[27].mxu0  ;;  %v1639_v21 = vadd.f32 %v1632_v5, %v1476_v47 }
 0x8f1   : > { %v1627_v7 = vadd.f32 %v1626_v6, %v1557_v9  ;;  %v1637_v19 = vadd.f32 %v1624_v10, %v1474_v42  ;;  %v6568_v10 = vld [vmem:[%s7294_s6 + $0x10] sm:$0xff] }
 0x8f2   : > { %v1646_v56 = vsel %vm307_vm0, %v1639_v21, 0.0  ;;  %v1733_v11 = vrot.slane %v6568_v10, %v6173_v16 }
 0x8f3   : > { %v1640_v20 = vsel %vm307_vm0, %v1637_v19, 0.0  ;;  %v1638_v8 = vadd.f32 %v1627_v7, %v1475_v45 }
 0x8f4   : > { %1641 = vadd.xlane.f32.xlu1 %v1640_v20 }
 0x8f5   : > { %v1643_v2 = vsel %vm307_vm0, %v1638_v8, 0.0 }
 0x8f6   : > { %1644 = vadd.xlane.f32.xlu0 %v1643_v2 }
 0x8f8   : > { %1647 = vadd.xlane.f32.xlu1 %v1646_v56 }
 0x981   : > { %v1642_v63 = vpop.xlane.xlu1 %1641 }
 0x982   : > { %v1649_v12 = vmul.f32 0.03125, %v1642_v63 }
 0x983   : > { %v1645_v14 = vpop.xlane.xlu0 %1644 }
 0x984   : > { %v1652_v27 = vsub.f32 %v1637_v19, %v1649_v12  ;;  %v1650_v29 = vmul.f32 0.03125, %v1645_v14 }
 0x985   : > { %v1648_v59 = vpop.xlane.xlu1 %1647 }
 0x986   : > { %v1653_v35 = vsub.f32 %v1638_v8, %v1650_v29  ;;  %v1651_v36 = vmul.f32 0.03125, %v1648_v59  ;;  %v1655_v33 = vmul.f32 %v1652_v27, %v1652_v27 }
 0x988   : > { %v1654_v37 = vsub.f32 %v1639_v21, %v1651_v36  ;;  %v1658_v28 = vsel %vm307_vm0, %v1655_v33, 0.0  ;;  %v1656_v41 = vmul.f32 %v1653_v35, %v1653_v35 }
 0x989   : > { %1659 = vadd.xlane.f32.xlu0 %v1658_v28 }
 0x98a   : > { %v1661_v44 = vsel %vm307_vm0, %v1656_v41, 0.0  ;;  %v1657_v23 = vmul.f32 %v1654_v37, %v1654_v37 }
 0x98b   : > { %1662 = vadd.xlane.f32.xlu1 %v1661_v44 }
 0x98c   : > { %v1664_v43 = vsel %vm307_vm0, %v1657_v23, 0.0 }
 0x98d   : > { %1665 = vadd.xlane.f32.xlu0 %v1664_v43 }
 0xa16   : > { %v1660_v17 = vpop.xlane.xlu0 %1659 }
 0xa17   : > { %v1667_v42 = vmul.f32 0.03125, %v1660_v17 }
 0xa18   : > { %v1663_v45 = vpop.xlane.xlu1 %1662 }
 0xa19   : > { %v1670_v46 = vadd.f32 1e-05, %v1667_v42  ;;  %v1668_v47 = vmul.f32 0.03125, %v1663_v45 }
 0xa1a   : > { %v1666_v49 = vpop.xlane.xlu0 %1665 }
 0xa1b   : > { %5963 = vrsqrt.f32 %v1670_v46  ;;  %v1671_v50 = vadd.f32 1e-05, %v1668_v47  ;;  %v1669_v52 = vmul.f32 0.03125, %v1666_v49 }
 0xa1d   : > { %5965 = vrsqrt.f32 %v1671_v50  ;;  %v1672_v55 = vadd.f32 1e-05, %v1669_v52 }
 0xa1f   : > { %5967 = vrsqrt.f32 %v1672_v55 }
 0xa25   : > { %v5964_v53 = vpop.eup %5963 }
 0xa26   : > { %v1676_v38 = vmul.f32 %v5964_v53, %v1652_v27 }
 0xa27   : > { %v5966_v32 = vpop.eup %5965 }
 0xa28   : > { %v1683_v39 = vmul.f32 %v1682_v51, %v1676_v38  ;;  %v1677_v60 = vmul.f32 %v5966_v32, %v1653_v35 }
 0xa29   : > { %v5968_v62 = vpop.eup %5967 }
 0xa2a   : > { %v1690_v0 = vadd.f32 %v1689_v58, %v1683_v39  ;;  %v1684_v61 = vmul.f32 %v1682_v51, %v1677_v60  ;;  %v1678_v9 = vmul.f32 %v5968_v62, %v1654_v37 }
 0xa2c   : > { %1697 = vst.msk [vmem:[#allocation3] sm:$0x3] %vm1696_vm13, %v1690_v0  ;;  %v1691_v15 = vadd.f32 %v1689_v58, %v1684_v61  ;;  %v1685_v3 = vmul.f32 %v1682_v51, %v1678_v9 }
 0xa2d   : > { %1693 = vst.msk [vmem:[#allocation2] sm:$0xff] %vm307_vm0, %v1690_v0 }
 0xa2e   : > { %1699 = vst.msk [vmem:[#allocation3 + $0x1] sm:$0x6] %vm1698_vm14, %v1691_v15  ;;  %v1692_v13 = vadd.f32 %v1689_v58, %v1685_v3 }
 0xa2f   : > { %1694 = vst.msk [vmem:[#allocation2 + $0x8] sm:$0xff] %vm307_vm0, %v1691_v15 }
 0xa30   : > { %1701 = vst.msk [vmem:[#allocation3 + $0x2] sm:$0xc] %vm1700_vm15, %v1692_v13 }
 0xa31   : > { %1695 = vst.msk [vmem:[#allocation2 + $0x10] sm:$0xff] %vm307_vm0, %v1692_v13 }
 0xa37   : > { %v6558_v4 = vld [vmem:[#allocation3] sm:$0x3f] }
 0xa38   : > { %v1729_v5 = vpack.c.bf16 %v6558_v4, %v6558_v4 }
 0xa3a   : > { %5486 = vmatmul.mubr.msk.bf16.vlgmr.msra.gmra.mrb[32].mxu1 %vm307_vm0, %v1729_v5 }
 0xa3b   : > { %5491 = vmatprep.mubr.msk.bf16.mxu1 %vm6087_vm12, %v6086_v40 }
 0xb0d   : > { %v1783_v6 = vpop.f32.mrb[32].mxu1 }
 0xb0e   : > { %v1784_v7 = vadd.f32 %v1783_v6, %v1733_v11  ;;  %v5487_v19 = vpop.f32.mrb[33].mxu1 }
 0xb0f   : > { %v1786_v20 = vpop.f32.mrb[34].mxu1 }
 0xb10   : > { %1793 = vrot.lane.b32.xlu0 %v1784_v7, %s6079_s16  ;;  %1790 = vrot.lane.b32.xlu1 %v1784_v7, %s6080_s17  ;;  %v5488_v8 = vpop.f32.mrb[35].mxu1  ;;  %v6575_v21 = vpack.c.bf16 %v1784_v7, %v1784_v7 }
 0xb14   : > { %1796 = vrot.lane.b32.xlu1 %v1784_v7, %s6081_s18 }
 0xb18   : > { %1804 = vrot.lane.b32.xlu1 %v6575_v21, %s6082_s19 }
 0xb82   : > { %v1794_v2 = vpop.permute.xlu0 %1793  ;;  %v1791_v56 = vpop.permute.xlu1 %1790 }
 0xb83   : > { %v6579_v63 = vpack.c.bf16 %v1794_v2, %v1794_v2  ;;  %v1800_v12 = vpack.c.bf16 %v1791_v56, %v1791_v56 }
 0xb85   : > { %1853 = vrot.lane.b32.xlu0 %v1800_v12, %s6082_s19  ;;  %1902 = vrot.lane.b32.xlu1 %v6579_v63, %s6082_s19 }
 0xb86   : > { %v1797_v14 = vpop.permute.xlu1 %1796 }
 0xb87   : > { %v6584_v27 = vpack.c.bf16 %v1797_v14, %v1797_v14 }
 0xb89   : > { %1951 = vrot.lane.b32.xlu0 %v6584_v27, %s6082_s19 }
 0xb8a   : > { %v1805_v29 = vpop.permute.xlu1 %1804 }
 0xb8b   : > { %v1810_v59 = vsel %vm483_vm1, %v1805_v29, 0 }
 0xb8c   : > { %5490 = vmatpush3.bf16.xpose.msra.mxu1 %v1810_v59 }
 0xb8d   : > { %5501 = vmatprep.subr.bf16.mxu1 %v6086_v40 }
 0xb93   : > { %5492 = vmatmul.mubr.msk.bf16.vlgmr.msra.gmra.mrb[36].mxu1 %vm483_vm1, %v6575_v21 }
 0xb94   : > { %5503 = vmatprep.mubr.msk.bf16.mxu1 %vm6087_vm12, %v6086_v40 }
 0xbf7   : > { %v1854_v35 = vpop.permute.xlu0 %1853  ;;  %v1903_v36 = vpop.permute.xlu1 %1902 }
 0xbf8   : > { %v1859_v33 = vsel %vm483_vm1, %v1854_v35, 0  ;;  %v1908_v37 = vsel %vm483_vm1, %v1903_v36, 0 }
 0xbf9   : > { %5496 = vmatpush3.bf16.xpose.msra.mxu0 %v1859_v33  ;;  %5502 = vmatpush3.bf16.xpose.msra.mxu1 %v1908_v37 }
 0xbfa   : > { %5507 = vmatprep.subr.bf16.mxu0 %v6086_v40  ;;  %5513 = vmatprep.subr.bf16.mxu1 %v6086_v40 }
 0xbfb   : > { %v1952_v28 = vpop.permute.xlu0 %1951 }
 0xbfc   : > { %v1957_v41 = vsel %vm483_vm1, %v1952_v28, 0 }
 0xc00   : > { %5498 = vmatmul.mubr.msk.bf16.vlgmr.msra.gmra.mrb[28].mxu0 %vm483_vm1, %v1800_v12  ;;  %5504 = vmatmul.mubr.msk.bf16.vlgmr.msra.gmra.mrb[40].mxu1 %vm483_vm1, %v6579_v63 }
 0xc01   : > { %5508 = vmatpush3.bf16.xpose.msra.mxu0 %v1957_v41  ;;  %5509 = vmatprep.mubr.msk.bf16.mxu0 %vm6087_vm12, %v6086_v40 }
 0xc02   : > { %5519 = vmatprep.subr.bf16.mxu0 %v6086_v40  ;;  %5515 = vmatprep.mubr.msk.bf16.mxu1 %vm6087_vm12, %v6086_v40 }
 0xc08   : > { %5510 = vmatmul.mubr.msk.bf16.vlgmr.msra.gmra.mrb[32].mxu0 %vm483_vm1, %v6584_v27 }
 0xc09   : > { %5521 = vmatprep.mubr.msk.bf16.mxu0 %vm6087_vm12, %v6086_v40 }
 0xc66   : > { %v1846_v44 = vpop.f32.mrb[36].mxu1 }
 0xc67   : > { %v1999_v23 = vmul.f32 0.35355338, %v1846_v44  ;;  %v5493_v43 = vpop.f32.mrb[37].mxu1 }
 0xc68   : > { %v1849_v24 = vpop.f32.mrb[38].mxu1 }
 0xc69   : > { %v5494_v30 = vpop.f32.mrb[39].mxu1  ;;  %v2004_v17 = vsel %vm2003_vm2, %v1999_v23, -inf }
 0xc6a   : > { %2005 = vmax.xlane.f32.xlu1 %v2004_v17 }
 0xcd3   : > { %v1895_v42 = vpop.f32.mrb[28].mxu0  ;;  %v1944_v45 = vpop.f32.mrb[40].mxu1 }
 0xcd4   : > { %v2000_v46 = vmul.f32 0.35355338, %v1895_v42  ;;  %v5499_v47 = vpop.f32.mrb[29].mxu0  ;;  %v5505_v49 = vpop.f32.mrb[41].mxu1  ;;  %v2001_v55 = vmul.f32 0.35355338, %v1944_v45 }
 0xcd5   : > { %v1898_v50 = vpop.f32.mrb[30].mxu0  ;;  %v1947_v52 = vpop.f32.mrb[42].mxu1 }
 0xcd6   : > { %v5500_v51 = vpop.f32.mrb[31].mxu0  ;;  %v5506_v53 = vpop.f32.mrb[43].mxu1  ;;  %v2007_v58 = vsel %vm2003_vm2, %v2000_v46, -inf  ;;  %v2010_v38 = vsel %vm2003_vm2, %v2001_v55, -inf  ;;  %v5034_v52 = vld [vmem:[%s7291_s3 + $0x20] sm:$0xf] }
 0xcd7   : > { %2008 = vmax.xlane.f32.xlu0 %v2007_v58  ;;  %v2254_v58 = vsel %vm918_vm10, %v5034_v52, 0 }
 0xcdb   : > { %v1993_v32 = vpop.f32.mrb[32].mxu0  ;;  %2011 = vmax.xlane.f32.xlu0 %v2010_v38 }
 0xcdc   : > { %v2002_v39 = vmul.f32 0.35355338, %v1993_v32  ;;  %v5511_v60 = vpop.f32.mrb[33].mxu0 }
 0xcdd   : > { %v1996_v62 = vpop.f32.mrb[34].mxu0  ;;  %v5035_v60 = vld [vmem:[%s7291_s3 + $0x24] sm:$0xf] }
 0xcde   : > { %v5512_v0 = vpop.f32.mrb[35].mxu0  ;;  %v2013_v61 = vsel %vm2003_vm2, %v2002_v39, -inf  ;;  %v2300_v62 = vsel %vm918_vm10, %v5035_v60, 0 }
 0xcdf   : > { %2014 = vmax.xlane.f32.xlu1 %v2013_v61  ;;  %v5036_v0 = vld [vmem:[%s7291_s3 + $0x28] sm:$0xf] }
 0xcf0   : > { %2102 = vrot.lane.b32.xlu1 %v1800_v12, %s6085_s20 }
 0xcf1   : > { %2052 = vrot.lane.b32.xlu0 %v6575_v21, %s6085_s20 }
 0xcf7   : > { %v2006_v9 = vpop.xlane.xlu1 %2005 }
 0xcf8   : > { %v2016_v15 = vsub.f32 %v1999_v23, %v2006_v9 }
 0xcfa   : > { %v2020_v3 = vmul.f32 1.442695, %v2016_v15 }
 0xcfc   : > { %5969 = vpow2.f32 %v2020_v3  ;;  %v2346_v3 = vsel %vm918_vm10, %v5036_v0, 0 }
 0xd06   : > { %v5970_v13 = vpop.eup %5969 }
 0xd07   : > { %v2028_v5 = vsel %vm2003_vm2, %v5970_v13, 0.0 }
 0xd10   : > { %2029 = vadd.xlane.f32.xlu0 %v2028_v5 }
 0xd64   : > { %v2009_v11 = vpop.xlane.xlu0 %2008 }
 0xd65   : > { %v2017_v6 = vsub.f32 %v2000_v46, %v2009_v11  ;;  %v5037_v11 = vld [vmem:[%s7291_s3 + $0x2c] sm:$0xf] }
 0xd67   : > { %v2022_v7 = vmul.f32 1.442695, %v2017_v6 }
 0xd68   : > { %v2012_v19 = vpop.xlane.xlu0 %2011 }
 0xd69   : > { %5971 = vpow2.f32 %v2022_v7  ;;  %v2018_v20 = vsub.f32 %v2001_v55, %v2012_v19 }
 0xd6b   : > { %v2024_v8 = vmul.f32 1.442695, %v2018_v20  ;;  %v2392_v20 = vsel %vm918_vm10, %v5037_v11, 0  ;;  %v5888_v11 = vld [vmem:[%s7292_s4 + $0x28] sm:$0xff]  }
 0xd6c   : > { %v2015_v2 = vpop.xlane.xlu1 %2014  ;;  %v2053_v56 = vpop.permute.xlu0 %2052 }
 0xd6d   : > { %5973 = vpow2.f32 %v2024_v8  ;;  %v2019_v21 = vsub.f32 %v2002_v39, %v2015_v2  ;;  %v2060_v12 = vsel %vm2058_vm3, %v2053_v56, 0 }
 0xd6e   : > { %5514 = vmatpush3.bf16.msra.mxu1 %v2060_v12 }
 0xd6f   : > { %v2026_v14 = vmul.f32 1.442695, %v2019_v21  ;;  %5525 = vmatprep.subr.bf16.mxu1 %v6086_v40 }
 0xd70   : > { %v2103_v29 = vpop.permute.xlu1 %2102 }
 0xd71   : > { %5975 = vpow2.f32 %v2026_v14  ;;  %v2108_v59 = vsel %vm2058_vm3, %v2103_v29, 0 }
 0xd72   : > { %5520 = vmatpush3.bf16.msra.mxu0 %v2108_v59 }
 0xd73   : > { %v5972_v35 = vpop.eup %5971  ;;  %5531 = vmatprep.subr.bf16.mxu0 %v6086_v40 }
 0xd74   : > { %v2031_v36 = vsel %vm2003_vm2, %v5972_v35, 0.0 }
 0xd75   : > { %2032 = vadd.xlane.f32.xlu1 %v2031_v36 }
 0xd77   : > { %v5974_v33 = vpop.eup %5973 }
 0xd78   : > { %v2034_v37 = vsel %vm2003_vm2, %v5974_v33, 0.0 }
 0xd79   : > { %2035 = vadd.xlane.f32.xlu0 %v2034_v37 }
 0xd7b   : > { %v5976_v28 = vpop.eup %5975 }
 0xd7c   : > { %v2037_v41 = vsel %vm2003_vm2, %v5976_v28, 0.0 }
 0xd7d   : > { %2038 = vadd.xlane.f32.xlu1 %v2037_v41 }
 0xd8e   : > { %2150 = vrot.lane.b32.xlu1 %v6579_v63, %s6085_s20 }
 0xd8f   : > { %2198 = vrot.lane.b32.xlu0 %v6584_v27, %s6085_s20 }
 0xd9d   : > { %v2030_v44 = vpop.xlane.xlu0 %2029 }
 0xd9e   : > { %5977 = vrcp.f32 %v2030_v44 }
 0xda8   : > { %v5978_v23 = vpop.eup %5977 }
 0xda9   : > { %v2044_v43 = vmul.f32 %v5978_v23, %v5970_v13 }
 0xdab   : > { %v2048_v24 = vpack.c.bf16 %v2044_v43, %v2044_v43 }
 0xdad   : > { %5516 = vmatmul.mubr.msk.bf16.vlgmr.msra.gmra.mrb[44].mxu1 %vm2054_vm4, %v2048_v24 }
 0xdae   : > { %5527 = vmatprep.mubr.msk.bf16.mxu1 %vm6087_vm12, %v6086_v40 }
 0xe02   : > { %v2033_v30 = vpop.xlane.xlu1 %2032 }
 0xe03   : > { %5979 = vrcp.f32 %v2033_v30 }
 0xe06   : > { %v2036_v17 = vpop.xlane.xlu0 %2035 }
 0xe07   : > { %5981 = vrcp.f32 %v2036_v17 }
 0xe0a   : > { %v2039_v42 = vpop.xlane.xlu1 %2038  ;;  %v2199_v46 = vpop.permute.xlu0 %2198 }
 0xe0b   : > { %5983 = vrcp.f32 %v2039_v42  ;;  %v2204_v51 = vsel %vm2058_vm3, %v2199_v46, 0 }
 0xe0d   : > { %v5980_v63 = vpop.eup %5979 }
 0xe0e   : > { %v2045_v45 = vmul.f32 %v5980_v63, %v5972_v35  ;;  %v2151_v27 = vpop.permute.xlu1 %2150 }
 0xe0f   : > { %v2156_v47 = vsel %vm2058_vm3, %v2151_v27, 0 }
 0xe10   : > { %5526 = vmatpush3.bf16.msra.mxu1 %v2156_v47  ;;  %v2049_v49 = vpack.c.bf16 %v2045_v45, %v2045_v45 }
 0xe11   : > { %v5982_v50 = vpop.eup %5981  ;;  %5537 = vmatprep.subr.bf16.mxu1 %v6086_v40 }
 0xe12   : > { %v2046_v55 = vmul.f32 %v5982_v50, %v5974_v33  ;;  %5522 = vmatmul.mubr.msk.bf16.vlgmr.msra.gmra.mrb[36].mxu0 %vm2054_vm4, %v2049_v49 }
 0xe13   : > { %5532 = vmatpush3.bf16.msra.mxu0 %v2204_v51  ;;  %5533 = vmatprep.mubr.msk.bf16.mxu0 %vm6087_vm12, %v6086_v40  ;;  %v2445_v51 = vrot.slane %v6568_v10, %v6459_v26 }
 0xe14   : > { %v2050_v53 = vpack.c.bf16 %v2046_v55, %v2046_v55  ;;  %5543 = vmatprep.subr.bf16.mxu0 %v6086_v40 }
 0xe15   : > { %v5984_v38 = vpop.eup %5983 }
 0xe16   : > { %v2047_v32 = vmul.f32 %v5984_v38, %v5976_v28  ;;  %5528 = vmatmul.mubr.msk.bf16.vlgmr.msra.gmra.mrb[48].mxu1 %vm2054_vm4, %v2050_v53 }
 0xe17   : > { %5538 = vmatpush3.bf16.msra.mxu1 %v2254_v58  ;;  %5539 = vmatprep.mubr.msk.bf16.mxu1 %vm6087_vm12, %v6086_v40 }
 0xe18   : > { %v2051_v39 = vpack.c.bf16 %v2047_v32, %v2047_v32  ;;  %5549 = vmatprep.subr.bf16.mxu1 %v6086_v40 }
 0xe1a   : > { %5534 = vmatmul.mubr.msk.bf16.vlgmr.msra.gmra.mrb[40].mxu0 %vm2054_vm4, %v2051_v39 }
 0xe1b   : > { %5545 = vmatprep.mubr.msk.bf16.mxu0 %vm6087_vm12, %v6086_v40  ;;  %5544 = vmatpush3.bf16.msra.mxu0 %v2300_v62 }
 0xe1c   : > { %5555 = vmatprep.subr.bf16.mxu0 %v6086_v40 }
 0xe80   : > { %v2096_v61 = vpop.f32.mrb[44].mxu1 }
 0xe81   : > { %v2246_v9 = vpack.c.bf16 %v2096_v61, %v2096_v61  ;;  %v5517_v15 = vpop.f32.mrb[45].mxu1 }
 0xe82   : > { %v2099_v13 = vpop.f32.mrb[46].mxu1 }
 0xe83   : > { %v5518_v5 = vpop.f32.mrb[47].mxu1  ;;  %5540 = vmatmul.mubr.msk.bf16.vlgmr.msra.gmra.mrb[52].mxu1 %vm483_vm1, %v2246_v9 }
 0xe84   : > { %5550 = vmatpush3.bf16.msra.mxu1 %v2346_v3  ;;  %5551 = vmatprep.mubr.msk.bf16.mxu1 %vm6087_vm12, %v6086_v40  ;;  %v5887_v5 = vld [vmem:[%s7292_s4 + $0x20] sm:$0xff]  }
 0xe85   : > { %5561 = vmatprep.subr.bf16.mxu1 %v6086_v40 }
 0xee5   : > { %v2144_v6 = vpop.f32.mrb[36].mxu0 }
 0xee6   : > { %v2247_v7 = vpack.c.bf16 %v2144_v6, %v2144_v6  ;;  %v5523_v19 = vpop.f32.mrb[37].mxu0  ;;  %v5890_v6 = vld [vmem:[%s7293_s5 + $0x48] sm:$0xff]  }
 0xee7   : > { %v2147_v8 = vpop.f32.mrb[38].mxu0 }
 0xee8   : > { %v5524_v2 = vpop.f32.mrb[39].mxu0  ;;  %5546 = vmatmul.mubr.msk.bf16.vlgmr.msra.gmra.mrb[44].mxu0 %vm483_vm1, %v2247_v7  ;;  %v2464_v8 = vrot.slane %v6568_v10, %v6488_v31 }
 0xee9   : > { %v2192_v56 = vpop.f32.mrb[48].mxu1  ;;  %5556 = vmatpush3.bf16.msra.mxu0 %v2392_v20  ;;  %5557 = vmatprep.mubr.msk.bf16.mxu0 %vm6087_vm12, %v6086_v40 }
 0xeea   : > { %v2248_v21 = vpack.c.bf16 %v2192_v56, %v2192_v56  ;;  %v5529_v12 = vpop.f32.mrb[49].mxu1  ;;  %5569 = vmatprep.subr.bf16.mxu0 %v6086_v40 }
 0xeeb   : > { %v2195_v14 = vpop.f32.mrb[50].mxu1 }
 0xeec   : > { %v5530_v29 = vpop.f32.mrb[51].mxu1  ;;  %5552 = vmatmul.mubr.msk.bf16.vlgmr.msra.gmra.mrb[56].mxu1 %vm483_vm1, %v2248_v21  ;;  %v2469_v21 = vrot.slane %v6568_v10, %v6493_v34 }
 0xeed   : > { %v2240_v59 = vpop.f32.mrb[40].mxu0  ;;  %5565 = vmatprep.mubr.msk.bf16.mxu1 %vm6087_vm12, %v6086_v40  ;;  %5562 = vmatpush3.bf16.msra.mxu1 %v5887_v5 }
 0xeee   : > { %v2249_v35 = vpack.c.bf16 %v2240_v59, %v2240_v59  ;;  %v5535_v36 = vpop.f32.mrb[41].mxu0  ;;  %5563 = vmatprep.subr.bf16.mxu1 %v6086_v40  ;;  %v5891_v59 = vld [vmem:[%s7293_s5 + $0x50] sm:$0xff]  }
 0xeef   : > { %v2243_v33 = vpop.f32.mrb[42].mxu0  ;;  %v2475_v36 = vrot.slane %v6568_v10, %v6511_v54 }
 0xef0   : > { %v5536_v37 = vpop.f32.mrb[43].mxu0  ;;  %5558 = vmatmul.mubr.msk.bf16.vlgmr.msra.gmra.mrb[48].mxu0 %vm483_vm1, %v2249_v35  ;;  %v5892_v35 = vld [vmem:[%s7293_s5 + $0x58] sm:$0xff]  }
 0xef1   : > { %5577 = vmatprep.mubr.msk.bf16.mxu0 %vm6087_vm12, %v6086_v40  ;;  %5564 = vmatpush3.bf16.msra.mxu1 %v5888_v11  ;;  %v6749_v11 = vld [vmem:[%s7294_s6 + $0x8] sm:$0xff] }
 0xf56   : > { %v2290_v28 = vpop.f32.mrb[52].mxu1 }
 0xf57   : > { %v5541_v41 = vpop.f32.mrb[53].mxu1  ;;  %v2435_v24 = vsel %vm2434_vm5, %v2290_v28, 0.0 }
 0xf58   : > { %v2293_v44 = vpop.f32.mrb[54].mxu1 }
 0xf59   : > { %v5542_v23 = vpop.f32.mrb[55].mxu1 }
 0xfbb   : > { %v2336_v43 = vpop.f32.mrb[44].mxu0 }
 0xfbc   : > { %v2436_v30 = vsel %vm2434_vm5, %v2336_v43, 0.0  ;;  %v5547_v17 = vpop.f32.mrb[45].mxu0 }
 0xfbd   : > { %v2437_v42 = vadd.f32 %v2436_v30, %v2435_v24  ;;  %v2339_v63 = vpop.f32.mrb[46].mxu0  ;;  %v2536_v24 = vrot.slane %v6568_v10, %v6518_v1 }
 0xfbe   : > { %v5548_v45 = vpop.f32.mrb[47].mxu0 }
 0xfbf   : > { %v2382_v27 = vpop.f32.mrb[56].mxu1 }
 0xfc0   : > { %v2438_v46 = vsel %vm2434_vm5, %v2382_v27, 0.0  ;;  %v5553_v47 = vpop.f32.mrb[57].mxu1 }
 0xfc1   : > { %v2439_v49 = vadd.f32 %v2438_v46, %v2437_v42  ;;  %v2385_v50 = vpop.f32.mrb[58].mxu1 }
 0xfc2   : > { %v5554_v52 = vpop.f32.mrb[59].mxu1 }
 0xfc3   : > { %v2428_v55 = vpop.f32.mrb[48].mxu0 }
 0xfc4   : > { %v2440_v53 = vsel %vm2434_vm5, %v2428_v55, 0.0  ;;  %v5559_v58 = vpop.f32.mrb[49].mxu0 }
 0xfc5   : > { %v2441_v38 = vadd.f32 %v2440_v53, %v2439_v49  ;;  %v2431_v32 = vpop.f32.mrb[50].mxu0  ;;  %v5894_v53 = vld [vmem:[%s7290_s2 + $0x18] sm:$0xff]  }
 0xfc6   : > { %v5560_v39 = vpop.f32.mrb[51].mxu0 }
 0xfc7   : > { %v2446_v60 = vadd.f32 %v2445_v51, %v2441_v38  ;;  %v5893_v51 = vld [vmem:[%s7290_s2 + $0x10] sm:$0xff]   ;;  %v2621_v39 = vrot.slane %v6568_v10, %v6543_v48 }
 0xfc8   : > { %5581 = vmatprep.subr.bf16.mxu1 %v5893_v51 }
 0xfc9   : > { %v2447_v62 = vadd.f32 %v2446_v60, %v6558_v4  ;;  %v5889_v4 = vld [vmem:[%s7293_s5 + $0x40] sm:$0xff]  }
 0xfca   : > { %5570 = vmatpush3.bf16.msra.mxu0 %v5889_v4  ;;  %v2666_v4 = vrot.slane %v6749_v11, %v6173_v16 }
 0xfcb   : > { %v2448_v0 = vsel %vm2434_vm5, %v2447_v62, 0.0  ;;  %5571 = vmatprep.subr.bf16.mxu0 %v6086_v40 }
 0xfcc   : > { %2449 = vadd.xlane.f32.xlu1 %v2448_v0 }
 0xfce   : > { %5572 = vmatpush3.bf16.msra.mxu0 %v5890_v6 }
 0xfcf   : > { %5573 = vmatprep.subr.bf16.mxu0 %v6086_v40 }
 0xfd2   : > { %5574 = vmatpush3.bf16.msra.mxu0 %v5891_v59 }
 0xfd3   : > { %5575 = vmatprep.subr.bf16.mxu0 %v6086_v40 }
 0xfd6   : > { %5576 = vmatpush3.bf16.msra.mxu0 %v5892_v35 }
0x1059   : > { %v2450_v61 = vpop.xlane.xlu1 %2449 }
0x105a   : > { %v2451_v9 = vmul.f32 0.03125, %v2450_v61 }
0x105c   : > { %v2452_v15 = vsub.f32 %v2447_v62, %v2451_v9  ;;  %v2626_v62 = vrot.slane %v6568_v10, %v6546_v57 }
0x105e   : > { %v2453_v3 = vmul.f32 %v2452_v15, %v2452_v15 }
0x1060   : > { %v2454_v13 = vsel %vm2434_vm5, %v2453_v3, 0.0 }
0x1061   : > { %2455 = vadd.xlane.f32.xlu0 %v2454_v13 }
0x10ee   : > { %v2456_v7 = vpop.xlane.xlu0 %2455 }
0x10ef   : > { %v2457_v19 = vmul.f32 0.03125, %v2456_v7 }
0x10f1   : > { %v2458_v20 = vadd.f32 1e-05, %v2457_v19 }
0x10f3   : > { %5985 = vrsqrt.f32 %v2458_v20 }
0x10fd   : > { %v5986_v2 = vpop.eup %5985 }
0x10fe   : > { %v2460_v56 = vmul.f32 %v5986_v2, %v2452_v15 }
0x1100   : > { %v2465_v12 = vmul.f32 %v2464_v8, %v2460_v56 }
0x1102   : > { %v2470_v14 = vadd.f32 %v2469_v21, %v2465_v12 }
0x1104   : > { %v2471_v29 = vpack.c.bf16 %v2470_v14, %v2470_v14 }
0x1106   : > { %5566 = vmatmul.mubr.msk.bf16.vlgmr.msra.gmra.mrb[60].mxu1 %vm307_vm0, %v2471_v29 }
0x1107   : > { %5582 = vmatpush3.bf16.msra.mxu1 %v5893_v51 }
0x1108   : > { %5583 = vmatprep.subr.bf16.mxu1 %v5894_v53 }
0x110b   : > { %5584 = vmatpush3.bf16.msra.mxu1 %v5894_v53 }
0x11d9   : > { %v2525_v33 = vpop.f32.mrb[60].mxu1 }
0x11da   : > { %v2526_v37 = vadd.f32 %v2525_v33, %v2475_v36  ;;  %v5567_v28 = vpop.f32.mrb[61].mxu1 }
0x11db   : > { %v2528_v41 = vpop.f32.mrb[62].mxu1 }
0x11dc   : > { %v2531_v44 = vmax.f32 %v2526_v37, 0.0  ;;  %v5568_v23 = vpop.f32.mrb[63].mxu1 }
0x11de   : > { %v2532_v43 = vpack.c.bf16 %v2531_v44, %v2531_v44 }
0x11e0   : > { %5578 = vmatmul.mubr.msk.bf16.vlgmr.msra.gmra.mrb[52].mxu0 %vm1582_vm11, %v2532_v43 }
0x12b3   : > { %v2598_v30 = vpop.f32.mrb[52].mxu0 }
0x12b4   : > { %v2599_v17 = vadd.f32 %v2598_v30, %v2536_v24  ;;  %v5579_v42 = vpop.f32.mrb[53].mxu0 }
0x12b5   : > { %v2601_v63 = vpop.f32.mrb[54].mxu0 }
0x12b6   : > { %v5580_v45 = vpop.f32.mrb[55].mxu0  ;;  %v2604_v27 = vadd.f32 %v2599_v17, %v2470_v14 }
0x12b8   : > { %v2605_v46 = vsel %vm2434_vm5, %v2604_v27, 0.0 }
0x12b9   : > { %2606 = vadd.xlane.f32.xlu0 %v2605_v46 }
0x1346   : > { %v2607_v47 = vpop.xlane.xlu0 %2606 }
0x1347   : > { %v2608_v49 = vmul.f32 0.03125, %v2607_v47 }
0x1349   : > { %v2609_v50 = vsub.f32 %v2604_v27, %v2608_v49 }
0x134b   : > { %v2610_v52 = vmul.f32 %v2609_v50, %v2609_v50 }
0x134d   : > { %v2611_v55 = vsel %vm2434_vm5, %v2610_v52, 0.0 }
0x134e   : > { %2612 = vadd.xlane.f32.xlu1 %v2611_v55 }
0x13db   : > { %v2613_v58 = vpop.xlane.xlu1 %2612 }
0x13dc   : > { %v2614_v38 = vmul.f32 0.03125, %v2613_v58 }
0x13de   : > { %v2615_v32 = vadd.f32 1e-05, %v2614_v38 }
0x13e0   : > { %5987 = vrsqrt.f32 %v2615_v32 }
0x13ea   : > { %v5988_v60 = vpop.eup %5987 }
0x13eb   : > { %v2617_v0 = vmul.f32 %v5988_v60, %v2609_v50 }
0x13ed   : > { %v2622_v61 = vmul.f32 %v2621_v39, %v2617_v0 }
0x13ef   : > { %v2627_v9 = vadd.f32 %v2626_v62, %v2622_v61 }
0x13f1   : > { %2628 = vst.msk [vmem:[#allocation2] sm:$0x3] %vm1696_vm13, %v2627_v9 }
0x13f2   : > { %2629 = vst.msk [vmem:[#allocation2 + $0x7] sm:$0xc] %vm1700_vm15, %v2627_v9 }
0x13f3   : > { %2631 = vst.msk [vmem:[#allocation2 + $0xe] sm:$0x30] %vm2630_vm6, %v2627_v9 }
0x13f8   : > { %v6734_v15 = vld [vmem:[#allocation2] sm:$0xff] }
0x13f9   : > { %v6736_v3 = vld [vmem:[#allocation2 + $0x8] sm:$0xff] }
0x13fa   : > { %v6738_v13 = vld [vmem:[#allocation2 + $0x10] sm:$0xff]  ;;  %v2661_v5 = vpack.c.bf16 %v6736_v3, %v6734_v15 }
0x13fb   : > { %v2662_v10 = vpack.c.bf16 %v6738_v13, %v6738_v13 }
0x13fc   : > { %5585 = vmatprep.mubr.msk.bf16.mxu1 %vm307_vm0, %v2661_v5 }
0x13fd   : > { %5586 = vmatmul.mubr.msk.bf16.vlgmr.msra.gmra.mrb[64].mxu1 %vm307_vm0, %v2662_v10 }
0x14d0   : > { %v5587_v6 = vpop.f32.mrb[64].mxu1 }
0x14d1   : > { %v2728_v7 = vadd.f32 %v5587_v6, %v2666_v4  ;;  %v2719_v19 = vpop.f32.mrb[65].mxu1 }
0x14d2   : > { %v5588_v20 = vpop.f32.mrb[66].mxu1  ;;  %v2720_v2 = vadd.f32 %v2719_v19, %v2666_v4 }
0x14d3   : > { %2740 = vrot.lane.b32.xlu1 %v2728_v7, %s6080_s17  ;;  %v2722_v8 = vpop.f32.mrb[67].mxu1  ;;  %v6765_v14 = vpack.c.bf16 %v2728_v7, %v2728_v7 }
0x14d4   : > { %v2723_v56 = vadd.f32 %v2722_v8, %v2666_v4 }
0x14d6   : > { %v5867_v21 = vpack.i.bf16 %v2723_v56, %v2720_v2  ;;  %v6754_v12 = vpack.c.bf16 %v2723_v56, %v2720_v2 }
0x14d8   : > { %5868 = vrot.lane.b32.xlu1 %v5867_v21, %s6079_s16  ;;  %5863 = vrot.lane.b32.xlu0 %v5867_v21, %s6080_s17 }
0x14d9   : > { %5593 = vmatprep.mubr.msk.bf16.mxu1 %vm483_vm1, %v6754_v12 }
0x14dc   : > { %2749 = vrot.lane.b32.xlu1 %v2728_v7, %s6079_s16  ;;  %5873 = vrot.lane.b32.xlu0 %v5867_v21, %s6081_s18 }
0x14e0   : > { %2758 = vrot.lane.b32.xlu0 %v2728_v7, %s6081_s18  ;;  %2773 = vrot.lane.b32.xlu1 %v6754_v12, %s6082_s19 }
0x14e4   : > { %2775 = vrot.lane.b32.xlu1 %v6765_v14, %s6082_s19 }
0x1545   : > { %v2741_v29 = vpop.permute.xlu1 %2740 }
0x1546   : > { %v6779_v24 = vpack.c.bf16 %v2741_v29, %v2741_v29 }
0x154a   : > { %v5869_v59 = vpop.permute.xlu1 %5868  ;;  %v5864_v35 = vpop.permute.xlu0 %5863 }
0x154b   : > { %v5871_v36 = vunpack.i.h.bf16 %v5869_v59  ;;  %v5870_v33 = vunpack.i.l.bf16 %v5869_v59  ;;  %v5866_v37 = vunpack.i.h.bf16 %v5864_v35  ;;  %v5865_v28 = vunpack.i.l.bf16 %v5864_v35 }
0x154d   : > { %v6769_v41 = vpack.c.bf16 %v5871_v36, %v5870_v33  ;;  %v6771_v44 = vpack.c.bf16 %v5866_v37, %v5865_v28 }
0x154e   : > { %v2750_v23 = vpop.permute.xlu1 %2749  ;;  %v5874_v43 = vpop.permute.xlu0 %5873 }
0x154f   : > { %2839 = vrot.lane.b32.xlu0 %v6771_v44, %s6082_s19  ;;  %5601 = vmatprep.mubr.msk.bf16.mxu0 %vm483_vm1, %v6771_v44  ;;  %v5876_v30 = vunpack.i.h.bf16 %v5874_v43  ;;  %v5875_v17 = vunpack.i.l.bf16 %v5874_v43  ;;  %v6781_v42 = vpack.c.bf16 %v2750_v23, %v2750_v23 }
0x1550   : > { %2905 = vrot.lane.b32.xlu1 %v6769_v41, %s6082_s19 }
0x1551   : > { %v6789_v27 = vpack.c.bf16 %v5876_v30, %v5875_v17 }
0x1552   : > { %v2774_v63 = vpop.permute.xlu1 %2773  ;;  %v2759_v46 = vpop.permute.xlu0 %2758 }
0x1553   : > { %v2784_v45 = vsel %vm483_vm1, %v2774_v63, 0  ;;  %2841 = vrot.lane.b32.xlu0 %v6779_v24, %s6082_s19  ;;  %5813 = vmatprep.subr.msk.bf16.mxu1 %vm483_vm1, %v2774_v63  ;;  %v6794_v49 = vpack.c.bf16 %v2759_v46, %v2759_v46 }
0x1554   : > { %2907 = vrot.lane.b32.xlu1 %v6781_v42, %s6082_s19  ;;  %5590 = vmatpush3.bf16.xpose.msra.mxu1 %v2784_v45 }
0x1556   : > { %v2776_v47 = vpop.permute.xlu1 %2775 }
0x1557   : > { %2971 = vrot.lane.b32.xlu0 %v6789_v27, %s6082_s19  ;;  %5814 = vmatprep.subr.msk.bf16.mxu1 %vm483_vm1, %v2776_v47  ;;  %v2787_v50 = vsel %vm483_vm1, %v2776_v47, 0 }
0x155b   : > { %2973 = vrot.lane.b32.xlu0 %v6794_v49, %s6082_s19 }
0x155c   : > { %5592 = vmatpush3.bf16.xpose.msra.mxu1 %v2787_v50 }
0x1563   : > { %5594 = vmatmul.mubr.msk.bf16.vlgmr.msra.gmra.mrb[68].mxu1 %vm483_vm1, %v6765_v14 }
0x1564   : > { %5609 = vmatprep.mubr.msk.bf16.mxu1 %vm483_vm1, %v6769_v41 }
0x15c1   : > { %v2840_v52 = vpop.permute.xlu0 %2839 }
0x15c2   : > { %v2850_v55 = vsel %vm483_vm1, %v2840_v52, 0  ;;  %v2906_v51 = vpop.permute.xlu1 %2905  ;;  %5815 = vmatprep.subr.msk.bf16.mxu0 %vm483_vm1, %v2840_v52 }
0x15c3   : > { %v2916_v53 = vsel %vm483_vm1, %v2906_v51, 0  ;;  %5817 = vmatprep.subr.msk.bf16.mxu1 %vm483_vm1, %v2906_v51  ;;  %5598 = vmatpush3.bf16.xpose.msra.mxu0 %v2850_v55 }
0x15c4   : > { %5606 = vmatpush3.bf16.xpose.msra.mxu1 %v2916_v53 }
0x15c5   : > { %v2842_v58 = vpop.permute.xlu0 %2841 }
0x15c6   : > { %v2908_v38 = vpop.permute.xlu1 %2907  ;;  %5816 = vmatprep.subr.msk.bf16.mxu0 %vm483_vm1, %v2842_v58  ;;  %v2853_v32 = vsel %vm483_vm1, %v2842_v58, 0 }
0x15c7   : > { %5818 = vmatprep.subr.msk.bf16.mxu1 %vm483_vm1, %v2908_v38  ;;  %v2919_v39 = vsel %vm483_vm1, %v2908_v38, 0 }
0x15c9   : > { %v2972_v60 = vpop.permute.xlu0 %2971 }
0x15ca   : > { %v2982_v62 = vsel %vm483_vm1, %v2972_v60, 0 }
0x15cb   : > { %5600 = vmatpush3.bf16.xpose.msra.mxu0 %v2853_v32 }
0x15cc   : > { %5608 = vmatpush3.bf16.xpose.msra.mxu1 %v2919_v39  ;;  %5819 = vmatprep.subr.msk.bf16.mxu0 %vm483_vm1, %v2972_v60 }
0x15cd   : > { %v2974_v0 = vpop.permute.xlu0 %2973 }
0x15ce   : > { %v2985_v61 = vsel %vm483_vm1, %v2974_v0, 0 }
0x15d2   : > { %5602 = vmatmul.mubr.msk.bf16.vlgmr.msra.gmra.mrb[56].mxu0 %vm483_vm1, %v6779_v24 }
0x15d3   : > { %5610 = vmatmul.mubr.msk.bf16.vlgmr.msra.gmra.mrb[72].mxu1 %vm483_vm1, %v6781_v42  ;;  %5614 = vmatpush3.bf16.xpose.msra.mxu0 %v2982_v62 }
0x15d4   : > { %5617 = vmatprep.mubr.msk.bf16.mxu0 %vm483_vm1, %v6789_v27  ;;  %5820 = vmatprep.subr.msk.bf16.mxu0 %vm483_vm1, %v2974_v0 }
0x15db   : > { %5616 = vmatpush3.bf16.xpose.msra.mxu0 %v2985_v61 }
0x15e2   : > { %5618 = vmatmul.mubr.msk.bf16.vlgmr.msra.gmra.mrb[60].mxu0 %vm483_vm1, %v6794_v49 }
0x1636   : > { %v5595_v9 = vpop.f32.mrb[68].mxu1 }
0x1637   : > { %v3037_v5 = vmul.f32 0.35355338, %v5595_v9  ;;  %v2823_v10 = vpop.f32.mrb[69].mxu1 }
0x1638   : > { %v3035_v4 = vmul.f32 0.35355338, %v2823_v10  ;;  %v5596_v6 = vpop.f32.mrb[70].mxu1 }
0x1639   : > { %v2826_v7 = vpop.f32.mrb[71].mxu1  ;;  %v6824_v19 = vadd.f32 %v3037_v5, %v6255_v18 }
0x163a   : > { %v3036_v20 = vmul.f32 0.35355338, %v2826_v7  ;;  %v6827_v8 = vadd.f32 %v3035_v4, %v6257_v22 }
0x163b   : > { %v3065_v2 = vsel %vm766_vm9, %v6824_v19, -inf }
0x163c   : > { %v6832_v56 = vadd.f32 %v3036_v20, %v6262_v25  ;;  %3066 = vmax.xlane.f32.xlu0 %v3065_v2  ;;  %v3059_v21 = vsel %vm766_vm9, %v6827_v8, -inf }
0x163d   : > { %3060 = vmax.xlane.f32.xlu1 %v3059_v21 }
0x163e   : > { %v3062_v29 = vsel %vm766_vm9, %v6832_v56, -inf }
0x1640   : > { %3063 = vmax.xlane.f32.xlu0 %v3062_v29 }
0x16a5   : > { %v5603_v59 = vpop.f32.mrb[56].mxu0 }
0x16a6   : > { %v3040_v35 = vmul.f32 0.35355338, %v5603_v59  ;;  %v5611_v36 = vpop.f32.mrb[72].mxu1  ;;  %v2889_v33 = vpop.f32.mrb[57].mxu0 }
0x16a7   : > { %v3038_v37 = vmul.f32 0.35355338, %v2889_v33  ;;  %v2955_v28 = vpop.f32.mrb[73].mxu1  ;;  %v5604_v23 = vpop.f32.mrb[58].mxu0  ;;  %v3043_v51 = vmul.f32 0.35355338, %v5611_v36 }
0x16a8   : > { %v3041_v43 = vmul.f32 0.35355338, %v2955_v28  ;;  %v5612_v30 = vpop.f32.mrb[74].mxu1  ;;  %v2892_v17 = vpop.f32.mrb[59].mxu0  ;;  %v6839_v63 = vadd.f32 %v3040_v35, %v6255_v18 }
0x16a9   : > { %v3039_v45 = vmul.f32 0.35355338, %v2892_v17  ;;  %v2958_v46 = vpop.f32.mrb[75].mxu1  ;;  %v6842_v47 = vadd.f32 %v3038_v37, %v6257_v22  ;;  %v6860_v39 = vadd.f32 %v3043_v51, %v6255_v18 }
0x16aa   : > { %v6845_v50 = vadd.f32 %v3041_v43, %v6257_v22  ;;  %v3042_v52 = vmul.f32 0.35355338, %v2958_v46  ;;  %v3074_v55 = vsel %vm766_vm9, %v6839_v63, -inf }
0x16ab   : > { %3075 = vmax.xlane.f32.xlu1 %v3074_v55  ;;  %v6850_v53 = vadd.f32 %v3039_v45, %v6262_v25  ;;  %v3068_v32 = vsel %vm766_vm9, %v6842_v47, -inf  ;;  %v3083_v0 = vsel %vm766_vm9, %v6860_v39, -inf }
0x16ac   : > { %v3077_v58 = vsel %vm766_vm9, %v6845_v50, -inf  ;;  %v6855_v38 = vadd.f32 %v3042_v52, %v6262_v25 }
0x16ad   : > { %3078 = vmax.xlane.f32.xlu0 %v3077_v58  ;;  %v3071_v60 = vsel %vm766_vm9, %v6850_v53, -inf }
0x16ae   : > { %v3080_v62 = vsel %vm766_vm9, %v6855_v38, -inf }
0x16af   : > { %3069 = vmax.xlane.f32.xlu1 %v3068_v32 }
0x16b1   : > { %3072 = vmax.xlane.f32.xlu0 %v3071_v60 }
0x16b3   : > { %3081 = vmax.xlane.f32.xlu1 %v3080_v62 }
0x16b5   : > { %3084 = vmax.xlane.f32.xlu0 %v3083_v0  ;;  %v5619_v61 = vpop.f32.mrb[60].mxu0 }
0x16b6   : > { %v3021_v9 = vpop.f32.mrb[61].mxu0  ;;  %v3046_v5 = vmul.f32 0.35355338, %v5619_v61 }
0x16b7   : > { %v3044_v10 = vmul.f32 0.35355338, %v3021_v9  ;;  %v5620_v4 = vpop.f32.mrb[62].mxu0 }
0x16b8   : > { %v3024_v6 = vpop.f32.mrb[63].mxu0  ;;  %v6872_v2 = vadd.f32 %v3046_v5, %v6255_v18 }
0x16b9   : > { %v6869_v7 = vadd.f32 %v3044_v10, %v6257_v22  ;;  %v3045_v20 = vmul.f32 0.35355338, %v3024_v6 }
0x16ba   : > { %v3092_v35 = vsel %vm766_vm9, %v6872_v2, -inf }
0x16bb   : > { %v6875_v21 = vadd.f32 %v3045_v20, %v6262_v25  ;;  %v3086_v29 = vsel %vm766_vm9, %v6869_v7, -inf }
0x16bc   : > { %3087 = vmax.xlane.f32.xlu1 %v3086_v29 }
0x16bd   : > { %v3089_v59 = vsel %vm766_vm9, %v6875_v21, -inf }
0x16be   : > { %3090 = vmax.xlane.f32.xlu0 %v3089_v59 }
0x16c0   : > { %3093 = vmax.xlane.f32.xlu1 %v3092_v35 }
0x16c9   : > { %v3067_v18 = vpop.xlane.xlu0 %3066 }
0x16ca   : > { %v3097_v25 = vsub.f32 %v6824_v19, %v3067_v18 }
0x16cd   : > { %v3064_v22 = vpop.xlane.xlu0 %3063 }
0x16ce   : > { %v3096_v36 = vsub.f32 %v6832_v56, %v3064_v22 }
0x16d1   : > { %3261 = vrot.lane.b32.xlu1 %v6771_v44, %s6085_s20  ;;  %v3061_v44 = vpop.xlane.xlu1 %3060 }
0x16d2   : > { %v3095_v33 = vsub.f32 %v6827_v8, %v3061_v44 }
0x16d4   : > { %3199 = vrot.lane.b32.xlu0 %v6754_v12, %s6085_s20  ;;  %v3111_v12 = vmul.f32 1.442695, %v3097_v25  ;;  %v3107_v37 = vmul.f32 1.442695, %v3095_v33 }
0x16d5   : > { %3201 = vrot.lane.b32.xlu1 %v6765_v14, %s6085_s20  ;;  %v3109_v14 = vmul.f32 1.442695, %v3096_v36 }
0x16d6   : > { %5989 = vpow2.f32 %v3111_v12 }
0x16d7   : > { %5991 = vpow2.f32 %v3109_v14 }
0x16d8   : > { %3263 = vrot.lane.b32.xlu0 %v6779_v24, %s6085_s20  ;;  %5993 = vpow2.f32 %v3107_v37 }
0x16d9   : > { %3323 = vrot.lane.b32.xlu1 %v6769_v41, %s6085_s20 }
0x16dc   : > { %3385 = vrot.lane.b32.xlu0 %v6789_v27, %s6085_s20 }
0x16e0   : > { %v6898_v24 = vpop.eup %5989 }
0x16e1   : > { %v6900_v41 = vpop.eup %5991  ;;  %v3137_v27 = vsel %vm766_vm9, %v6898_v24, 0.0 }
0x16e2   : > { %v6904_v28 = vpop.eup %5993  ;;  %v3134_v19 = vsel %vm766_vm9, %v6900_v41, 0.0 }
0x16e3   : > { %v3131_v8 = vsel %vm766_vm9, %v6904_v28, 0.0 }
0x16fb   : > { %3138 = vadd.xlane.f32.xlu0 %v3137_v27 }
0x16fd   : > { %3135 = vadd.xlane.f32.xlu1 %v3134_v19 }
0x16ff   : > { %3132 = vadd.xlane.f32.xlu0 %v3131_v8 }
0x1738   : > { %v3076_v56 = vpop.xlane.xlu1 %3075 }
0x1739   : > { %v3100_v23 = vsub.f32 %v6839_v63, %v3076_v56 }
0x173a   : > { %v3079_v43 = vpop.xlane.xlu0 %3078 }
0x173b   : > { %v3117_v30 = vmul.f32 1.442695, %v3100_v23  ;;  %v3101_v51 = vsub.f32 %v6845_v50, %v3079_v43 }
0x173c   : > { %v3070_v17 = vpop.xlane.xlu1 %3069 }
0x173d   : > { %5995 = vpow2.f32 %v3117_v30  ;;  %v3098_v45 = vsub.f32 %v6842_v47, %v3070_v17  ;;  %v3119_v0 = vmul.f32 1.442695, %v3101_v51 }
0x173e   : > { %v3073_v46 = vpop.xlane.xlu0 %3072 }
0x173f   : > { %v3113_v52 = vmul.f32 1.442695, %v3098_v45  ;;  %v3099_v63 = vsub.f32 %v6850_v53, %v3073_v46 }
0x1740   : > { %v3082_v55 = vpop.xlane.xlu1 %3081 }
0x1741   : > { %5997 = vpow2.f32 %v3113_v52  ;;  %v3102_v58 = vsub.f32 %v6855_v38, %v3082_v55  ;;  %v3115_v50 = vmul.f32 1.442695, %v3099_v63 }
0x1742   : > { %v3085_v32 = vpop.xlane.xlu0 %3084 }
0x1743   : > { %v3121_v60 = vmul.f32 1.442695, %v3102_v58  ;;  %v3103_v62 = vsub.f32 %v6860_v39, %v3085_v32 }
0x1745   : > { %5999 = vpow2.f32 %v3121_v60  ;;  %v3123_v61 = vmul.f32 1.442695, %v3103_v62 }
0x1747   : > { %v6916_v9 = vpop.eup %5995  ;;  %6001 = vpow2.f32 %v3123_v61 }
0x1748   : > { %v3146_v47 = vsel %vm766_vm9, %v6916_v9, 0.0  ;;  %6003 = vpow2.f32 %v3119_v0 }
0x1749   : > { %3147 = vadd.xlane.f32.xlu1 %v3146_v47  ;;  %v3088_v5 = vpop.xlane.xlu1 %3087  ;;  %6005 = vpow2.f32 %v3115_v50 }
0x174a   : > { %v3104_v39 = vsub.f32 %v6869_v7, %v3088_v5 }
0x174b   : > { %v6920_v38 = vpop.eup %5997  ;;  %v3091_v10 = vpop.xlane.xlu0 %3090 }
0x174c   : > { %v3105_v4 = vsub.f32 %v6875_v21, %v3091_v10  ;;  %v3140_v53 = vsel %vm766_vm9, %v6920_v38, 0.0  ;;  %v3125_v18 = vmul.f32 1.442695, %v3104_v39 }
0x174d   : > { %3141 = vadd.xlane.f32.xlu1 %v3140_v53  ;;  %v3094_v6 = vpop.xlane.xlu1 %3093 }
0x174e   : > { %v3127_v20 = vmul.f32 1.442695, %v3105_v4  ;;  %v3106_v29 = vsub.f32 %v6872_v2, %v3094_v6 }
0x174f   : > { %v6927_v59 = vpop.eup %5999  ;;  %v3200_v35 = vpop.permute.xlu0 %3199 }
0x1750   : > { %v3129_v22 = vmul.f32 1.442695, %v3106_v29  ;;  %5621 = vmatprep.subr.bf16.mxu1 %v3200_v35  ;;  %v3152_v7 = vsel %vm766_vm9, %v6927_v59, 0.0  ;;  %6007 = vpow2.f32 %v3127_v20 }
0x1751   : > { %v6931_v25 = vpop.eup %6001  ;;  %5622 = vmatpush3.bf16.msra.mxu1 %v3200_v35  ;;  %3153 = vadd.xlane.f32.xlu1 %v3152_v7  ;;  %v3262_v21 = vpop.permute.xlu1 %3261 }
0x1752   : > { %6009 = vpow2.f32 %v3129_v22  ;;  %v3155_v44 = vsel %vm766_vm9, %v6931_v25, 0.0  ;;  %5629 = vmatprep.subr.bf16.mxu0 %v3262_v21  ;;  %v6935_v2 = vpop.eup %6003 }
0x1753   : > { %3156 = vadd.xlane.f32.xlu0 %v3155_v44  ;;  %v3264_v36 = vpop.permute.xlu0 %3263  ;;  %5630 = vmatpush3.bf16.msra.mxu0 %v3262_v21  ;;  %6011 = vpow2.f32 %v3125_v18  ;;  %v3149_v14 = vsel %vm766_vm9, %v6935_v2, 0.0  ;;  %v6942_v37 = vpop.eup %6005 }
0x1754   : > { %5822 = vmatprep.subr.msk.bf16.mxu0 %vm918_vm10, %v3264_v36  ;;  %v3273_v27 = vsel %vm918_vm10, %v3264_v36, 0  ;;  %v3143_v56 = vsel %vm766_vm9, %v6942_v37, 0.0 }
0x1755   : > { %v3202_v12 = vpop.permute.xlu1 %3201 }
0x1756   : > { %v3211_v33 = vsel %vm918_vm10, %v3202_v12, 0  ;;  %5821 = vmatprep.subr.msk.bf16.mxu1 %vm918_vm10, %v3202_v12 }
0x1757   : > { %3150 = vadd.xlane.f32.xlu0 %v3149_v14  ;;  %v6945_v19 = vpop.permute.xlu0 %3385  ;;  %5624 = vmatpush3.bf16.msra.mxu1 %v3211_v33 }
0x1758   : > { %5632 = vmatpush3.bf16.msra.mxu0 %v3273_v27 }
0x1759   : > { %5645 = vmatprep.subr.bf16.mxu0 %v6945_v19  ;;  %v3324_v8 = vpop.permute.xlu1 %3323 }
0x175a   : > { %5637 = vmatprep.subr.bf16.mxu1 %v3324_v8  ;;  %v6950_v23 = vpop.eup %6007 }
0x175b   : > { %3144 = vadd.xlane.f32.xlu0 %v3143_v56  ;;  %v3161_v45 = vsel %vm766_vm9, %v6950_v23, 0.0 }
0x175c   : > { %v6952_v43 = vpop.eup %6009 }
0x175d   : > { %v3164_v30 = vsel %vm766_vm9, %v6952_v43, 0.0  ;;  %v6956_v17 = vpop.eup %6011 }
0x175e   : > { %3165 = vadd.xlane.f32.xlu1 %v3164_v30  ;;  %v3158_v46 = vsel %vm766_vm9, %v6956_v17, 0.0 }
0x175f   : > { %3162 = vadd.xlane.f32.xlu0 %v3161_v45 }
0x1762   : > { %3159 = vadd.xlane.f32.xlu1 %v3158_v46 }
0x1773   : > { %3325 = vrot.lane.b32.xlu1 %v6781_v42, %s6085_s20 }
0x1775   : > { %3387 = vrot.lane.b32.xlu0 %v6794_v49, %s6085_s20 }
0x1788   : > { %v3139_v52 = vpop.xlane.xlu0 %3138 }
0x1789   : > { %6013 = vrcp.f32 %v3139_v52 }
0x178a   : > { %v3136_v55 = vpop.xlane.xlu1 %3135 }
0x178b   : > { %6015 = vrcp.f32 %v3136_v55 }
0x178c   : > { %v3133_v51 = vpop.xlane.xlu0 %3132 }
0x178d   : > { %6017 = vrcp.f32 %v3133_v51 }
0x1793   : > { %v6014_v58 = vpop.eup %6013 }
0x1794   : > { %v3181_v62 = vmul.f32 %v6014_v58, %v6898_v24 }
0x1795   : > { %v6016_v32 = vpop.eup %6015 }
0x1796   : > { %v3180_v63 = vmul.f32 %v6016_v32, %v6900_v41  ;;  %v3192_v42 = vpack.c.bf16 %v3181_v62, %v3181_v62 }
0x1797   : > { %v6018_v60 = vpop.eup %6017 }
0x1798   : > { %v3179_v0 = vmul.f32 %v6018_v60, %v6904_v28 }
0x179a   : > { %v3191_v61 = vpack.c.bf16 %v3180_v63, %v3179_v0 }
0x179c   : > { %5625 = vmatprep.mubr.msk.bf16.mxu1 %vm766_vm9, %v3191_v61 }
0x179d   : > { %5626 = vmatmul.mubr.msk.bf16.vlgmr.msra.gmra.mrb[76].mxu1 %vm766_vm9, %v3192_v42 }
0x179e   : > { %5638 = vmatpush3.bf16.msra.mxu1 %v3324_v8 }
0x17d6   : > { %v3148_v49 = vpop.xlane.xlu1 %3147 }
0x17da   : > { %v3142_v47 = vpop.xlane.xlu1 %3141 }
0x17de   : > { %v3154_v50 = vpop.xlane.xlu1 %3153 }
0x17df   : > { %6019 = vrcp.f32 %v3154_v50 }
0x17e0   : > { %v3157_v5 = vpop.xlane.xlu0 %3156 }
0x17e1   : > { %6021 = vrcp.f32 %v3157_v5 }
0x17e4   : > { %v3151_v10 = vpop.xlane.xlu0 %3150 }
0x17e5   : > { %6023 = vrcp.f32 %v3151_v10 }
0x17e6   : > { %6025 = vrcp.f32 %v3148_v49 }
0x17e7   : > { %6027 = vrcp.f32 %v3142_v47 }
0x17e8   : > { %v3145_v24 = vpop.xlane.xlu0 %3144 }
0x17e9   : > { %6029 = vrcp.f32 %v3145_v24  ;;  %v6020_v39 = vpop.eup %6019 }
0x17ea   : > { %v3186_v35 = vmul.f32 %v6020_v39, %v6927_v59  ;;  %v5078_v59 = vld [vmem:[%s7291_s3 + $0x10] sm:$0xf] }
0x17eb   : > { %v3166_v41 = vpop.xlane.xlu1 %3165  ;;  %v6022_v4 = vpop.eup %6021 }
0x17ec   : > { %v3163_v28 = vpop.xlane.xlu0 %3162  ;;  %6031 = vrcp.f32 %v3166_v41  ;;  %v3187_v22 = vmul.f32 %v6022_v4, %v6931_v25 }
0x17ed   : > { %6033 = vrcp.f32 %v3163_v28 }
0x17ee   : > { %v3196_v14 = vpack.c.bf16 %v3187_v22, %v3187_v22 }
0x17ef   : > { %v6024_v53 = vpop.eup %6023  ;;  %v3160_v6 = vpop.xlane.xlu1 %3159 }
0x17f0   : > { %v6026_v20 = vpop.eup %6025  ;;  %6035 = vrcp.f32 %v3160_v6  ;;  %v3185_v29 = vmul.f32 %v6024_v53, %v6935_v2 }
0x17f1   : > { %v6028_v18 = vpop.eup %6027  ;;  %v3184_v44 = vmul.f32 %v6026_v20, %v6916_v9  ;;  %v3462_v9 = vsel %vm918_vm10, %v5078_v59, 0 }
0x17f2   : > { %v3195_v7 = vpack.c.bf16 %v3186_v35, %v3185_v29  ;;  %v3182_v33 = vmul.f32 %v6028_v18, %v6920_v38 }
0x17f3   : > { %v6030_v21 = vpop.eup %6029  ;;  %v3326_v36 = vpop.permute.xlu1 %3325  ;;  %v3194_v8 = vpack.c.bf16 %v3184_v44, %v3184_v44 }
0x17f4   : > { %5641 = vmatprep.mubr.msk.bf16.mxu1 %vm766_vm9, %v3195_v7  ;;  %v3335_v12 = vsel %vm918_vm10, %v3326_v36, 0  ;;  %5823 = vmatprep.subr.msk.bf16.mxu1 %vm918_vm10, %v3326_v36  ;;  %v3183_v2 = vmul.f32 %v6030_v21, %v6942_v37  ;;  %v3388_v37 = vpop.permute.xlu0 %3387 }
0x17f5   : > { %5640 = vmatpush3.bf16.msra.mxu1 %v3335_v12  ;;  %v3397_v52 = vsel %vm918_vm10, %v3388_v37, 0 }
0x17f6   : > { %v3193_v25 = vpack.c.bf16 %v3183_v2, %v3182_v33  ;;  %5825 = vmatprep.subr.msk.bf16.mxu1 %vm918_vm10, %v5078_v59  ;;  %v6032_v27 = vpop.eup %6031 }
0x17f7   : > { %v6034_v56 = vpop.eup %6033  ;;  %v3190_v30 = vmul.f32 %v6032_v27, %v6952_v43  ;;  %v5080_v43 = vld [vmem:[%s7291_s3 + $0x18] sm:$0xf] }
0x17f8   : > { %5633 = vmatprep.mubr.msk.bf16.mxu0 %vm766_vm9, %v3193_v25  ;;  %5642 = vmatmul.mubr.msk.bf16.vlgmr.msra.gmra.mrb[80].mxu1 %vm766_vm9, %v3196_v14  ;;  %v3189_v46 = vmul.f32 %v6034_v56, %v6950_v23  ;;  %v3576_v61 = vsel %vm918_vm10, %v5080_v43, 0 }
0x17f9   : > { %5634 = vmatmul.mubr.msk.bf16.vlgmr.msra.gmra.mrb[64].mxu0 %vm766_vm9, %v3194_v8  ;;  %5654 = vmatpush3.bf16.msra.mxu1 %v3462_v9  ;;  %v3198_v51 = vpack.c.bf16 %v3190_v30, %v3190_v30 }
0x17fa   : > { %v6036_v38 = vpop.eup %6035  ;;  %5646 = vmatpush3.bf16.msra.mxu0 %v6945_v19  ;;  %v5079_v19 = vld [vmem:[%s7291_s3 + $0x14] sm:$0xf]  ;;  %5827 = vmatprep.subr.msk.bf16.mxu1 %vm918_vm10, %v5080_v43 }
0x17fb   : > { %5824 = vmatprep.subr.msk.bf16.mxu0 %vm918_vm10, %v3388_v37  ;;  %v3188_v45 = vmul.f32 %v6036_v38, %v6956_v17  ;;  %v3519_v23 = vsel %vm918_vm10, %v5079_v19, 0  ;;  %v5081_v17 = vld [vmem:[%s7291_s3 + $0x1c] sm:$0xf] }
0x17fc   : > { %v3633_v6 = vsel %vm918_vm10, %v5081_v17, 0 }
0x17fd   : > { %v3197_v55 = vpack.c.bf16 %v3189_v46, %v3188_v45 }
0x17fe   : > { %5648 = vmatpush3.bf16.msra.mxu0 %v3397_v52 }
0x17ff   : > { %5649 = vmatprep.mubr.msk.bf16.mxu0 %vm766_vm9, %v3197_v55  ;;  %5826 = vmatprep.subr.msk.bf16.mxu0 %vm918_vm10, %v5079_v19 }
0x1801   : > { %5650 = vmatmul.mubr.msk.bf16.vlgmr.msra.gmra.mrb[68].mxu0 %vm766_vm9, %v3198_v51 }
0x1802   : > { %5660 = vmatpush3.bf16.msra.mxu0 %v3519_v23 }
0x1803   : > { %5828 = vmatprep.subr.msk.bf16.mxu0 %vm918_vm10, %v5081_v17 }
0x1870   : > { %v5627_v58 = vpop.f32.mrb[76].mxu1 }
0x1871   : > { %v3247_v32 = vpop.f32.mrb[77].mxu1  ;;  %v3448_v63 = vpack.c.bf16 %v5627_v58, %v5627_v58 }
0x1872   : > { %v5628_v60 = vpop.f32.mrb[78].mxu1 }
0x1873   : > { %v3250_v62 = vpop.f32.mrb[79].mxu1 }
0x1874   : > { %v3447_v0 = vpack.c.bf16 %v3250_v62, %v3247_v32 }
0x1876   : > { %5655 = vmatprep.mubr.msk.bf16.mxu1 %vm483_vm1, %v3447_v0  ;;  %v3707_v0 = vrot.slane %v6749_v11, %v6459_v26 }
0x1877   : > { %5656 = vmatmul.mubr.msk.bf16.vlgmr.msra.gmra.mrb[84].mxu1 %vm483_vm1, %v3448_v63 }
0x1878   : > { %5666 = vmatpush3.bf16.msra.mxu1 %v3576_v61 }
0x18cb   : > { %v5643_v42 = vpop.f32.mrb[80].mxu1 }
0x18cc   : > { %v5635_v49 = vpop.f32.mrb[64].mxu0  ;;  %v3371_v47 = vpop.f32.mrb[81].mxu1  ;;  %v3452_v39 = vpack.c.bf16 %v5643_v42, %v5643_v42 }
0x18cd   : > { %v3309_v50 = vpop.f32.mrb[65].mxu0  ;;  %v5644_v5 = vpop.f32.mrb[82].mxu1  ;;  %v3450_v53 = vpack.c.bf16 %v5635_v49, %v5635_v49 }
0x18ce   : > { %v5636_v10 = vpop.f32.mrb[66].mxu0  ;;  %v3374_v24 = vpop.f32.mrb[83].mxu1 }
0x18cf   : > { %v3312_v41 = vpop.f32.mrb[67].mxu0  ;;  %v3451_v28 = vpack.c.bf16 %v3374_v24, %v3371_v47 }
0x18d0   : > { %v3449_v4 = vpack.c.bf16 %v3312_v41, %v3309_v50 }
0x18d1   : > { %5667 = vmatprep.mubr.msk.bf16.mxu1 %vm483_vm1, %v3451_v28 }
0x18d2   : > { %5661 = vmatprep.mubr.msk.bf16.mxu0 %vm483_vm1, %v3449_v4  ;;  %5668 = vmatmul.mubr.msk.bf16.vlgmr.msra.gmra.mrb[88].mxu1 %vm483_vm1, %v3452_v39 }
0x18d3   : > { %5662 = vmatmul.mubr.msk.bf16.vlgmr.msra.gmra.mrb[72].mxu0 %vm483_vm1, %v3450_v53 }
0x18d4   : > { %v5651_v20 = vpop.f32.mrb[68].mxu0  ;;  %5672 = vmatpush3.bf16.msra.mxu0 %v3633_v6 }
0x18d5   : > { %v3433_v29 = vpop.f32.mrb[69].mxu0  ;;  %v3454_v7 = vpack.c.bf16 %v5651_v20, %v5651_v20 }
0x18d6   : > { %v5652_v35 = vpop.f32.mrb[70].mxu0 }
0x18d7   : > { %v3436_v18 = vpop.f32.mrb[71].mxu0 }
0x18d8   : > { %v3453_v22 = vpack.c.bf16 %v3436_v18, %v3433_v29 }
0x18da   : > { %5673 = vmatprep.mubr.msk.bf16.mxu0 %vm483_vm1, %v3453_v22 }
0x18db   : > { %5674 = vmatmul.mubr.msk.bf16.vlgmr.msra.gmra.mrb[76].mxu0 %vm483_vm1, %v3454_v7 }
0x194a   : > { %v5657_v21 = vpop.f32.mrb[84].mxu1 }
0x194b   : > { %v3498_v44 = vpop.f32.mrb[85].mxu1  ;;  %v3697_v25 = vsel %vm307_vm0, %v5657_v21, 0.0 }
0x194c   : > { %v5658_v36 = vpop.f32.mrb[86].mxu1  ;;  %v3683_v8 = vsel %vm307_vm0, %v3498_v44, 0.0 }
0x194d   : > { %v3501_v12 = vpop.f32.mrb[87].mxu1 }
0x194e   : > { %v3690_v55 = vsel %vm307_vm0, %v3501_v12, 0.0 }
0x19a5   : > { %v5669_v33 = vpop.f32.mrb[88].mxu1 }
0x19a6   : > { %v5663_v2 = vpop.f32.mrb[72].mxu0  ;;  %v3612_v59 = vpop.f32.mrb[89].mxu1  ;;  %v3700_v45 = vsel %vm307_vm0, %v5669_v33, 0.0 }
0x19a7   : > { %v3698_v14 = vsel %vm307_vm0, %v5663_v2, 0.0  ;;  %v3555_v9 = vpop.f32.mrb[73].mxu0  ;;  %v5670_v27 = vpop.f32.mrb[90].mxu1  ;;  %v3686_v19 = vsel %vm307_vm0, %v3612_v59, 0.0 }
0x19a8   : > { %v3699_v56 = vadd.f32 %v3698_v14, %v3697_v25  ;;  %v3684_v38 = vsel %vm307_vm0, %v3555_v9, 0.0  ;;  %v5664_v37 = vpop.f32.mrb[74].mxu0  ;;  %v3615_v30 = vpop.f32.mrb[91].mxu1  ;;  %v5895_v14 = vld [vmem:[%s7292_s4 + $0x10] sm:$0xff]   ;;  %v5896_v9 = vld [vmem:[%s7292_s4 + $0x18] sm:$0xff]   ;;  %v5897_v27 = vld [vmem:[%s7293_s5 + $0x20] sm:$0xff]  }
0x19a9   : > { %v3685_v46 = vadd.f32 %v3684_v38, %v3683_v8  ;;  %v3558_v52 = vpop.f32.mrb[75].mxu0  ;;  %v3693_v58 = vsel %vm307_vm0, %v3615_v30, 0.0  ;;  %5677 = vmatprep.subr.bf16.mxu1 %v5895_v14  ;;  %v5898_v8 = vld [vmem:[%s7293_s5 + $0x28] sm:$0xff]   ;;  %5685 = vmatprep.subr.bf16.mxu0 %v5897_v27 }
0x19aa   : > { %v3701_v51 = vadd.f32 %v3700_v45, %v3699_v56  ;;  %v3691_v43 = vsel %vm307_vm0, %v3558_v52, 0.0  ;;  %5678 = vmatpush3.bf16.msra.mxu1 %v5895_v14  ;;  %5686 = vmatpush3.bf16.msra.mxu0 %v5897_v27 }
0x19ab   : > { %v3687_v23 = vadd.f32 %v3686_v19, %v3685_v46  ;;  %v3692_v17 = vadd.f32 %v3691_v43, %v3690_v55  ;;  %5679 = vmatprep.subr.bf16.mxu1 %v5896_v9  ;;  %5687 = vmatprep.subr.bf16.mxu0 %v5898_v8  ;;  %v3756_v19 = vrot.slane %v6749_v11, %v6488_v31 }
0x19ad   : > { %v3694_v32 = vadd.f32 %v3693_v58, %v3692_v17 }
0x19ae   : > { %v5675_v60 = vpop.f32.mrb[76].mxu0  ;;  %5680 = vmatpush3.bf16.msra.mxu1 %v5896_v9  ;;  %5688 = vmatpush3.bf16.msra.mxu0 %v5898_v8 }
0x19af   : > { %v3702_v62 = vsel %vm307_vm0, %v5675_v60, 0.0  ;;  %v3669_v63 = vpop.f32.mrb[77].mxu0  ;;  %5697 = vmatprep.subr.bf16.mxu1 %v6086_v40  ;;  %v3763_v60 = vrot.slane %v6749_v11, %v6493_v34 }
0x19b0   : > { %v3703_v61 = vadd.f32 %v3702_v62, %v3701_v51  ;;  %v3688_v42 = vsel %vm307_vm0, %v3669_v63, 0.0  ;;  %v5676_v49 = vpop.f32.mrb[78].mxu0 }
0x19b1   : > { %v3689_v47 = vadd.f32 %v3688_v42, %v3687_v23  ;;  %v3672_v50 = vpop.f32.mrb[79].mxu0 }
0x19b2   : > { %v3695_v5 = vsel %vm307_vm0, %v3672_v50, 0.0  ;;  %v3710_v41 = vadd.f32 %v3707_v0, %v3703_v61 }
0x19b3   : > { %v3708_v10 = vadd.f32 %v3707_v0, %v3689_v47  ;;  %v3696_v24 = vadd.f32 %v3695_v5, %v3694_v32 }
0x19b4   : > { %v3713_v20 = vadd.f32 %v3710_v41, %v6738_v13  ;;  %v3772_v41 = vrot.slane %v6749_v11, %v6511_v54  ;;  %v6070_v11 = vld [vmem:[%s7294_s6 + $0x8] sm:$0xff] }
0x19b5   : > { %v3709_v28 = vadd.f32 %v3707_v0, %v3696_v24  ;;  %v3711_v39 = vadd.f32 %v3708_v10, %v6734_v15  ;;  %v5899_v10 = vld [vmem:[%s7293_s5 + $0x30] sm:$0xff]   ;;  %v5900_v24 = vld [vmem:[%s7293_s5 + $0x38] sm:$0xff]  }
0x19b6   : > { %v3720_v29 = vsel %vm307_vm0, %v3713_v20, 0.0  ;;  %5689 = vmatprep.subr.bf16.mxu0 %v5899_v10 }
0x19b7   : > { %v3714_v4 = vsel %vm307_vm0, %v3711_v39, 0.0  ;;  %v3712_v53 = vadd.f32 %v3709_v28, %v6736_v3  ;;  %5690 = vmatpush3.bf16.msra.mxu0 %v5899_v10 }
0x19b8   : > { %3715 = vadd.xlane.f32.xlu1 %v3714_v4  ;;  %5691 = vmatprep.subr.bf16.mxu0 %v5900_v24 }
0x19b9   : > { %v3717_v6 = vsel %vm307_vm0, %v3712_v53, 0.0 }
0x19ba   : > { %3718 = vadd.xlane.f32.xlu0 %v3717_v6 }
0x19bb   : > { %5692 = vmatpush3.bf16.msra.mxu0 %v5900_v24  ;;  %v3971_v24 = vrot.slane %v6070_v11, %v6543_v48 }
0x19bc   : > { %5711 = vmatprep.subr.bf16.mxu0 %v6086_v40 }
0x19be   : > { %3721 = vadd.xlane.f32.xlu0 %v3720_v29 }
0x1a45   : > { %v3716_v35 = vpop.xlane.xlu1 %3715 }
0x1a46   : > { %v3723_v18 = vmul.f32 0.03125, %v3716_v35 }
0x1a47   : > { %v3719_v22 = vpop.xlane.xlu0 %3718 }
0x1a48   : > { %v3726_v7 = vsub.f32 %v3711_v39, %v3723_v18  ;;  %v3724_v21 = vmul.f32 0.03125, %v3719_v22 }
0x1a4a   : > { %v3727_v44 = vsub.f32 %v3712_v53, %v3724_v21  ;;  %v3729_v15 = vmul.f32 %v3726_v7, %v3726_v7 }
0x1a4b   : > { %v3722_v36 = vpop.xlane.xlu0 %3721 }
0x1a4c   : > { %v3725_v12 = vmul.f32 0.03125, %v3722_v36  ;;  %v3732_v3 = vsel %vm307_vm0, %v3729_v15, 0.0  ;;  %v3730_v33 = vmul.f32 %v3727_v44, %v3727_v44 }
0x1a4d   : > { %3733 = vadd.xlane.f32.xlu1 %v3732_v3 }
0x1a4e   : > { %v3728_v2 = vsub.f32 %v3713_v20, %v3725_v12  ;;  %v3735_v13 = vsel %vm307_vm0, %v3730_v33, 0.0 }
0x1a4f   : > { %3736 = vadd.xlane.f32.xlu0 %v3735_v13 }
0x1a50   : > { %v3731_v59 = vmul.f32 %v3728_v2, %v3728_v2 }
0x1a52   : > { %v3738_v25 = vsel %vm307_vm0, %v3731_v59, 0.0 }
0x1a53   : > { %3739 = vadd.xlane.f32.xlu1 %v3738_v25 }
0x1ada   : > { %v3734_v56 = vpop.xlane.xlu1 %3733 }
0x1adb   : > { %v3741_v38 = vmul.f32 0.03125, %v3734_v56 }
0x1adc   : > { %v3737_v37 = vpop.xlane.xlu0 %3736 }
0x1add   : > { %v3744_v30 = vadd.f32 1e-05, %v3741_v38  ;;  %v3742_v45 = vmul.f32 0.03125, %v3737_v37 }
0x1adf   : > { %6037 = vrsqrt.f32 %v3744_v30  ;;  %v3745_v46 = vadd.f32 1e-05, %v3742_v45 }
0x1ae0   : > { %v3740_v52 = vpop.xlane.xlu1 %3739 }
0x1ae1   : > { %6039 = vrsqrt.f32 %v3745_v46  ;;  %v3743_v55 = vmul.f32 0.03125, %v3740_v52 }
0x1ae3   : > { %v3746_v51 = vadd.f32 1e-05, %v3743_v55 }
0x1ae5   : > { %6041 = vrsqrt.f32 %v3746_v51 }
0x1ae9   : > { %v6038_v43 = vpop.eup %6037 }
0x1aea   : > { %v3750_v23 = vmul.f32 %v6038_v43, %v3726_v7 }
0x1aeb   : > { %v6040_v17 = vpop.eup %6039 }
0x1aec   : > { %v3751_v58 = vmul.f32 %v6040_v17, %v3727_v44  ;;  %v3757_v32 = vmul.f32 %v3756_v19, %v3750_v23  ;;  %v3847_v44 = vrot.slane %v6070_v11, %v6518_v1 }
0x1aee   : > { %v3758_v62 = vmul.f32 %v3756_v19, %v3751_v58  ;;  %v3764_v61 = vadd.f32 %v3763_v60, %v3757_v32 }
0x1aef   : > { %v6042_v0 = vpop.eup %6041 }
0x1af0   : > { %v3752_v63 = vmul.f32 %v6042_v0, %v3728_v2  ;;  %v3765_v42 = vadd.f32 %v3763_v60, %v3758_v62  ;;  %v5902_v62 = vld [vmem:[%s7290_s2 + $0x38] sm:$0xff]  }
0x1af2   : > { %v3759_v49 = vmul.f32 %v3756_v19, %v3752_v63  ;;  %v3767_v47 = vpack.c.bf16 %v3765_v42, %v3764_v61 }
0x1af4   : > { %5681 = vmatprep.mubr.msk.bf16.mxu1 %vm307_vm0, %v3767_v47  ;;  %v3766_v50 = vadd.f32 %v3763_v60, %v3759_v49  ;;  %v5901_v60 = vld [vmem:[%s7290_s2 + $0x30] sm:$0xff]  }
0x1af6   : > { %v3768_v5 = vpack.c.bf16 %v3766_v50, %v3766_v50 }
0x1af8   : > { %5682 = vmatmul.mubr.msk.bf16.vlgmr.msra.gmra.mrb[92].mxu1 %vm307_vm0, %v3768_v5 }
0x1af9   : > { %5701 = vmatprep.mubr.msk.bf16.mxu1 %vm6087_vm12, %v6086_v40  ;;  %5698 = vmatpush3.bf16.msra.mxu1 %v5901_v60 }
0x1afa   : > { %5699 = vmatprep.subr.bf16.mxu1 %v6086_v40 }
0x1afd   : > { %5700 = vmatpush3.bf16.msra.mxu1 %v5902_v62 }
0x1afe   : > { %5705 = vmatprep.subr.bf16.mxu1 %v6086_v40 }
0x1bcb   : > { %v5683_v28 = vpop.f32.mrb[92].mxu1 }
0x1bcc   : > { %v3834_v39 = vadd.f32 %v5683_v28, %v3772_v41  ;;  %v3825_v4 = vpop.f32.mrb[93].mxu1  ;;  %v3978_v28 = vrot.slane %v6070_v11, %v6546_v57 }
0x1bcd   : > { %v3826_v53 = vadd.f32 %v3825_v4, %v3772_v41  ;;  %v5684_v6 = vpop.f32.mrb[94].mxu1 }
0x1bce   : > { %v3828_v20 = vpop.f32.mrb[95].mxu1  ;;  %v3841_v35 = vmax.f32 %v3834_v39, 0.0 }
0x1bcf   : > { %v3829_v29 = vadd.f32 %v3828_v20, %v3772_v41  ;;  %v3839_v18 = vmax.f32 %v3826_v53, 0.0 }
0x1bd0   : > { %v3843_v21 = vpack.c.bf16 %v3841_v35, %v3841_v35 }
0x1bd1   : > { %v3840_v22 = vmax.f32 %v3829_v29, 0.0 }
0x1bd3   : > { %v3842_v7 = vpack.c.bf16 %v3840_v22, %v3839_v18 }
0x1bd5   : > { %5693 = vmatprep.mubr.msk.bf16.mxu0 %vm1582_vm11, %v3842_v7 }
0x1bd6   : > { %5694 = vmatmul.mubr.msk.bf16.vlgmr.msra.gmra.mrb[80].mxu0 %vm1582_vm11, %v3843_v21 }
0x1bd7   : > { %5713 = vmatprep.mubr.msk.bf16.mxu0 %vm6087_vm12, %v6086_v40 }
0x1ca9   : > { %v5695_v15 = vpop.f32.mrb[80].mxu0 }
0x1caa   : > { %v3912_v36 = vpop.f32.mrb[81].mxu0  ;;  %v3921_v12 = vadd.f32 %v5695_v15, %v3847_v44  ;;  %v7112_v15 = vld [vmem:[%s7294_s6 + $0x18] sm:$0xff] }
0x1cab   : > { %v3913_v3 = vadd.f32 %v3912_v36, %v3847_v44  ;;  %v5696_v33 = vpop.f32.mrb[82].mxu0  ;;  %v4019_v36 = vrot.slane %v7112_v15, %v6173_v16 }
0x1cac   : > { %v3915_v2 = vpop.f32.mrb[83].mxu0  ;;  %v3928_v25 = vadd.f32 %v3921_v12, %v3766_v50 }
0x1cad   : > { %v3926_v13 = vadd.f32 %v3913_v3, %v3764_v61  ;;  %v3916_v59 = vadd.f32 %v3915_v2, %v3847_v44 }
0x1cae   : > { %v3935_v8 = vsel %vm307_vm0, %v3928_v25, 0.0 }
0x1caf   : > { %v3927_v14 = vadd.f32 %v3916_v59, %v3765_v42  ;;  %v3929_v9 = vsel %vm307_vm0, %v3926_v13, 0.0 }
0x1cb0   : > { %3930 = vadd.xlane.f32.xlu0 %v3929_v9 }
0x1cb1   : > { %v3932_v27 = vsel %vm307_vm0, %v3927_v14, 0.0 }
0x1cb2   : > { %3933 = vadd.xlane.f32.xlu1 %v3932_v27 }
0x1cb4   : > { %3936 = vadd.xlane.f32.xlu0 %v3935_v8 }
0x1d3d   : > { %v3931_v56 = vpop.xlane.xlu0 %3930 }
0x1d3e   : > { %v3938_v38 = vmul.f32 0.03125, %v3931_v56 }
0x1d3f   : > { %v3934_v37 = vpop.xlane.xlu1 %3933 }
0x1d40   : > { %v3941_v30 = vsub.f32 %v3926_v13, %v3938_v38  ;;  %v3939_v45 = vmul.f32 0.03125, %v3934_v37 }
0x1d41   : > { %v3937_v46 = vpop.xlane.xlu0 %3936 }
0x1d42   : > { %v3942_v52 = vsub.f32 %v3927_v14, %v3939_v45  ;;  %v3940_v55 = vmul.f32 0.03125, %v3937_v46  ;;  %v3944_v51 = vmul.f32 %v3941_v30, %v3941_v30 }
0x1d44   : > { %v3943_v19 = vsub.f32 %v3928_v25, %v3940_v55  ;;  %v3947_v43 = vsel %vm307_vm0, %v3944_v51, 0.0  ;;  %v3945_v23 = vmul.f32 %v3942_v52, %v3942_v52 }
0x1d45   : > { %3948 = vadd.xlane.f32.xlu1 %v3947_v43 }
0x1d46   : > { %v3950_v17 = vsel %vm307_vm0, %v3945_v23, 0.0  ;;  %v3946_v58 = vmul.f32 %v3943_v19, %v3943_v19 }
0x1d47   : > { %3951 = vadd.xlane.f32.xlu0 %v3950_v17 }
0x1d48   : > { %v3953_v32 = vsel %vm307_vm0, %v3946_v58, 0.0 }
0x1d49   : > { %3954 = vadd.xlane.f32.xlu1 %v3953_v32 }
0x1dd2   : > { %v3949_v0 = vpop.xlane.xlu1 %3948 }
0x1dd3   : > { %v3956_v63 = vmul.f32 0.03125, %v3949_v0 }
0x1dd4   : > { %v3952_v61 = vpop.xlane.xlu0 %3951 }
0x1dd5   : > { %v3959_v42 = vadd.f32 1e-05, %v3956_v63  ;;  %v3957_v49 = vmul.f32 0.03125, %v3952_v61 }
0x1dd6   : > { %v3955_v47 = vpop.xlane.xlu1 %3954 }
0x1dd7   : > { %6043 = vrsqrt.f32 %v3959_v42  ;;  %v3960_v50 = vadd.f32 1e-05, %v3957_v49  ;;  %v3958_v5 = vmul.f32 0.03125, %v3955_v47 }
0x1dd9   : > { %6045 = vrsqrt.f32 %v3960_v50  ;;  %v3961_v10 = vadd.f32 1e-05, %v3958_v5 }
0x1ddb   : > { %6047 = vrsqrt.f32 %v3961_v10 }
0x1de1   : > { %v6044_v41 = vpop.eup %6043 }
0x1de2   : > { %v3965_v39 = vmul.f32 %v6044_v41, %v3941_v30 }
0x1de3   : > { %v6046_v4 = vpop.eup %6045 }
0x1de4   : > { %v3972_v53 = vmul.f32 %v3971_v24, %v3965_v39  ;;  %v3966_v6 = vmul.f32 %v6046_v4, %v3942_v52 }
0x1de5   : > { %v6048_v20 = vpop.eup %6047 }
0x1de6   : > { %v3979_v29 = vadd.f32 %v3978_v28, %v3972_v53  ;;  %v3973_v35 = vmul.f32 %v3971_v24, %v3966_v6  ;;  %v3967_v18 = vmul.f32 %v6048_v20, %v3943_v19 }
0x1de8   : > { %3985 = vst.msk [vmem:[#allocation3] sm:$0x3] %vm1696_vm13, %v3979_v29  ;;  %v3980_v22 = vadd.f32 %v3978_v28, %v3973_v35  ;;  %v3974_v7 = vmul.f32 %v3971_v24, %v3967_v18 }
0x1de9   : > { %3982 = vst.msk [vmem:[#allocation2] sm:$0xff] %vm307_vm0, %v3979_v29 }
0x1dea   : > { %3986 = vst.msk [vmem:[#allocation3 + $0x1] sm:$0x6] %vm1698_vm14, %v3980_v22  ;;  %v3981_v21 = vadd.f32 %v3978_v28, %v3974_v7 }
0x1deb   : > { %3983 = vst.msk [vmem:[#allocation2 + $0x8] sm:$0xff] %vm307_vm0, %v3980_v22 }
0x1dec   : > { %3987 = vst.msk [vmem:[#allocation3 + $0x2] sm:$0xc] %vm1700_vm15, %v3981_v21 }
0x1ded   : > { %3984 = vst.msk [vmem:[#allocation2 + $0x10] sm:$0xff] %vm307_vm0, %v3981_v21 }
0x1df3   : > { %v7102_v11 = vld [vmem:[#allocation3] sm:$0x3f] }
0x1df4   : > { %v4015_v44 = vpack.c.bf16 %v7102_v11, %v7102_v11 }
0x1df6   : > { %5702 = vmatmul.mubr.msk.bf16.vlgmr.msra.gmra.mrb[96].mxu1 %vm307_vm0, %v4015_v44 }
0x1df7   : > { %5707 = vmatprep.mubr.msk.bf16.mxu1 %vm6087_vm12, %v6086_v40 }
0x1ec9   : > { %v4069_v12 = vpop.f32.mrb[96].mxu1 }
0x1eca   : > { %v4070_v3 = vadd.f32 %v4069_v12, %v4019_v36  ;;  %v5703_v33 = vpop.f32.mrb[97].mxu1 }
0x1ecb   : > { %v4072_v2 = vpop.f32.mrb[98].mxu1 }
0x1ecc   : > { %4079 = vrot.lane.b32.xlu1 %v4070_v3, %s6079_s16  ;;  %4076 = vrot.lane.b32.xlu0 %v4070_v3, %s6080_s17  ;;  %v5704_v13 = vpop.f32.mrb[99].mxu1  ;;  %v7118_v59 = vpack.c.bf16 %v4070_v3, %v4070_v3 }
0x1ed0   : > { %4082 = vrot.lane.b32.xlu1 %v4070_v3, %s6081_s18  ;;  %4090 = vrot.lane.b32.xlu0 %v7118_v59, %s6082_s19  ;;  %s292_s18 = scalar_lea.vmem %s7295_s7, %s5829_s30 }
0x1f3e   : > { %v4080_v25 = vpop.permute.xlu1 %4079  ;;  %v4077_v14 = vpop.permute.xlu0 %4076 }
0x1f3f   : > { %v7123_v9 = vpack.c.bf16 %v4080_v25, %v4080_v25  ;;  %v7125_v16 = vpack.c.bf16 %v4077_v14, %v4077_v14 }
0x1f41   : > { %4139 = vrot.lane.b32.xlu1 %v7125_v16, %s6082_s19  ;;  %4188 = vrot.lane.b32.xlu0 %v7123_v9, %s6082_s19 }
0x1f42   : > { %v4083_v27 = vpop.permute.xlu1 %4082  ;;  %v4091_v8 = vpop.permute.xlu0 %4090 }
0x1f43   : > { %v7131_v56 = vpack.c.bf16 %v4083_v27, %v4083_v27  ;;  %v4096_v38 = vsel %vm483_vm1, %v4091_v8, 0 }
0x1f44   : > { %5706 = vmatpush3.bf16.xpose.msra.mxu1 %v4096_v38 }
0x1f45   : > { %4237 = vrot.lane.b32.xlu1 %v7131_v56, %s6082_s19  ;;  %5717 = vmatprep.subr.bf16.mxu1 %v6086_v40 }
0x1f4b   : > { %5708 = vmatmul.mubr.msk.bf16.vlgmr.msra.gmra.mrb[100].mxu1 %vm483_vm1, %v7118_v59 }
0x1f4c   : > { %5719 = vmatprep.mubr.msk.bf16.mxu1 %vm6087_vm12, %v6086_v40 }
0x1fb3   : > { %v4140_v37 = vpop.permute.xlu1 %4139  ;;  %v4189_v30 = vpop.permute.xlu0 %4188 }
0x1fb4   : > { %v4145_v45 = vsel %vm483_vm1, %v4140_v37, 0  ;;  %v4194_v46 = vsel %vm483_vm1, %v4189_v30, 0 }
0x1fb5   : > { %5712 = vmatpush3.bf16.xpose.msra.mxu0 %v4145_v45  ;;  %5718 = vmatpush3.bf16.xpose.msra.mxu1 %v4194_v46 }
0x1fb6   : > { %5723 = vmatprep.subr.bf16.mxu0 %v6086_v40  ;;  %5729 = vmatprep.subr.bf16.mxu1 %v6086_v40 }
0x1fb7   : > { %v4238_v52 = vpop.permute.xlu1 %4237 }
0x1fb8   : > { %v4243_v55 = vsel %vm483_vm1, %v4238_v52, 0 }
0x1fbc   : > { %5714 = vmatmul.mubr.msk.bf16.vlgmr.msra.gmra.mrb[84].mxu0 %vm483_vm1, %v7125_v16  ;;  %5720 = vmatmul.mubr.msk.bf16.vlgmr.msra.gmra.mrb[104].mxu1 %vm483_vm1, %v7123_v9 }
0x1fbd   : > { %5724 = vmatpush3.bf16.xpose.msra.mxu0 %v4243_v55  ;;  %5725 = vmatprep.mubr.msk.bf16.mxu0 %vm6087_vm12, %v6086_v40 }
0x1fbe   : > { %5731 = vmatprep.mubr.msk.bf16.mxu1 %vm6087_vm12, %v6086_v40  ;;  %5735 = vmatprep.subr.bf16.mxu0 %v6086_v40 }
0x1fc4   : > { %5726 = vmatmul.mubr.msk.bf16.vlgmr.msra.gmra.mrb[88].mxu0 %vm483_vm1, %v7131_v56 }
0x1fc5   : > { %5737 = vmatprep.mubr.msk.bf16.mxu0 %vm6087_vm12, %v6086_v40 }
0x201e   : > { %v4132_v51 = vpop.f32.mrb[100].mxu1 }
0x201f   : > { %v4285_v19 = vmul.f32 0.35355338, %v4132_v51  ;;  %v5709_v43 = vpop.f32.mrb[101].mxu1 }
0x2020   : > { %v4135_v23 = vpop.f32.mrb[102].mxu1 }
0x2021   : > { %v5710_v17 = vpop.f32.mrb[103].mxu1  ;;  %v4289_v58 = vsel %vm2003_vm2, %v4285_v19, -inf }
0x2022   : > { %4290 = vmax.xlane.f32.xlu0 %v4289_v58 }
0x208f   : > { %v4181_v32 = vpop.f32.mrb[84].mxu0  ;;  %v4230_v60 = vpop.f32.mrb[104].mxu1 }
0x2090   : > { %v4286_v62 = vmul.f32 0.35355338, %v4181_v32  ;;  %v4287_v0 = vmul.f32 0.35355338, %v4230_v60  ;;  %v5715_v63 = vpop.f32.mrb[85].mxu0  ;;  %v5721_v61 = vpop.f32.mrb[105].mxu1 }
0x2091   : > { %v4184_v42 = vpop.f32.mrb[86].mxu0  ;;  %v4233_v49 = vpop.f32.mrb[106].mxu1  ;;  %v5137_v60 = vld [vmem:[%s7291_s3 + $0x30] sm:$0xf] }
0x2092   : > { %v5716_v47 = vpop.f32.mrb[87].mxu0  ;;  %v5722_v50 = vpop.f32.mrb[107].mxu1  ;;  %v4292_v5 = vsel %vm2003_vm2, %v4286_v62, -inf  ;;  %v4295_v10 = vsel %vm2003_vm2, %v4287_v0, -inf  ;;  %v4537_v61 = vsel %vm918_vm10, %v5137_v60, 0 }
0x2093   : > { %4293 = vmax.xlane.f32.xlu1 %v4292_v5  ;;  %4296 = vmax.xlane.f32.xlu0 %v4295_v10  ;;  %v5138_v5 = vld [vmem:[%s7291_s3 + $0x34] sm:$0xf] }
0x2094   : > { %v4583_v10 = vsel %vm918_vm10, %v5138_v5, 0 }
0x2097   : > { %v4279_v24 = vpop.f32.mrb[88].mxu0 }
0x2098   : > { %v4288_v41 = vmul.f32 0.35355338, %v4279_v24  ;;  %v5727_v28 = vpop.f32.mrb[89].mxu0  ;;  %v5139_v24 = vld [vmem:[%s7291_s3 + $0x38] sm:$0xf] }
0x2099   : > { %v4282_v39 = vpop.f32.mrb[90].mxu0 }
0x209a   : > { %v5728_v4 = vpop.f32.mrb[91].mxu0  ;;  %v4298_v53 = vsel %vm2003_vm2, %v4288_v41, -inf }
0x209b   : > { %4299 = vmax.xlane.f32.xlu0 %v4298_v53  ;;  %v4629_v4 = vsel %vm918_vm10, %v5139_v24, 0 }
0x20a4   : > { %4337 = vrot.lane.b32.xlu1 %v7118_v59, %s6085_s20 }
0x20af   : > { %v4291_v6 = vpop.xlane.xlu0 %4290 }
0x20b0   : > { %v4301_v20 = vsub.f32 %v4285_v19, %v4291_v6 }
0x20b2   : > { %v4305_v29 = vmul.f32 1.442695, %v4301_v20  ;;  %v5140_v20 = vld [vmem:[%s7291_s3 + $0x3c] sm:$0xf] }
0x20b4   : > { %6049 = vpow2.f32 %v4305_v29 }
0x20be   : > { %v6050_v35 = vpop.eup %6049 }
0x20bf   : > { %v4313_v18 = vsel %vm2003_vm2, %v6050_v35, 0.0 }
0x20c8   : > { %4314 = vadd.xlane.f32.xlu1 %v4313_v18 }
0x2120   : > { %v4294_v22 = vpop.xlane.xlu1 %4293  ;;  %v4297_v7 = vpop.xlane.xlu0 %4296 }
0x2121   : > { %v4302_v21 = vsub.f32 %v4286_v62, %v4294_v22  ;;  %v4303_v44 = vsub.f32 %v4287_v0, %v4297_v7 }
0x2123   : > { %v4307_v36 = vmul.f32 1.442695, %v4302_v21  ;;  %v4309_v12 = vmul.f32 1.442695, %v4303_v44  ;;  %v4675_v44 = vsel %vm918_vm10, %v5140_v20, 0  ;;  %v4746_v20 = vrot.slane %v7112_v15, %v6488_v31  ;;  %v5908_v31 = vld [vmem:[%s7293_s5 + $0x78] sm:$0xff]  }
0x2124   : > { %v4338_v3 = vpop.permute.xlu1 %4337 }
0x2125   : > { %6051 = vpow2.f32 %v4307_v36  ;;  %v4343_v33 = vsel %vm2058_vm3, %v4338_v3, 0 }
0x2126   : > { %6053 = vpow2.f32 %v4309_v12  ;;  %5730 = vmatpush3.bf16.msra.mxu1 %v4343_v33 }
0x2127   : > { %5741 = vmatprep.subr.bf16.mxu1 %v6086_v40 }
0x2128   : > { %v4300_v2 = vpop.xlane.xlu0 %4299 }
0x2129   : > { %v4304_v13 = vsub.f32 %v4288_v41, %v4300_v2 }
0x212b   : > { %v4311_v59 = vmul.f32 1.442695, %v4304_v13 }
0x212d   : > { %6055 = vpow2.f32 %v4311_v59 }
0x212f   : > { %v6052_v25 = vpop.eup %6051 }
0x2130   : > { %v6054_v14 = vpop.eup %6053  ;;  %v4316_v27 = vsel %vm2003_vm2, %v6052_v25, 0.0 }
0x2131   : > { %4317 = vadd.xlane.f32.xlu0 %v4316_v27  ;;  %v4319_v8 = vsel %vm2003_vm2, %v6054_v14, 0.0 }
0x2132   : > { %4320 = vadd.xlane.f32.xlu1 %v4319_v8 }
0x2137   : > { %v6056_v38 = vpop.eup %6055 }
0x2138   : > { %v4322_v37 = vsel %vm2003_vm2, %v6056_v38, 0.0 }
0x2139   : > { %4323 = vadd.xlane.f32.xlu0 %v4322_v37 }
0x2143   : > { %4433 = vrot.lane.b32.xlu1 %v7123_v9, %s6085_s20 }
0x2147   : > { %4481 = vrot.lane.b32.xlu1 %v7131_v56, %s6085_s20 }
0x214f   : > { %4385 = vrot.lane.b32.xlu0 %v7125_v16, %s6085_s20 }
0x2155   : > { %v4315_v30 = vpop.xlane.xlu1 %4314 }
0x2156   : > { %6057 = vrcp.f32 %v4315_v30 }
0x2160   : > { %v6058_v45 = vpop.eup %6057 }
0x2161   : > { %v4329_v46 = vmul.f32 %v6058_v45, %v6050_v35 }
0x2163   : > { %v4333_v52 = vpack.c.bf16 %v4329_v46, %v4329_v46 }
0x2165   : > { %5732 = vmatmul.mubr.msk.bf16.vlgmr.msra.gmra.mrb[108].mxu1 %vm2054_vm4, %v4333_v52 }
0x2166   : > { %5743 = vmatprep.mubr.msk.bf16.mxu1 %vm6087_vm12, %v6086_v40 }
0x21be   : > { %v4318_v55 = vpop.xlane.xlu0 %4317 }
0x21bf   : > { %v4321_v51 = vpop.xlane.xlu1 %4320  ;;  %6059 = vrcp.f32 %v4318_v55 }
0x21c0   : > { %6061 = vrcp.f32 %v4321_v51 }
0x21c3   : > { %v4434_v9 = vpop.permute.xlu1 %4433 }
0x21c4   : > { %v4439_v56 = vsel %vm2058_vm3, %v4434_v9, 0 }
0x21c5   : > { %5742 = vmatpush3.bf16.msra.mxu1 %v4439_v56 }
0x21c6   : > { %v4324_v19 = vpop.xlane.xlu0 %4323  ;;  %5753 = vmatprep.subr.bf16.mxu1 %v6086_v40 }
0x21c7   : > { %6063 = vrcp.f32 %v4324_v19  ;;  %v4482_v62 = vpop.permute.xlu1 %4481 }
0x21c8   : > { %v4487_v42 = vsel %vm2058_vm3, %v4482_v62, 0 }
0x21c9   : > { %v6060_v16 = vpop.eup %6059 }
0x21ca   : > { %v6062_v43 = vpop.eup %6061  ;;  %v4330_v23 = vmul.f32 %v6060_v16, %v6052_v25  ;;  %v4386_v17 = vpop.permute.xlu0 %4385 }
0x21cb   : > { %v4331_v58 = vmul.f32 %v6062_v43, %v6054_v14  ;;  %v4391_v32 = vsel %vm2058_vm3, %v4386_v17, 0 }
0x21cc   : > { %5736 = vmatpush3.bf16.msra.mxu0 %v4391_v32  ;;  %v4334_v0 = vpack.c.bf16 %v4330_v23, %v4330_v23  ;;  %v4727_v32 = vrot.slane %v7112_v15, %v6459_v26  ;;  %v5903_v26 = vld [vmem:[%s7292_s4 + $0x30] sm:$0xff]  }
0x21cd   : > { %v4335_v63 = vpack.c.bf16 %v4331_v58, %v4331_v58  ;;  %5747 = vmatprep.subr.bf16.mxu0 %v6086_v40 }
0x21cf   : > { %5744 = vmatmul.mubr.msk.bf16.vlgmr.msra.gmra.mrb[112].mxu1 %vm2054_vm4, %v4335_v63  ;;  %5738 = vmatmul.mubr.msk.bf16.vlgmr.msra.gmra.mrb[92].mxu0 %vm2054_vm4, %v4334_v0 }
0x21d0   : > { %5748 = vmatpush3.bf16.msra.mxu0 %v4487_v42  ;;  %5749 = vmatprep.mubr.msk.bf16.mxu0 %vm6087_vm12, %v6086_v40 }
0x21d1   : > { %v6064_v49 = vpop.eup %6063  ;;  %5754 = vmatpush3.bf16.msra.mxu1 %v4537_v61  ;;  %5755 = vmatprep.mubr.msk.bf16.mxu1 %vm6087_vm12, %v6086_v40 }
0x21d2   : > { %v4332_v47 = vmul.f32 %v6064_v49, %v6056_v38  ;;  %5765 = vmatprep.subr.bf16.mxu1 %v6086_v40  ;;  %5759 = vmatprep.subr.bf16.mxu0 %v6086_v40 }
0x21d4   : > { %v4336_v50 = vpack.c.bf16 %v4332_v47, %v4332_v47 }
0x21d7   : > { %5750 = vmatmul.mubr.msk.bf16.vlgmr.msra.gmra.mrb[96].mxu0 %vm2054_vm4, %v4336_v50 }
0x21d8   : > { %5761 = vmatprep.mubr.msk.bf16.mxu0 %vm6087_vm12, %v6086_v40  ;;  %5760 = vmatpush3.bf16.msra.mxu0 %v4583_v10 }
0x21d9   : > { %5771 = vmatprep.subr.bf16.mxu0 %v6086_v40 }
0x2238   : > { %v4379_v41 = vpop.f32.mrb[108].mxu1 }
0x2239   : > { %v4529_v28 = vpack.c.bf16 %v4379_v41, %v4379_v41  ;;  %v5733_v39 = vpop.f32.mrb[109].mxu1 }
0x223a   : > { %v4382_v53 = vpop.f32.mrb[110].mxu1  ;;  %v5906_v39 = vld [vmem:[%s7293_s5 + $0x68] sm:$0xff]  }
0x223b   : > { %v5734_v6 = vpop.f32.mrb[111].mxu1  ;;  %5756 = vmatmul.mubr.msk.bf16.vlgmr.msra.gmra.mrb[116].mxu1 %vm483_vm1, %v4529_v28  ;;  %v5904_v28 = vld [vmem:[%s7292_s4 + $0x38] sm:$0xff]  }
0x223c   : > { %5766 = vmatpush3.bf16.msra.mxu1 %v4629_v4  ;;  %5767 = vmatprep.mubr.msk.bf16.mxu1 %vm6087_vm12, %v6086_v40 }
0x223d   : > { %5777 = vmatprep.subr.bf16.mxu1 %v6086_v40 }
0x22a2   : > { %v4475_v29 = vpop.f32.mrb[112].mxu1  ;;  %v4427_v35 = vpop.f32.mrb[92].mxu0 }
0x22a3   : > { %v4531_v18 = vpack.c.bf16 %v4475_v29, %v4475_v29  ;;  %v4530_v22 = vpack.c.bf16 %v4427_v35, %v4427_v35  ;;  %v5745_v7 = vpop.f32.mrb[113].mxu1  ;;  %v5739_v21 = vpop.f32.mrb[93].mxu0 }
0x22a4   : > { %v4478_v36 = vpop.f32.mrb[114].mxu1  ;;  %v4430_v12 = vpop.f32.mrb[94].mxu0 }
0x22a5   : > { %v5746_v3 = vpop.f32.mrb[115].mxu1  ;;  %5768 = vmatmul.mubr.msk.bf16.vlgmr.msra.gmra.mrb[120].mxu1 %vm483_vm1, %v4531_v18  ;;  %v5740_v33 = vpop.f32.mrb[95].mxu0  ;;  %5762 = vmatmul.mubr.msk.bf16.vlgmr.msra.gmra.mrb[100].mxu0 %vm483_vm1, %v4530_v22  ;;  %v4751_v18 = vrot.slane %v7112_v15, %v6493_v34  ;;  %v4757_v34 = vrot.slane %v7112_v15, %v6511_v54 }
0x22a6   : > { %5772 = vmatpush3.bf16.msra.mxu0 %v4675_v44  ;;  %5773 = vmatprep.mubr.msk.bf16.mxu0 %vm6087_vm12, %v6086_v40  ;;  %v5907_v44 = vld [vmem:[%s7293_s5 + $0x70] sm:$0xff]  }
0x22a7   : > { %5781 = vmatprep.mubr.msk.bf16.mxu1 %vm6087_vm12, %v6086_v40  ;;  %5785 = vmatprep.subr.bf16.mxu0 %v6086_v40 }
0x22a8   : > { %5778 = vmatpush3.bf16.msra.mxu1 %v5903_v26 }
0x22a9   : > { %5779 = vmatprep.subr.bf16.mxu1 %v6086_v40 }
0x22aa   : > { %v4523_v2 = vpop.f32.mrb[96].mxu0 }
0x22ab   : > { %v4532_v13 = vpack.c.bf16 %v4523_v2, %v4523_v2  ;;  %v5751_v59 = vpop.f32.mrb[97].mxu0 }
0x22ac   : > { %v4526_v25 = vpop.f32.mrb[98].mxu0  ;;  %5780 = vmatpush3.bf16.msra.mxu1 %v5904_v28 }
0x22ad   : > { %v5752_v14 = vpop.f32.mrb[99].mxu0  ;;  %5774 = vmatmul.mubr.msk.bf16.vlgmr.msra.gmra.mrb[104].mxu0 %vm483_vm1, %v4532_v13 }
0x22ae   : > { %5793 = vmatprep.mubr.msk.bf16.mxu0 %vm6087_vm12, %v6086_v40 }
0x230e   : > { %v4573_v27 = vpop.f32.mrb[116].mxu1 }
0x230f   : > { %v5757_v8 = vpop.f32.mrb[117].mxu1  ;;  %v4717_v46 = vsel %vm2434_vm5, %v4573_v27, 0.0 }
0x2310   : > { %v4576_v38 = vpop.f32.mrb[118].mxu1 }
0x2311   : > { %v5758_v37 = vpop.f32.mrb[119].mxu1 }
0x2378   : > { %v4665_v30 = vpop.f32.mrb[120].mxu1  ;;  %v4619_v45 = vpop.f32.mrb[100].mxu0 }
0x2379   : > { %v4718_v52 = vsel %vm2434_vm5, %v4619_v45, 0.0  ;;  %v5769_v55 = vpop.f32.mrb[121].mxu1  ;;  %v5763_v51 = vpop.f32.mrb[101].mxu0  ;;  %v4720_v16 = vsel %vm2434_vm5, %v4665_v30, 0.0 }
0x237a   : > { %v4719_v9 = vadd.f32 %v4718_v52, %v4717_v46  ;;  %v4668_v56 = vpop.f32.mrb[122].mxu1  ;;  %v4622_v19 = vpop.f32.mrb[102].mxu0 }
0x237b   : > { %v5770_v43 = vpop.f32.mrb[123].mxu1  ;;  %v5764_v23 = vpop.f32.mrb[103].mxu0  ;;  %v4903_v56 = vrot.slane %v7112_v15, %v6543_v48 }
0x237c   : > { %v4721_v17 = vadd.f32 %v4720_v16, %v4719_v9  ;;  %v4908_v16 = vrot.slane %v7112_v15, %v6546_v57 }
0x2380   : > { %v4711_v58 = vpop.f32.mrb[104].mxu0 }
0x2381   : > { %v4722_v60 = vsel %vm2434_vm5, %v4711_v58, 0.0  ;;  %v5775_v62 = vpop.f32.mrb[105].mxu0 }
0x2382   : > { %v4723_v0 = vadd.f32 %v4722_v60, %v4721_v17  ;;  %v4714_v63 = vpop.f32.mrb[106].mxu0 }
0x2383   : > { %v5776_v61 = vpop.f32.mrb[107].mxu0 }
0x2384   : > { %v4728_v42 = vadd.f32 %v4727_v32, %v4723_v0 }
0x2386   : > { %v4729_v49 = vadd.f32 %v4728_v42, %v7102_v11  ;;  %v5905_v11 = vld [vmem:[%s7293_s5 + $0x60] sm:$0xff]  }
0x2387   : > { %5786 = vmatpush3.bf16.msra.mxu0 %v5905_v11 }
0x2388   : > { %v4730_v47 = vsel %vm2434_vm5, %v4729_v49, 0.0  ;;  %5787 = vmatprep.subr.bf16.mxu0 %v6086_v40 }
0x2389   : > { %4731 = vadd.xlane.f32.xlu0 %v4730_v47 }
0x238b   : > { %5788 = vmatpush3.bf16.msra.mxu0 %v5906_v39 }
0x238c   : > { %5789 = vmatprep.subr.bf16.mxu0 %v6086_v40 }
0x238f   : > { %5790 = vmatpush3.bf16.msra.mxu0 %v5907_v44 }
0x2390   : > { %5791 = vmatprep.subr.bf16.mxu0 %v6086_v40  ;;  %v4818_v40 = vrot.slane %v7112_v15, %v6518_v1 }
0x2393   : > { %5792 = vmatpush3.bf16.msra.mxu0 %v5908_v31 }
0x2416   : > { %v4732_v50 = vpop.xlane.xlu0 %4731 }
0x2417   : > { %v4733_v5 = vmul.f32 0.03125, %v4732_v50 }
0x2419   : > { %v4734_v10 = vsub.f32 %v4729_v49, %v4733_v5 }
0x241b   : > { %v4735_v24 = vmul.f32 %v4734_v10, %v4734_v10 }
0x241d   : > { %v4736_v41 = vsel %vm2434_vm5, %v4735_v24, 0.0 }
0x241e   : > { %4737 = vadd.xlane.f32.xlu1 %v4736_v41 }
0x24ab   : > { %v4738_v4 = vpop.xlane.xlu1 %4737 }
0x24ac   : > { %v4739_v53 = vmul.f32 0.03125, %v4738_v4 }
0x24ae   : > { %v4740_v6 = vadd.f32 1e-05, %v4739_v53 }
0x24b0   : > { %6065 = vrsqrt.f32 %v4740_v6 }
0x24ba   : > { %v6066_v29 = vpop.eup %6065 }
0x24bb   : > { %v4742_v35 = vmul.f32 %v6066_v29, %v4734_v10 }
0x24bd   : > { %v4747_v22 = vmul.f32 %v4746_v20, %v4742_v35 }
0x24bf   : > { %v4752_v7 = vadd.f32 %v4751_v18, %v4747_v22 }
0x24c1   : > { %v4753_v21 = vpack.c.bf16 %v4752_v7, %v4752_v7 }
0x24c3   : > { %5782 = vmatmul.mubr.msk.bf16.vlgmr.msra.gmra.mrb[124].mxu1 %vm307_vm0, %v4753_v21 }
0x2596   : > { %v4807_v36 = vpop.f32.mrb[124].mxu1 }
0x2597   : > { %v4808_v12 = vadd.f32 %v4807_v36, %v4757_v34  ;;  %v5783_v3 = vpop.f32.mrb[125].mxu1 }
0x2598   : > { %v4810_v33 = vpop.f32.mrb[126].mxu1 }
0x2599   : > { %v4813_v2 = vmax.f32 %v4808_v12, 0.0  ;;  %v5784_v13 = vpop.f32.mrb[127].mxu1 }
0x259b   : > { %v4814_v59 = vpack.c.bf16 %v4813_v2, %v4813_v2 }
0x259d   : > { %5794 = vmatmul.mubr.msk.bf16.vlgmr.msra.gmra.mrb[108].mxu0 %vm1582_vm11, %v4814_v59 }
0x2670   : > { %v4880_v25 = vpop.f32.mrb[108].mxu0 }
0x2671   : > { %v4881_v14 = vadd.f32 %v4880_v25, %v4818_v40  ;;  %v5795_v27 = vpop.f32.mrb[109].mxu0 }
0x2672   : > { %v4883_v8 = vpop.f32.mrb[110].mxu0 }
0x2673   : > { %v4886_v38 = vadd.f32 %v4881_v14, %v4752_v7  ;;  %v5796_v37 = vpop.f32.mrb[111].mxu0 }
0x2675   : > { %v4887_v54 = vsel %vm2434_vm5, %v4886_v38, 0.0 }
0x2676   : > { %4888 = vadd.xlane.f32.xlu0 %v4887_v54 }
0x2703   : > { %v4889_v30 = vpop.xlane.xlu0 %4888 }
0x2704   : > { %v4890_v45 = vmul.f32 0.03125, %v4889_v30 }
0x2706   : > { %v4891_v46 = vsub.f32 %v4886_v38, %v4890_v45 }
0x2708   : > { %v4892_v52 = vmul.f32 %v4891_v46, %v4891_v46 }
0x270a   : > { %v4893_v55 = vsel %vm2434_vm5, %v4892_v52, 0.0 }
0x270b   : > { %4894 = vadd.xlane.f32.xlu0 %v4893_v55 }
0x2798   : > { %v4895_v51 = vpop.xlane.xlu0 %4894 }
0x2799   : > { %v4896_v9 = vmul.f32 0.03125, %v4895_v51 }
0x279b   : > { %v4897_v1 = vadd.f32 1e-05, %v4896_v9 }
0x279d   : > { %6067 = vrsqrt.f32 %v4897_v1 }
0x27a7   : > { %v6068_v19 = vpop.eup %6067 }
0x27a8   : > { %v4899_v43 = vmul.f32 %v6068_v19, %v4891_v46 }
0x27aa   : > { %v4904_v23 = vmul.f32 %v4903_v56, %v4899_v43 }
0x27ac   : > { %v4909_v17 = vadd.f32 %v4908_v16, %v4904_v23 }
0x27ae   : > { %4910 = vst.msk [vmem:[#allocation2] sm:$0x3] %vm1696_vm13, %v4909_v17 }
0x27af   : > { %4911 = vst.msk [vmem:[#allocation2 + $0x7] sm:$0xc] %vm1700_vm15, %v4909_v17 }
0x27b0   : > { %4912 = vst.msk [vmem:[#allocation2 + $0xe] sm:$0x30] %vm2630_vm6, %v4909_v17 }
0x27b5   : > { %v4913_v58 = vld [vmem:[#allocation2] sm:$0xff] }
0x27b6   : > { %v4914_v48 = vld [vmem:[#allocation2 + $0x8] sm:$0xff]  ;;  %4916 = vst.msk [vmem:[%s292_s18] sm:$0xff] %vm307_vm0, %v4913_v58 }
0x27b7   : > { %v4915_v32 = vld [vmem:[#allocation2 + $0x10] sm:$0xff]  ;;  %4917 = vst.msk [vmem:[%s292_s18 + $0x8] sm:$0xff] %vm307_vm0, %v4914_v48 }
0x27b8   : > { %4918 = vst.msk [vmem:[%s292_s18 + $0x10] sm:$0xff] %vm307_vm0, %v4915_v32 }
0x27b9 PF: > { %s17_s24 = sadd.s32 1, %s6077_s24  }
0x27ba   : > { %p14_p4 = scmp.ge.s32.totalorder %s17_s24, 4  }
0x27bc   :  { %16 = sbr.rel (!%p14_p4) target bundleno = 1 (0x1), region = 96 }

</bundles_post_ra>
